<compile_context>
chip_gen: v6e
topology: v6e:2x2x1
jax: 0.10.0
libtpu: 0.0.40
codegen_flags: <defaults>
</compile_context>

<pallas_src>
import functools

import jax
import jax.numpy as jnp
from jax.experimental import pallas as pl
from jax.experimental.pallas import tpu as pltpu

SELU_ALPHA = 1.6732632423543772848170429916717
SELU_SCALE = 1.0507009873554804934193349852946


def _round_up(x, m):
    return -(-x // m) * m


def _choose_tile(n_out):
    # Lane-dense tile along the (pooled) output-length axis: multiple of 128,
    # capped at 512 so blocks stay small on every generation (v7x: 64 MiB VMEM).
    return min(512, _round_up(max(n_out, 1), 128))


# ----------------------------------------------------------------------------
# Fused conv (+ optional pool) kernel
#   w_ref : (P*Cout, K)   bf16   K = Q*Cin*F, columns ordered (q, ci, r)
#   b_ref : (P*Cout, 1)   f32
#   xc/xn : (Cin*F, tLp)  bf16   current / next lane tile of the phase input
#   o_ref : (Cout, tLp)   f32    lane-dense output tile
# ----------------------------------------------------------------------------
def _conv_pool_kernel(w_ref, b_ref, *rest, Q, P, pool):
    o_ref = rest[-1]
    xc_ref = rest[0]

    if Q == 1:
        patches = xc_ref[...]                                    # (CinF, tLp)
    else:
        xn_ref = rest[1]
        tLp = xc_ref.shape[-1]
        full = jnp.concatenate([xc_ref[...], xn_ref[...]], axis=-1)  # halo
        # patch rows ordered (q, ci, r) -> matches the weight column order.
        parts = [full[:, q:q + tLp] for q in range(Q)]
        patches = jnp.concatenate(parts, axis=0)                 # (Q*CinF, tLp)

    # One MXU matmul per tile; f32 accumulation, f32 epilogue.
    acc = jnp.dot(w_ref[...], patches, preferred_element_type=jnp.float32)
    acc = acc + b_ref[...]            # bias broadcast over lanes
    acc = jnp.maximum(acc, 0.0)       # ReLU (matches relu-before-pool order)

    if P > 1:                         # fused MaxPool1d(P) / AvgPool1d(P)
        cout = acc.shape[0] // P
        r = acc[0:cout]
        for g in range(1, P):
            blk = acc[g * cout:(g + 1) * cout]
            r = jnp.maximum(r, blk) if pool == "max" else r + blk
        if pool == "avg":
            r = r * (1.0 / P)
        acc = r

    o_ref[...] = acc.astype(o_ref.dtype)


def _phase_weights(w, b, S, P, F, Q):
    """Reorder Conv1d weights for the phase-decomposed matmul.

    wstk[t*Cout + co, q*Cin*F + ci*F + r] = w[co, ci, F*q + r - S*t]  (else 0)
    """
    Cout, Cin, W = w.shape
    q = jnp.arange(Q)[:, None]
    r = jnp.arange(F)[None, :]
    base = F * q + r                                   # (Q, F)
    t = jnp.arange(P)[:, None, None]
    widx = base[None] - S * t                          # (P, Q, F)
    valid = (widx >= 0) & (widx < W)
    wg = w[:, :, jnp.clip(widx, 0, W - 1)]             # (Cout, Cin, P, Q, F)
    wg = jnp.where(valid[None, None], wg, 0.0)
    wstk = wg.transpose(2, 0, 3, 1, 4).reshape(P * Cout, Q * Cin * F)
    bstk = jnp.tile(b, P).reshape(P * Cout, 1)
    return wstk, bstk


def conv1d_pool(x, w, b, *, stride, pool="none", pool_k=4):
    """Conv1d(stride) [+ ReLU] [+ MaxPool1d/AvgPool1d(pool_k)] -> (B, Cout, Lp)."""
    B, Cin, L = x.shape
    Cout, Cin2, W = w.shape
    assert Cin == Cin2
    S = stride
    P = pool_k if pool != "none" else 1
    F = S * P                                   # phase factor
    Lout = (L - W) // S + 1                     # conv output length
    n_out = Lout // P                           # (pooled) output length
    Q = -(-(S * (P - 1) + W) // F)              # taps in the phase domain

    tLp = _choose_tile(n_out)
    assert Q <= tLp, "halo must fit inside one extra tile"
    n_tiles = -(-n_out // tLp)
    n_pad = n_tiles * tLp
    Mpad = n_pad + (tLp if Q > 1 else 0)        # +1 tile of halo for the "next" block
    CinF = Cin * F
    K = Q * CinF

    # ---- glue: phase-decompose the input (no W/stride im2col inflation) ----
    xb = x.astype(jnp.bfloat16)
    total = F * Mpad
    if total >= L:
        xb = jnp.pad(xb, ((0, 0), (0, 0), (0, total - L)))
    else:
        xb = xb[:, :, :total]
    xr = (xb.reshape(B, Cin, Mpad, F)
            .transpose(0, 1, 3, 2)
            .reshape(B, CinF, Mpad))            # xr[b, ci*F + r, m] = x[b, ci, F*m + r]

    wstk, bstk = _phase_weights(w, b, S, P, F, Q)
    wstk = wstk.astype(jnp.bfloat16)
    bstk = bstk.astype(jnp.float32)

    in_specs = [
        pl.BlockSpec((P * Cout, K), lambda bb, j: (0, 0)),            # weights
        pl.BlockSpec((P * Cout, 1), lambda bb, j: (0, 0)),            # bias
        pl.BlockSpec((None, CinF, tLp), lambda bb, j: (bb, 0, j)),    # current tile
    ]
    args = [wstk, bstk, xr]
    if Q > 1:  # halo: same array, next lane tile
        in_specs.append(pl.BlockSpec((None, CinF, tLp), lambda bb, j: (bb, 0, j + 1)))
        args.append(xr)

    out = pl.pallas_call(
        functools.partial(_conv_pool_kernel, Q=Q, P=P, pool=pool),
        out_shape=jax.ShapeDtypeStruct((B, Cout, n_pad), jnp.float32),
        grid=(B, n_tiles),
        in_specs=in_specs,
        out_specs=pl.BlockSpec((None, Cout, tLp), lambda bb, j: (bb, 0, j)),
        compiler_params=pltpu.CompilerParams(
            dimension_semantics=("parallel", "parallel")),
        cost_estimate=pl.CostEstimate(
            flops=2 * B * n_pad * (P * Cout) * K,
            transcendentals=0,
            bytes_accessed=(xr.size * 2 + wstk.size * 2
                            + B * Cout * n_pad * 4)),
    )(*args)
    return out[:, :, :n_out]


# ----------------------------------------------------------------------------
# Fused FC head: fc_1 (K-tiled accumulator) + SELU + fc_4 in the finalize step
# ----------------------------------------------------------------------------
def _fc_head_kernel(x_ref, w1_ref, b1_ref, w4_ref, b4_ref, o_ref, acc_ref):
    k = pl.program_id(0)

    @pl.when(k == 0)
    def _():
        acc_ref[...] = jnp.zeros_like(acc_ref)

    acc_ref[...] += jnp.dot(x_ref[...], w1_ref[...],
                            preferred_element_type=jnp.float32)

    @pl.when(k == pl.num_programs(0) - 1)
    def _():
        h = acc_ref[...] + b1_ref[...]
        h = SELU_SCALE * jnp.where(h > 0.0, h, SELU_ALPHA * (jnp.exp(h) - 1.0))
        out = jnp.sum(h * w4_ref[...], axis=-1, keepdims=True) + b4_ref[...]
        o_ref[...] = out.astype(o_ref.dtype)


def fc_head(x, fc1_w, fc1_b, fc4_w, fc4_b, *, tk=512):
    Bsz, K = x.shape
    N1 = fc1_w.shape[0]
    tk = min(tk, _round_up(K, 128))
    Kpad = _round_up(K, tk)
    nk = Kpad // tk

    xp = jnp.pad(x, ((0, 0), (0, Kpad - K))).astype(jnp.bfloat16)
    w1t = jnp.pad(fc1_w.T, ((0, Kpad - K), (0, 0))).astype(jnp.bfloat16)
    b1 = fc1_b.reshape(1, N1).astype(jnp.float32)
    w4 = fc4_w.reshape(1, N1).astype(jnp.float32)
    b4 = fc4_b.reshape(1, 1).astype(jnp.float32)

    return pl.pallas_call(
        _fc_head_kernel,
        out_shape=jax.ShapeDtypeStruct((Bsz, 1), jnp.float32),
        grid=(nk,),
        in_specs=[
            pl.BlockSpec((Bsz, tk), lambda k: (0, k)),
            pl.BlockSpec((tk, N1), lambda k: (k, 0)),
            pl.BlockSpec((1, N1), lambda k: (0, 0)),
            pl.BlockSpec((1, N1), lambda k: (0, 0)),
            pl.BlockSpec((1, 1), lambda k: (0, 0)),
        ],
        out_specs=pl.BlockSpec((Bsz, 1), lambda k: (0, 0)),
        scratch_shapes=[pltpu.VMEM((Bsz, N1), jnp.float32)],
        compiler_params=pltpu.CompilerParams(
            dimension_semantics=("arbitrary",)),
        cost_estimate=pl.CostEstimate(
            flops=2 * Bsz * Kpad * N1 + 2 * Bsz * N1,
            transcendentals=Bsz * N1,
            bytes_accessed=xp.size * 2 + w1t.size * 2 + Bsz * 4),
    )(xp, w1t, b1, w4, b4)


# ----------------------------------------------------------------------------
# ConvNet forward (mirrors the PyTorch forward exactly)
# ----------------------------------------------------------------------------
def convnet_forward(tokens, p):
    # TODO(synk): embedding lookup is a table gather + transpose/narrow; kept as
    # XLA glue feeding the Pallas conv kernels.
    x = p["embed"][tokens]                 # (B, L, 8)
    x = jnp.transpose(x, (0, 2, 1))        # torch.transpose(x, -1, -2) -> (B, 8, L)
    x = x[:, 4:8, :]                       # x.narrow(-2, 4, 4)
    x = conv1d_pool(x, p["conv1_w"], p["conv1_b"], stride=4, pool="none")
    x = conv1d_pool(x, p["conv2_w"], p["conv2_b"], stride=4, pool="max", pool_k=4)
    x = conv1d_pool(x, p["conv3_w"], p["conv3_b"], stride=8, pool="avg", pool_k=4)
    B, C, Lf = x.shape
    x = x.reshape(B, C * Lf)               # x.view(-1, 64*Lf)
    x = fc_head(x, p["fc1_w"], p["fc1_b"], p["fc4_w"], p["fc4_b"])
    return x                               # (B, 1)


# ----------------------------------------------------------------------------
# Pure-JAX references (sanity checks only)
# ----------------------------------------------------------------------------
def reference_forward(tokens, p, matmul_dtype=None):
    def cast(a):
        return a if matmul_dtype is None else a.astype(matmul_dtype)

    def conv(x, w, b, s):
        y = jax.lax.conv_general_dilated(
            cast(x), cast(w), (s,), "VALID",
            dimension_numbers=("NCH", "OIH", "NCH"),
            preferred_element_type=jnp.float32)
        return y + b[None, :, None]

    x = p["embed"][tokens]
    x = jnp.transpose(x, (0, 2, 1))[:, 4:8, :]
    x = jnp.maximum(conv(x, p["conv1_w"], p["conv1_b"], 4), 0.0)
    x = jnp.maximum(conv(x, p["conv2_w"], p["conv2_b"], 4), 0.0)
    B, C, L = x.shape
    x = x[:, :, :L // 4 * 4].reshape(B, C, L // 4, 4).max(-1)
    x = jnp.maximum(conv(x, p["conv3_w"], p["conv3_b"], 8), 0.0)
    B, C, L = x.shape
    x = x[:, :, :L // 4 * 4].reshape(B, C, L // 4, 4).mean(-1)
    x = x.reshape(B, -1)
    x = jnp.dot(cast(x), cast(p["fc1_w"].T),
                preferred_element_type=jnp.float32) + p["fc1_b"]
    x = SELU_SCALE * jnp.where(x > 0, x, SELU_ALPHA * (jnp.exp(x) - 1.0))
    x = x @ p["fc4_w"].T + p["fc4_b"]
    return x


# ----------------------------------------------------------------------------
# Deterministic parameter init (shapes from ConvNet.__init__, scaled window)
# ----------------------------------------------------------------------------
def init_params(key, window, fc1_in):
    ks = jax.random.split(key, 11)

    def uniform(k, shape, fan_in):
        bound = 1.0 / jnp.sqrt(jnp.float32(fan_in))
        return jax.random.uniform(k, shape, jnp.float32, -bound, bound)

    emb = jax.random.normal(ks[0], (257, 8), jnp.float32)
    emb = emb.at[0].set(0.0)               # padding_idx=0

    return {
        "embed": emb,
        "conv1_w": uniform(ks[1], (16, 4, window), 4 * window),
        "conv1_b": uniform(ks[2], (16,), 4 * window),
        "conv2_w": uniform(ks[3], (32, 16, window), 16 * window),
        "conv2_b": uniform(ks[4], (32,), 16 * window),
        "conv3_w": uniform(ks[5], (64, 32, window), 32 * window),
        "conv3_b": uniform(ks[6], (64,), 32 * window),
        "fc1_w": uniform(ks[7], (192, fc1_in), fc1_in),
        "fc1_b": uniform(ks[8], (192,), fc1_in),
        "fc4_w": uniform(ks[9], (1, 192), 192),
        "fc4_b": uniform(ks[10], (1,), 192),
        # TODO(synk): conv_4, fc_2, fc_3, sigmoid are not used in forward()
        # of the reference module -> intentionally omitted.
    }


if __name__ == "__main__":
    WINDOW = 8          # scaled down from 500
    B, L = 2, 4116      # scaled down from 2,000,000

    # derive the flattened feature size (64*959 in the original config)
    L1 = (L - WINDOW) // 4 + 1
    L2 = (L1 - WINDOW) // 4 + 1
    L3 = L2 // 4
    L4 = (L3 - WINDOW) // 8 + 1
    L5 = L4 // 4
    fc1_in = 64 * L5

    key = jax.random.PRNGKey(0)
    k_tok, k_par = jax.random.split(key)
    tokens = jax.random.randint(k_tok, (B, L), 0, 257, dtype=jnp.int32)
    params = init_params(k_par, WINDOW, fc1_in)

    fwd = jax.jit(convnet_forward)
    out = jax.block_until_ready(fwd(tokens, params))
    assert out.shape == (B, 1), out.shape

    # Check against a reference using the same bf16-operand / f32-accum policy
    # (tight), and against the full-f32 reference (loose, semantic sanity).
    ref_bf16 = reference_forward(tokens, params, matmul_dtype=jnp.bfloat16)
    ref_f32 = reference_forward(tokens, params)
    assert jnp.allclose(out, ref_bf16, rtol=2e-2, atol=2e-2), (out, ref_bf16)
    assert jnp.allclose(out, ref_f32, rtol=1e-1, atol=1e-1), (out, ref_f32)
    print("KERNEL_OK")
</pallas_src>

<mosaic_0001>
module attributes {stable_mosaic.version = 11 : i64} {
  func.func @_conv_pool_kernel(%arg0: i32, %arg1: i32, %arg2: memref<16x32xbf16, #tpu.memory_space<vmem>>, %arg3: memref<16x1xf32, #tpu.memory_space<vmem>>, %arg4: memref<1x16x512xbf16, #tpu.memory_space<vmem>>, %arg5: memref<1x16x512xbf16, #tpu.memory_space<vmem>>, %arg6: memref<1x16x512xf32, #tpu.memory_space<vmem>>) attributes {dimension_semantics = [#tpu.dimension_semantics<parallel>, #tpu.dimension_semantics<parallel>], iteration_bounds = array<i64: 2, 3>, scalar_prefetch = 0 : i64, scratch_operands = 0 : i64, tpu.core_type = #tpu.core_type<tc>, window_params = [{pipeline_mode = #tpu.pipeline_mode<synchronous>, transform_indices = @transform_0, window_bounds = array<i64: 16, 32>}, {pipeline_mode = #tpu.pipeline_mode<synchronous>, transform_indices = @transform_1, window_bounds = array<i64: 16, 1>}, {transform_indices = @transform_2, window_bounds = array<i64: 1, 16, 512>}, {transform_indices = @transform_3, window_bounds = array<i64: 1, 16, 512>}, {transform_indices = @transform_4, window_bounds = array<i64: 1, 16, 512>}]} {
    %c0 = arith.constant 0 : index
    %c0_0 = arith.constant 0 : index
    %c0_1 = arith.constant 0 : index
    %0 = vector.load %arg4[%c0, %c0_0, %c0_1] : memref<1x16x512xbf16, #tpu.memory_space<vmem>>, vector<1x16x512xbf16>
    %1 = vector.shape_cast %0 : vector<1x16x512xbf16> to vector<16x512xbf16>
    %c0_2 = arith.constant 0 : index
    %c0_3 = arith.constant 0 : index
    %c0_4 = arith.constant 0 : index
    %2 = vector.load %arg5[%c0_2, %c0_3, %c0_4] : memref<1x16x512xbf16, #tpu.memory_space<vmem>>, vector<1x16x512xbf16>
    %3 = vector.shape_cast %2 : vector<1x16x512xbf16> to vector<16x512xbf16>
    %4 = tpu.concatenate %1, %3 in 1 : vector<16x512xbf16>, vector<16x512xbf16> -> vector<16x1024xbf16>
    %5 = vector.extract_strided_slice %4 {offsets = [0, 0], sizes = [16, 512], strides = [1, 1]} : vector<16x1024xbf16> to vector<16x512xbf16>
    %6 = vector.extract_strided_slice %4 {offsets = [0, 1], sizes = [16, 512], strides = [1, 1]} : vector<16x1024xbf16> to vector<16x512xbf16>
    %7 = tpu.concatenate %5, %6 in 0 : vector<16x512xbf16>, vector<16x512xbf16> -> vector<32x512xbf16>
    %c0_5 = arith.constant 0 : index
    %c0_6 = arith.constant 0 : index
    %8 = vector.load %arg2[%c0_5, %c0_6] : memref<16x32xbf16, #tpu.memory_space<vmem>>, vector<16x32xbf16>
    %cst = arith.constant dense<0.000000e+00> : vector<16x512xf32>
    %9 = tpu.matmul %8, %7, %cst {dimension_numbers = #tpu.dot_dimension_numbers<[1], [0], [0], [1], [0, 0, 1, 1], [], []>} : vector<16x32xbf16>, vector<32x512xbf16>, vector<16x512xf32> -> vector<16x512xf32>
    %c0_7 = arith.constant 0 : index
    %c0_8 = arith.constant 0 : index
    %10 = vector.load %arg3[%c0_7, %c0_8] : memref<16x1xf32, #tpu.memory_space<vmem>>, vector<16x1xf32>
    %11 = vector.broadcast %10 : vector<16x1xf32> to vector<16x512xf32>
    %12 = arith.addf %9, %11 : vector<16x512xf32>
    %cst_9 = arith.constant 0.000000e+00 : f32
    %13 = vector.broadcast %cst_9 : f32 to vector<16x512xf32>
    %14 = arith.maximumf %12, %13 : vector<16x512xf32>
    %c0_10 = arith.constant 0 : index
    %c0_11 = arith.constant 0 : index
    %c0_12 = arith.constant 0 : index
    %15 = vector.load %arg6[%c0_10, %c0_11, %c0_12] : memref<1x16x512xf32, #tpu.memory_space<vmem>>, vector<1x16x512xf32>
    %16 = vector.shape_cast %15 : vector<1x16x512xf32> to vector<16x512xf32>
    %17 = vector.shape_cast %14 : vector<16x512xf32> to vector<1x16x512xf32>
    tpu.vector_store %arg6[%c0_10, %c0_11, %c0_12], %17 {strides = array<i32>} : memref<1x16x512xf32, #tpu.memory_space<vmem>>, vector<1x16x512xf32>,
    return
  }
  func.func @transform_0(%arg0: i32, %arg1: i32) -> (i32, i32) {
    %c0_i32 = arith.constant 0 : i32
    %c0_i32_0 = arith.constant 0 : i32
    %c0_i32_1 = arith.constant 0 : i32
    return %c0_i32, %c0_i32_0 : i32, i32
  }
  func.func @transform_1(%arg0: i32, %arg1: i32) -> (i32, i32) {
    %c0_i32 = arith.constant 0 : i32
    %c0_i32_0 = arith.constant 0 : i32
    %c0_i32_1 = arith.constant 0 : i32
    return %c0_i32, %c0_i32_0 : i32, i32
  }
  func.func @transform_2(%arg0: i32, %arg1: i32) -> (i32, i32, i32) {
    %c0_i32 = arith.constant 0 : i32
    %c0_i32_0 = arith.constant 0 : i32
    return %arg0, %c0_i32, %arg1 : i32, i32, i32
  }
  func.func @transform_3(%arg0: i32, %arg1: i32) -> (i32, i32, i32) {
    %c1_i32 = arith.constant 1 : i32
    %0 = arith.addi %arg1, %c1_i32 : i32
    %c0_i32 = arith.constant 0 : i32
    %c0_i32_0 = arith.constant 0 : i32
    return %arg0, %c0_i32, %0 : i32, i32, i32
  }
  func.func @transform_4(%arg0: i32, %arg1: i32) -> (i32, i32, i32) {
    %c0_i32 = arith.constant 0 : i32
    %c0_i32_0 = arith.constant 0 : i32
    return %arg0, %c0_i32, %arg1 : i32, i32, i32
  }
}

module attributes {stable_mosaic.version = 11 : i64} {
  func.func @_conv_pool_kernel(%arg0: i32, %arg1: i32, %arg2: memref<128x512xbf16, #tpu.memory_space<vmem>>, %arg3: memref<128x1xf32, #tpu.memory_space<vmem>>, %arg4: memref<1x256x128xbf16, #tpu.memory_space<vmem>>, %arg5: memref<1x256x128xbf16, #tpu.memory_space<vmem>>, %arg6: memref<1x32x128xf32, #tpu.memory_space<vmem>>) attributes {dimension_semantics = [#tpu.dimension_semantics<parallel>, #tpu.dimension_semantics<parallel>], iteration_bounds = array<i64: 2, 1>, scalar_prefetch = 0 : i64, scratch_operands = 0 : i64, tpu.core_type = #tpu.core_type<tc>, window_params = [{pipeline_mode = #tpu.pipeline_mode<synchronous>, transform_indices = @transform_0, window_bounds = array<i64: 128, 512>}, {pipeline_mode = #tpu.pipeline_mode<synchronous>, transform_indices = @transform_1, window_bounds = array<i64: 128, 1>}, {transform_indices = @transform_2, window_bounds = array<i64: 1, 256, 128>}, {transform_indices = @transform_3, window_bounds = array<i64: 1, 256, 128>}, {transform_indices = @transform_4, window_bounds = array<i64: 1, 32, 128>}]} {
    %c0 = arith.constant 0 : index
    %c0_0 = arith.constant 0 : index
    %c0_1 = arith.constant 0 : index
    %0 = vector.load %arg4[%c0, %c0_0, %c0_1] : memref<1x256x128xbf16, #tpu.memory_space<vmem>>, vector<1x256x128xbf16>
    %1 = vector.shape_cast %0 : vector<1x256x128xbf16> to vector<256x128xbf16>
    %c0_2 = arith.constant 0 : index
    %c0_3 = arith.constant 0 : index
    %c0_4 = arith.constant 0 : index
    %2 = vector.load %arg5[%c0_2, %c0_3, %c0_4] : memref<1x256x128xbf16, #tpu.memory_space<vmem>>, vector<1x256x128xbf16>
    %3 = vector.shape_cast %2 : vector<1x256x128xbf16> to vector<256x128xbf16>
    %4 = tpu.concatenate %1, %3 in 1 : vector<256x128xbf16>, vector<256x128xbf16> -> vector<256x256xbf16>
    %5 = vector.extract_strided_slice %4 {offsets = [0, 0], sizes = [256, 128], strides = [1, 1]} : vector<256x256xbf16> to vector<256x128xbf16>
    %6 = vector.extract_strided_slice %4 {offsets = [0, 1], sizes = [256, 128], strides = [1, 1]} : vector<256x256xbf16> to vector<256x128xbf16>
    %7 = tpu.concatenate %5, %6 in 0 : vector<256x128xbf16>, vector<256x128xbf16> -> vector<512x128xbf16>
    %c0_5 = arith.constant 0 : index
    %c0_6 = arith.constant 0 : index
    %8 = vector.load %arg2[%c0_5, %c0_6] : memref<128x512xbf16, #tpu.memory_space<vmem>>, vector<128x512xbf16>
    %cst = arith.constant dense<0.000000e+00> : vector<128x128xf32>
    %9 = tpu.matmul %8, %7, %cst {dimension_numbers = #tpu.dot_dimension_numbers<[1], [0], [0], [1], [0, 0, 1, 1], [], []>} : vector<128x512xbf16>, vector<512x128xbf16>, vector<128x128xf32> -> vector<128x128xf32>
    %c0_7 = arith.constant 0 : index
    %c0_8 = arith.constant 0 : index
    %10 = vector.load %arg3[%c0_7, %c0_8] : memref<128x1xf32, #tpu.memory_space<vmem>>, vector<128x1xf32>
    %11 = vector.broadcast %10 : vector<128x1xf32> to vector<128x128xf32>
    %12 = arith.addf %9, %11 : vector<128x128xf32>
    %cst_9 = arith.constant 0.000000e+00 : f32
    %13 = vector.broadcast %cst_9 : f32 to vector<128x128xf32>
    %14 = arith.maximumf %12, %13 : vector<128x128xf32>
    %15 = vector.extract_strided_slice %14 {offsets = [0, 0], sizes = [32, 128], strides = [1, 1]} : vector<128x128xf32> to vector<32x128xf32>
    %16 = vector.extract_strided_slice %14 {offsets = [32, 0], sizes = [32, 128], strides = [1, 1]} : vector<128x128xf32> to vector<32x128xf32>
    %17 = arith.maximumf %15, %16 : vector<32x128xf32>
    %18 = vector.extract_strided_slice %14 {offsets = [64, 0], sizes = [32, 128], strides = [1, 1]} : vector<128x128xf32> to vector<32x128xf32>
    %19 = arith.maximumf %17, %18 : vector<32x128xf32>
    %20 = vector.extract_strided_slice %14 {offsets = [96, 0], sizes = [32, 128], strides = [1, 1]} : vector<128x128xf32> to vector<32x128xf32>
    %21 = arith.maximumf %19, %20 : vector<32x128xf32>
    %c0_10 = arith.constant 0 : index
    %c0_11 = arith.constant 0 : index
    %c0_12 = arith.constant 0 : index
    %22 = vector.load %arg6[%c0_10, %c0_11, %c0_12] : memref<1x32x128xf32, #tpu.memory_space<vmem>>, vector<1x32x128xf32>
    %23 = vector.shape_cast %22 : vector<1x32x128xf32> to vector<32x128xf32>
    %24 = vector.shape_cast %21 : vector<32x128xf32> to vector<1x32x128xf32>
    tpu.vector_store %arg6[%c0_10, %c0_11, %c0_12], %24 {strides = array<i32>} : memref<1x32x128xf32, #tpu.memory_space<vmem>>, vector<1x32x128xf32>,
    return
  }
  func.func @transform_0(%arg0: i32, %arg1: i32) -> (i32, i32) {
    %c0_i32 = arith.constant 0 : i32
    %c0_i32_0 = arith.constant 0 : i32
    %c0_i32_1 = arith.constant 0 : i32
    return %c0_i32, %c0_i32_0 : i32, i32
  }
  func.func @transform_1(%arg0: i32, %arg1: i32) -> (i32, i32) {
    %c0_i32 = arith.constant 0 : i32
    %c0_i32_0 = arith.constant 0 : i32
    %c0_i32_1 = arith.constant 0 : i32
    return %c0_i32, %c0_i32_0 : i32, i32
  }
  func.func @transform_2(%arg0: i32, %arg1: i32) -> (i32, i32, i32) {
    %c0_i32 = arith.constant 0 : i32
    %c0_i32_0 = arith.constant 0 : i32
    return %arg0, %c0_i32, %arg1 : i32, i32, i32
  }
  func.func @transform_3(%arg0: i32, %arg1: i32) -> (i32, i32, i32) {
    %c1_i32 = arith.constant 1 : i32
    %0 = arith.addi %arg1, %c1_i32 : i32
    %c0_i32 = arith.constant 0 : i32
    %c0_i32_0 = arith.constant 0 : i32
    return %arg0, %c0_i32, %0 : i32, i32, i32
  }
  func.func @transform_4(%arg0: i32, %arg1: i32) -> (i32, i32, i32) {
    %c0_i32 = arith.constant 0 : i32
    %c0_i32_0 = arith.constant 0 : i32
    return %arg0, %c0_i32, %arg1 : i32, i32, i32
  }
}

module attributes {stable_mosaic.version = 11 : i64} {
  func.func @_conv_pool_kernel(%arg0: i32, %arg1: i32, %arg2: memref<256x1024xbf16, #tpu.memory_space<vmem>>, %arg3: memref<256x1xf32, #tpu.memory_space<vmem>>, %arg4: memref<1x1024x128xbf16, #tpu.memory_space<vmem>>, %arg5: memref<1x64x128xf32, #tpu.memory_space<vmem>>) attributes {dimension_semantics = [#tpu.dimension_semantics<parallel>, #tpu.dimension_semantics<parallel>], iteration_bounds = array<i64: 2, 1>, scalar_prefetch = 0 : i64, scratch_operands = 0 : i64, tpu.core_type = #tpu.core_type<tc>, window_params = [{pipeline_mode = #tpu.pipeline_mode<synchronous>, transform_indices = @transform_0, window_bounds = array<i64: 256, 1024>}, {pipeline_mode = #tpu.pipeline_mode<synchronous>, transform_indices = @transform_1, window_bounds = array<i64: 256, 1>}, {transform_indices = @transform_2, window_bounds = array<i64: 1, 1024, 128>}, {transform_indices = @transform_3, window_bounds = array<i64: 1, 64, 128>}]} {
    %c0 = arith.constant 0 : index
    %c0_0 = arith.constant 0 : index
    %c0_1 = arith.constant 0 : index
    %0 = vector.load %arg4[%c0, %c0_0, %c0_1] : memref<1x1024x128xbf16, #tpu.memory_space<vmem>>, vector<1x1024x128xbf16>
    %1 = vector.shape_cast %0 : vector<1x1024x128xbf16> to vector<1024x128xbf16>
    %c0_2 = arith.constant 0 : index
    %c0_3 = arith.constant 0 : index
    %2 = vector.load %arg2[%c0_2, %c0_3] : memref<256x1024xbf16, #tpu.memory_space<vmem>>, vector<256x1024xbf16>
    %cst = arith.constant dense<0.000000e+00> : vector<256x128xf32>
    %3 = tpu.matmul %2, %1, %cst {dimension_numbers = #tpu.dot_dimension_numbers<[1], [0], [0], [1], [0, 0, 1, 1], [], []>} : vector<256x1024xbf16>, vector<1024x128xbf16>, vector<256x128xf32> -> vector<256x128xf32>
    %c0_4 = arith.constant 0 : index
    %c0_5 = arith.constant 0 : index
    %4 = vector.load %arg3[%c0_4, %c0_5] : memref<256x1xf32, #tpu.memory_space<vmem>>, vector<256x1xf32>
    %5 = vector.broadcast %4 : vector<256x1xf32> to vector<256x128xf32>
    %6 = arith.addf %3, %5 : vector<256x128xf32>
    %cst_6 = arith.constant 0.000000e+00 : f32
    %7 = vector.broadcast %cst_6 : f32 to vector<256x128xf32>
    %8 = arith.maximumf %6, %7 : vector<256x128xf32>
    %9 = vector.extract_strided_slice %8 {offsets = [0, 0], sizes = [64, 128], strides = [1, 1]} : vector<256x128xf32> to vector<64x128xf32>
    %10 = vector.extract_strided_slice %8 {offsets = [64, 0], sizes = [64, 128], strides = [1, 1]} : vector<256x128xf32> to vector<64x128xf32>
    %11 = arith.addf %9, %10 : vector<64x128xf32>
    %12 = vector.extract_strided_slice %8 {offsets = [128, 0], sizes = [64, 128], strides = [1, 1]} : vector<256x128xf32> to vector<64x128xf32>
    %13 = arith.addf %11, %12 : vector<64x128xf32>
    %14 = vector.extract_strided_slice %8 {offsets = [192, 0], sizes = [64, 128], strides = [1, 1]} : vector<256x128xf32> to vector<64x128xf32>
    %15 = arith.addf %13, %14 : vector<64x128xf32>
    %cst_7 = arith.constant 2.500000e-01 : f32
    %16 = vector.broadcast %cst_7 : f32 to vector<64x128xf32>
    %17 = arith.mulf %15, %16 : vector<64x128xf32>
    %c0_8 = arith.constant 0 : index
    %c0_9 = arith.constant 0 : index
    %c0_10 = arith.constant 0 : index
    %18 = vector.load %arg5[%c0_8, %c0_9, %c0_10] : memref<1x64x128xf32, #tpu.memory_space<vmem>>, vector<1x64x128xf32>
    %19 = vector.shape_cast %18 : vector<1x64x128xf32> to vector<64x128xf32>
    %20 = vector.shape_cast %17 : vector<64x128xf32> to vector<1x64x128xf32>
    tpu.vector_store %arg5[%c0_8, %c0_9, %c0_10], %20 {strides = array<i32>} : memref<1x64x128xf32, #tpu.memory_space<vmem>>, vector<1x64x128xf32>,
    return
  }
  func.func @transform_0(%arg0: i32, %arg1: i32) -> (i32, i32) {
    %c0_i32 = arith.constant 0 : i32
    %c0_i32_0 = arith.constant 0 : i32
    %c0_i32_1 = arith.constant 0 : i32
    return %c0_i32, %c0_i32_0 : i32, i32
  }
  func.func @transform_1(%arg0: i32, %arg1: i32) -> (i32, i32) {
    %c0_i32 = arith.constant 0 : i32
    %c0_i32_0 = arith.constant 0 : i32
    %c0_i32_1 = arith.constant 0 : i32
    return %c0_i32, %c0_i32_0 : i32, i32
  }
  func.func @transform_2(%arg0: i32, %arg1: i32) -> (i32, i32, i32) {
    %c0_i32 = arith.constant 0 : i32
    %c0_i32_0 = arith.constant 0 : i32
    return %arg0, %c0_i32, %arg1 : i32, i32, i32
  }
  func.func @transform_3(%arg0: i32, %arg1: i32) -> (i32, i32, i32) {
    %c0_i32 = arith.constant 0 : i32
    %c0_i32_0 = arith.constant 0 : i32
    return %arg0, %c0_i32, %arg1 : i32, i32, i32
  }
}

module attributes {stable_mosaic.version = 11 : i64} {
  func.func @_fc_head_kernel(%arg0: i32, %arg1: memref<2x128xbf16, #tpu.memory_space<vmem>>, %arg2: memref<128x192xbf16, #tpu.memory_space<vmem>>, %arg3: memref<1x192xf32, #tpu.memory_space<vmem>>, %arg4: memref<1x192xf32, #tpu.memory_space<vmem>>, %arg5: memref<1x1xf32, #tpu.memory_space<vmem>>, %arg6: memref<2x1xf32, #tpu.memory_space<vmem>>, %arg7: memref<2x192xf32, #tpu.memory_space<vmem>>) attributes {dimension_semantics = [#tpu.dimension_semantics<arbitrary>], iteration_bounds = array<i64: 1>, scalar_prefetch = 0 : i64, scratch_operands = 1 : i64, tpu.core_type = #tpu.core_type<tc>, window_params = [{transform_indices = @transform_0, window_bounds = array<i64: 2, 128>}, {transform_indices = @transform_1, window_bounds = array<i64: 128, 192>}, {pipeline_mode = #tpu.pipeline_mode<synchronous>, transform_indices = @transform_2, window_bounds = array<i64: 1, 192>}, {pipeline_mode = #tpu.pipeline_mode<synchronous>, transform_indices = @transform_3, window_bounds = array<i64: 1, 192>}, {pipeline_mode = #tpu.pipeline_mode<synchronous>, transform_indices = @transform_4, window_bounds = array<i64: 1, 1>}, {pipeline_mode = #tpu.pipeline_mode<synchronous>, transform_indices = @transform_5, window_bounds = array<i64: 2, 1>}]} {
    %c0_i32 = arith.constant 0 : i32
    %0 = arith.cmpi eq, %arg0, %c0_i32 : i32
    %1 = arith.extui %0 : i1 to i32
    %c0_i32_0 = arith.constant 0 : i32
    %2 = arith.cmpi ne, %1, %c0_i32_0 : i32
    scf.if %2 {
      %cst_10 = arith.constant 0.000000e+00 : f32
      %12 = vector.broadcast %cst_10 : f32 to vector<2x192xf32>
      %c0_11 = arith.constant 0 : index
      %c0_12 = arith.constant 0 : index
      %13 = vector.load %arg7[%c0_11, %c0_12] : memref<2x192xf32, #tpu.memory_space<vmem>>, vector<2x192xf32>
      tpu.vector_store %arg7[%c0_11, %c0_12], %12 {strides = array<i32>} : memref<2x192xf32, #tpu.memory_space<vmem>>, vector<2x192xf32>,
    } else {
    }
    %c0 = arith.constant 0 : index
    %c0_1 = arith.constant 0 : index
    %3 = vector.load %arg7[%c0, %c0_1] : memref<2x192xf32, #tpu.memory_space<vmem>>, vector<2x192xf32>
    %c0_2 = arith.constant 0 : index
    %c0_3 = arith.constant 0 : index
    %4 = vector.load %arg1[%c0_2, %c0_3] : memref<2x128xbf16, #tpu.memory_space<vmem>>, vector<2x128xbf16>
    %c0_4 = arith.constant 0 : index
    %c0_5 = arith.constant 0 : index
    %5 = vector.load %arg2[%c0_4, %c0_5] : memref<128x192xbf16, #tpu.memory_space<vmem>>, vector<128x192xbf16>
    %cst = arith.constant dense<0.000000e+00> : vector<2x192xf32>
    %6 = tpu.matmul %4, %5, %cst {dimension_numbers = #tpu.dot_dimension_numbers<[1], [0], [0], [1], [0, 0, 1, 1], [], []>} : vector<2x128xbf16>, vector<128x192xbf16>, vector<2x192xf32> -> vector<2x192xf32>
    %7 = arith.addf %3, %6 : vector<2x192xf32>
    %c0_6 = arith.constant 0 : index
    %c0_7 = arith.constant 0 : index
    %8 = vector.load %arg7[%c0_6, %c0_7] : memref<2x192xf32, #tpu.memory_space<vmem>>, vector<2x192xf32>
    tpu.vector_store %arg7[%c0_6, %c0_7], %7 {strides = array<i32>} : memref<2x192xf32, #tpu.memory_space<vmem>>, vector<2x192xf32>,
    %c0_i32_8 = arith.constant 0 : i32
    %9 = arith.cmpi eq, %arg0, %c0_i32_8 : i32
    %10 = arith.extui %9 : i1 to i32
    %c0_i32_9 = arith.constant 0 : i32
    %11 = arith.cmpi ne, %10, %c0_i32_9 : i32
    scf.if %11 {
      %c0_10 = arith.constant 0 : index
      %c0_11 = arith.constant 0 : index
      %12 = vector.load %arg7[%c0_10, %c0_11] : memref<2x192xf32, #tpu.memory_space<vmem>>, vector<2x192xf32>
      %c0_12 = arith.constant 0 : index
      %c0_13 = arith.constant 0 : index
      %13 = vector.load %arg3[%c0_12, %c0_13] : memref<1x192xf32, #tpu.memory_space<vmem>>, vector<1x192xf32>
      %14 = vector.broadcast %13 : vector<1x192xf32> to vector<2x192xf32>
      %15 = arith.addf %12, %14 : vector<2x192xf32>
      %cst_14 = arith.constant 0.000000e+00 : f32
      %16 = vector.broadcast %cst_14 : f32 to vector<2x192xf32>
      %17 = arith.cmpf ogt, %15, %16 : vector<2x192xf32>
      %18 = math.exp %15 : vector<2x192xf32>
      %cst_15 = arith.constant 1.000000e+00 : f32
      %19 = vector.broadcast %cst_15 : f32 to vector<2x192xf32>
      %20 = arith.subf %18, %19 : vector<2x192xf32>
      %cst_16 = arith.constant 1.67326319 : f32
      %21 = vector.broadcast %cst_16 : f32 to vector<2x192xf32>
      %22 = arith.mulf %21, %20 : vector<2x192xf32>
      %23 = arith.select %17, %15, %22 : vector<2x192xi1>, vector<2x192xf32>
      %cst_17 = arith.constant 1.05070102 : f32
      %24 = vector.broadcast %cst_17 : f32 to vector<2x192xf32>
      %25 = arith.mulf %24, %23 : vector<2x192xf32>
      %c0_18 = arith.constant 0 : index
      %c0_19 = arith.constant 0 : index
      %26 = vector.load %arg4[%c0_18, %c0_19] : memref<1x192xf32, #tpu.memory_space<vmem>>, vector<1x192xf32>
      %27 = vector.broadcast %26 : vector<1x192xf32> to vector<2x192xf32>
      %28 = arith.mulf %25, %27 : vector<2x192xf32>
      %cst_20 = arith.constant dense<0.000000e+00> : vector<2xf32>
      %29 = vector.multi_reduction <add>, %28, %cst_20 [1] : vector<2x192xf32> to vector<2xf32>
      %30 = vector.shape_cast %29 : vector<2xf32> to vector<2x1xf32>
      %c0_21 = arith.constant 0 : index
      %c0_22 = arith.constant 0 : index
      %31 = vector.load %arg5[%c0_21, %c0_22] : memref<1x1xf32, #tpu.memory_space<vmem>>, vector<1x1xf32>
      %32 = vector.broadcast %31 : vector<1x1xf32> to vector<2x1xf32>
      %33 = arith.addf %30, %32 : vector<2x1xf32>
      %c0_23 = arith.constant 0 : index
      %c0_24 = arith.constant 0 : index
      %34 = vector.load %arg6[%c0_23, %c0_24] : memref<2x1xf32, #tpu.memory_space<vmem>>, vector<2x1xf32>
      tpu.vector_store %arg6[%c0_23, %c0_24], %33 {strides = array<i32>} : memref<2x1xf32, #tpu.memory_space<vmem>>, vector<2x1xf32>,
    } else {
    }
    return
  }
  func.func @transform_0(%arg0: i32) -> (i32, i32) {
    %c0_i32 = arith.constant 0 : i32
    %c0_i32_0 = arith.constant 0 : i32
    return %c0_i32, %arg0 : i32, i32
  }
  func.func @transform_1(%arg0: i32) -> (i32, i32) {
    %c0_i32 = arith.constant 0 : i32
    %c0_i32_0 = arith.constant 0 : i32
    return %arg0, %c0_i32 : i32, i32
  }
  func.func @transform_2(%arg0: i32) -> (i32, i32) {
    %c0_i32 = arith.constant 0 : i32
    %c0_i32_0 = arith.constant 0 : i32
    %c0_i32_1 = arith.constant 0 : i32
    return %c0_i32, %c0_i32_0 : i32, i32
  }
  func.func @transform_3(%arg0: i32) -> (i32, i32) {
    %c0_i32 = arith.constant 0 : i32
    %c0_i32_0 = arith.constant 0 : i32
    %c0_i32_1 = arith.constant 0 : i32
    return %c0_i32, %c0_i32_0 : i32, i32
  }
  func.func @transform_4(%arg0: i32) -> (i32, i32) {
    %c0_i32 = arith.constant 0 : i32
    %c0_i32_0 = arith.constant 0 : i32
    %c0_i32_1 = arith.constant 0 : i32
    return %c0_i32, %c0_i32_0 : i32, i32
  }
  func.func @transform_5(%arg0: i32) -> (i32, i32) {
    %c0_i32 = arith.constant 0 : i32
    %c0_i32_0 = arith.constant 0 : i32
    %c0_i32_1 = arith.constant 0 : i32
    return %c0_i32, %c0_i32_0 : i32, i32
  }
}

</mosaic_0001>

<bundles_post_ra>
// kernel: convnet_forward.4
= control target key start
LH: loop header
LB: loop body
LE: loop exit
PB: predicated region body
PF: predicated region fallthrough
CT: control target
= control target key end

     0   :  { %s825_s15 = smov 0   ;;  %s827_s16 = smov 0   ;;  %s1004_s0 = inlined_call_operand.vmem [shape: bf16[16,32], index: 0, kind: input, shape index: {}]   ;;  %s1005_s1 = inlined_call_operand.vmem [shape: f32[16,1], index: 1, kind: input, shape index: {}]   ;;  %s1006_s2 = inlined_call_operand.vmem [shape: bf16[2,16,2048], index: 2, kind: input, shape index: {}, may-alias: {2,3}]   ;;  %s1007_s3 = inlined_call_operand.vmem [shape: bf16[2,16,2048], index: 3, kind: input, shape index: {}, may-alias: {2,3}]   ;;  %s1008_s4 = inlined_call_operand.vmem [shape: f32[2,16,1536], index: 4, kind: output, shape index: {}]  }
   0x1   :  { %s829_s17 = smov 0   ;;  %s831_s18 = smov 0  }
   0x2   :  { %s833_s19 = smov 0   ;;  %s835_s20 = smov 0  }
   0x3   :  { %s837_s21 = smov 0   ;;  %s839_s22 = smov 0  }
   0x4   :  { %s841_s23 = smov 0  }
   0x5 LB: > { %s608_s24 = sadd.s32 4294967295, %s796_s23   ;;  %s23_s25 = sadd.s32 1, %s788_s21  ;;  %s796_s23 = sphi %s841_s23, %s14_s23   ;;  %s792_s22 = sphi %s839_s22, %s1019_s22   ;;  %s788_s21 = sphi %s837_s21, %s1018_s21   ;;  %s784_s20 = sphi %s835_s20, %s1017_s20   ;;  %s780_s19 = sphi %s833_s19, %s1016_s19   ;;  %s776_s18 = sphi %s831_s18, %s1015_s18   ;;  %s772_s17 = sphi %s829_s17, %s1014_s17   ;;  %s768_s16 = sphi %s827_s16, %s1013_s16   ;;  %s764_s15 = sphi %s825_s15, %s1012_s15  }
   0x6   : > { %p24_p0 = scmp.ge.s32.totalorder %s23_s25, 3  ;;  %s26_s26 = sadd.s32 1, %s792_s22 }
   0x7   : > { %s77_s27 = sadd.s32 1, %s776_s18  ;;  %p84_p1 = scmp.ne.s32.totalorder %s776_s18, %s772_s17 }
   0x8   : > { %s876_s28 = scalar_select %p24_p0, 0, %s23_s25  }
   0x9   : > { %s1021_s26 = smov (!%p24_p0, %s26_s26), %s792_s22  ;;  %p85_p2 = scmp.eq.s32.totalorder %s796_s23, 0 }
   0xa   : > { %s73_s29 = ssub.s32 %s788_s21, %s876_s28  ;;  %p28_p3 = scmp.ge.s32.totalorder %s1021_s26, 2 }
   0xb   : > { %s101_s30 = sadd.s32 1, %s876_s28  ;;  %p888_p4 = por %p85_p2, %p84_p1 }
   0xc   : > { %s103_s6 = ssub.s32 %s23_s25, %s101_s30  ;;  %s1023_s26 = smov (%p28_p3, %s1021_s26), 0 }
   0xd   : > { %s107_s7 = sadd.s32 1, %s768_s16  ;;  %p114_p5 = scmp.ne.s32.totalorder %s768_s16, %s764_s15 }
   0xe   : > { %s72_s8 = ssub.s32 %s792_s22, %s1023_s26  ;;  %p146_p6 = scmp.eq.s32.totalorder %s608_s24, 5 }
   0xf   : > { %s74_s9 = sor.u32 %s73_s29, %s72_s8  ;;  %s104_s10 = sor.u32 %s103_s6, %s72_s8 }
  0x10   : > { %p75_p7 = scmp.eq.s32.totalorder %s74_s9, 0  ;;  %p105_p8 = scmp.eq.s32.totalorder %s104_s10, 0 }
  0x11   : > { %p901_p9 = por %p114_p5, %p85_p2  ;;  %p908_p10 = por %p146_p6, %p84_p1 }
  0x12   : > { %s913_s13 = scalar_select %p75_p7, %s776_s18, %s77_s27  }
  0x13   : > { %s916_s14 = scalar_select %p105_p8, %s768_s16, %s107_s7  }
  0x14   : > { %p611_p11 = scmp.ge.s32.totalorder %s796_s23, 6 }
  0x16   : > { %174 = sbr.rel (%p611_p11) target bundleno = 45 (0x2d), region = 24 }
  0x1b   : > { %177 = sbr.rel (!%p888_p4) target bundleno = 36 (0x24), region = 28  ;;  %s179_s24 = sand.u32 (%p888_p4), 1, %s776_s18  }
  0x1c   : > { %s613_s25 = sshll.u32 (%p888_p4), %s788_s21, 2  ;;  %s612_s29 = sshll.u32 (%p888_p4), %s179_s24, 5 }
  0x1d   : > { %s614_s30 = sshll.u32 (%p888_p4), %s792_s22, 5  ;;  %s181_s10 = scalar_lea.vmem (%p888_p4), [#allocation2], %s612_s29 }
  0x1e   : > { %s184_s6 = sadd.s32 (%p888_p4), %s614_s30, %s613_s25 }
  0x1f   : > { %s615_s8 = sshll.u32 (%p888_p4), %s184_s6, 2 }
  0x20   : > { %s186_s7 = scalar_lea.vmem %s1006_s2, %s615_s8 }
  0x21   : > { %v199_v0 = vld [vmem:[%s186_s7] sm:$0xff]  ;;  %v201_v1 = vld [vmem:[%s186_s7 + $0x8] sm:$0xff] }
  0x22   : > { %v203_v2 = vld [vmem:[%s186_s7 + $0x40] sm:$0xff]  ;;  %200 = vst [vmem:[%s181_s10] sm:$0xff] %v199_v0  ;;  %202 = vst [vmem:[%s181_s10 + $0x8] sm:$0xff] %v201_v1  ;;  %v205_v3 = vld [vmem:[%s186_s7 + $0x48] sm:$0xff] }
  0x23   : > { %204 = vst [vmem:[%s181_s10 + $0x10] sm:$0xff] %v203_v2  ;;  %206 = vst [vmem:[%s181_s10 + $0x18] sm:$0xff] %v205_v3 }
  0x24 PF: > { %212 = sbr.rel (!%p901_p9) target bundleno = 45 (0x2d), region = 51  ;;  %s214_s5 = sand.u32 (%p901_p9), 1, %s768_s16  }
  0x25   : > { %s617_s24 = sshll.u32 (%p901_p9), %s788_s21, 2  ;;  %s616_s25 = sshll.u32 (%p901_p9), %s214_s5, 5 }
  0x26   : > { %s618_s30 = sshll.u32 (%p901_p9), %s792_s22, 5  ;;  %s216_s7 = scalar_lea.vmem (%p901_p9), [#allocation3], %s616_s25 }
  0x27   : > { %s535_s6 = sadd.s32 (%p901_p9), %s618_s30, %s617_s24 }
  0x28   : > { %s619_s8 = sshll.u32 (%p901_p9), %s535_s6, 2 }
  0x29   : > { %s537_s27 = scalar_lea.vmem %s1007_s3, %s619_s8 }
  0x2a   : > { %v620_v4 = vld [vmem:[%s537_s27 + $0x10] sm:$0xff]  ;;  %v621_v5 = vld [vmem:[%s537_s27 + $0x18] sm:$0xff] }
  0x2b   : > { %v622_v6 = vld [vmem:[%s537_s27 + $0x50] sm:$0xff]  ;;  %236 = vst [vmem:[%s216_s7] sm:$0xff] %v620_v4  ;;  %238 = vst [vmem:[%s216_s7 + $0x8] sm:$0xff] %v621_v5  ;;  %v623_v7 = vld [vmem:[%s537_s27 + $0x58] sm:$0xff] }
  0x2c   : > { %240 = vst [vmem:[%s216_s7 + $0x10] sm:$0xff] %v622_v6  ;;  %242 = vst [vmem:[%s216_s7 + $0x18] sm:$0xff] %v623_v7 }
  0x2d PF: > { %p624_p12 = scmp.ge.s32.totalorder %s796_s23, 1  ;;  %p247_p13 = scmp.lt.s32.totalorder %s796_s23, 7 }
  0x2f   : > { %p248_p0 = pnand %p624_p12, %p247_p13 }
  0x30   : > { %s254_s11 = sand.u32 (!%p248_p0), 1, %s772_s17   ;;  %s261_s24 = sand.u32 (!%p248_p0), 1, %s764_s15  }
  0x31   : > { %251 = sbr.rel (%p248_p0) target bundleno = 400 (0x190), region = 74  ;;  %s625_s10 = sshll.u32 (!%p248_p0), %s254_s11, 5 }
  0x32   : > { %s256_s5 = scalar_lea.vmem (!%p248_p0), [#allocation2], %s625_s10  ;;  %s626_s25 = sshll.u32 (!%p248_p0), %s261_s24, 5 }
  0x33   : > { %s798_s30 = smov (!%p248_p0), 127   ;;  %s263_s6 = scalar_lea.vmem (!%p248_p0), [#allocation3], %s626_s25 }
  0x34   : > { %s627_s10 = sshll.u32 (!%p248_p0), %s254_s11, 6 }
  0x36   : > { %v718_v8 = vld [vmem:[%s256_s5 + $0xc] ss:$16 sps:$4 sm:$0xff]   ;;  %v721_v9 = vld [vmem:[%s256_s5 + $0x4] ss:$16 sps:$4 sm:$0xff]   ;;  %v799_v10 = vmov 0   ;;  %vm335_vm0 = vcmask 1039360  }
  0x37   : > { %331 = vrot.lane.b32.xlu1 %v718_v8, %s798_s30  ;;  %442 = vmatprep.mubr.bf16.mxu1 %v799_v10  ;;  %v724_v11 = vld [vmem:[%s263_s6] ss:$16 sps:$4 sm:$0xff]   ;;  %v720_v12 = vld [vmem:[%s256_s5 + $0x8] ss:$16 sps:$4 sm:$0xff]   ;;  %vm363_vm1 = vcmask 261120   ;;  %s637_s17 = sshll.u32 (%p908_p10), %s780_s19, 2 }
  0x38   : > { %399 = vmatprep.mubr.bf16.mxu0 %v799_v10  ;;  %716 = vset.pattern.permute.xlu1 %v799_v10  ;;  %v346_v13 = vld [vmem:[%s1005_s1] sm:$0xff]  ;;  %v347_v15 = vld [vmem:[%s1005_s1 + $0x8] sm:$0xff]  ;;  %s641_s11 = smul.u32 (%p908_p10), 24, %s784_s20 }
  0x39   : > { %327 = vrot.lane.b32.xlu0 %v721_v9, %s798_s30  ;;  %v723_v14 = vld [vmem:[%s256_s5] ss:$16 sps:$4 sm:$0xff]   ;;  %s952_s5 = scalar_lea.vmem [#allocation4], %s627_s10 }
  0x3a   : > { %717 = vset.pattern.permute.xlu0 %v799_v10  ;;  %v725_v25 = vld [vmem:[%s1004_s0] sm:$0xff]   ;;  %s478_s24 = sadd.s32 (%p908_p10), %s641_s11, %s637_s17 }
  0x3b   : > { %333 = vrot.lane.b32.xlu1 %v724_v11, %s798_s30  ;;  %s638_s12 = sshll.u32 (%p908_p10), %s478_s24, 3 }
  0x3c   : > { %s480_s6 = scalar_lea.vmem (%p908_p10), %s1008_s4, %s638_s12 }
  0x3d   : > { %329 = vrot.lane.b32.xlu0 %v720_v12, %s798_s30 }
  0x3f   : > { %350 = vperm.xlu1 %716, %v346_v13  }
  0x41   : > { %325 = vrot.lane.b32.xlu0 %v723_v14, %s798_s30 }
  0x45   : > { %355 = vperm.xlu0 %717, %v347_v15  }
  0xa9   : > { %v332_v16 = vpop.permute.xlu1 %331 }
  0xab   : > { %v328_v17 = vpop.permute.xlu0 %327 }
  0xad   : > { %v334_v18 = vpop.permute.xlu1 %333 }
  0xae   : > { %v339_v19 = vsel %vm335_vm0, %v332_v16, %v334_v18 }
  0xaf   : > { %v330_v20 = vpop.permute.xlu0 %329  ;;  %422 = vmatprep.subr.bf16.mxu1 %v339_v19 }
  0xb0   : > { %v337_v21 = vsel %vm335_vm0, %v328_v17, %v330_v20  ;;  %v338_v22 = vsel %vm335_vm0, %v330_v20, %v332_v16 }
  0xb1   : > { %379 = vmatprep.subr.bf16.mxu0 %v337_v21  ;;  %423 = vmatpush1.bf16.msra.mxu1 %v338_v22 }
  0xb2   : > { %424 = vmatprep.subr.bf16.mxu1 %v718_v8 }
  0xb3   : > { %v326_v23 = vpop.permute.xlu0 %325 }
  0xb4   : > { %v336_v24 = vsel %vm335_vm0, %v326_v23, %v328_v17 }
  0xb5   : > { %380 = vmatpush1.bf16.msra.mxu0 %v336_v24  ;;  %425 = vmatpush1.bf16.msra.mxu1 %v720_v12 }
  0xb6   : > { %381 = vmatprep.subr.bf16.mxu0 %v721_v9 }
  0xb8   : > { %635 = vmatmul.mubr.msk.bf16.vlgmr.msra.gmra.mxu1 %vm363_vm1, %v725_v25 }
  0xb9   : > { %382 = vmatpush1.bf16.msra.mxu0 %v723_v14 }
  0xba   : > { %v351_v26 = vpop.permute.xlu1 %350 }
  0xbc   : > { %634 = vmatmul.mubr.msk.bf16.vlgmr.msra.gmra.mxu0 %vm363_vm1, %v725_v25 }
  0xc0   : > { %v356_v30 = vpop.permute.xlu0 %355 }
 0x178   : > { %v444_v27 = vpop.f32.mrf.mxu1 }
 0x179   : > { %v445_v28 = vadd.f32 %v444_v27, %v351_v26 }
 0x17a   : > { %v446_v29 = vpop.f32.mrf.mxu1 }
 0x17b   : > { %v447_v31 = vadd.f32 %v446_v29, %v351_v26  ;;  %v455_v32 = vmax.f32 %v445_v28, 0.0 }
 0x17c   : > { %v401_v33 = vpop.f32.mrf.mxu0  ;;  %v448_v34 = vpop.f32.mrf.mxu1 }
 0x17d   : > { %v456_v35 = vmax.f32 %v447_v31, 0.0  ;;  %463 = vst [vmem:[%s952_s5 + $0x10] sm:$0xff] %v455_v32  ;;  %v402_v36 = vadd.f32 %v401_v33, %v351_v26  ;;  %v449_v37 = vadd.f32 %v448_v34, %v356_v30 }
 0x17e   : > { %v403_v38 = vpop.f32.mrf.mxu0  ;;  %v450_v39 = vpop.f32.mrf.mxu1 }
 0x17f   : > { %464 = vst [vmem:[%s952_s5 + $0x18] sm:$0xff] %v456_v35  ;;  %v453_v40 = vmax.f32 %v402_v36, 0.0  ;;  %v459_v41 = vmax.f32 %v449_v37, 0.0  ;;  %v404_v42 = vadd.f32 %v403_v38, %v351_v26  ;;  %v451_v43 = vadd.f32 %v450_v39, %v356_v30 }
 0x180   : > { %v405_v44 = vpop.f32.mrf.mxu0 }
 0x181   : > { %461 = vst [vmem:[%s952_s5] sm:$0xff] %v453_v40  ;;  %467 = vst [vmem:[%s952_s5 + $0x30] sm:$0xff] %v459_v41  ;;  %v454_v45 = vmax.f32 %v404_v42, 0.0  ;;  %v460_v46 = vmax.f32 %v451_v43, 0.0  ;;  %v406_v47 = vadd.f32 %v405_v44, %v356_v30 }
 0x182   : > { %v407_v48 = vpop.f32.mrf.mxu0 }
 0x183   : > { %462 = vst [vmem:[%s952_s5 + $0x8] sm:$0xff] %v454_v45  ;;  %468 = vst [vmem:[%s952_s5 + $0x38] sm:$0xff] %v460_v46  ;;  %v457_v49 = vmax.f32 %v406_v47, 0.0  ;;  %v408_v50 = vadd.f32 %v407_v48, %v356_v30  ;;  %475 = sbr.rel (!%p908_p10) target bundleno = 400 (0x190), region = 86 }
 0x184   : > { %v497_v54 = vld [vmem:[%s952_s5 + $0x10] sm:$0xff] (%p908_p10) }
 0x185   : > { %465 = vst [vmem:[%s952_s5 + $0x20] sm:$0xff] %v457_v49  ;;  %v458_v51 = vmax.f32 %v408_v50, 0.0  ;;  %498 = vst [vmem:[%s480_s6 + $0x10] sm:$0xff] (%p908_p10), %v497_v54 }
 0x186   : > { %v499_v55 = vld [vmem:[%s952_s5 + $0x18] sm:$0xff] (%p908_p10) }
 0x187   : > { %466 = vst [vmem:[%s952_s5 + $0x28] sm:$0xff] %v458_v51  ;;  %500 = vst [vmem:[%s480_s6 + $0x18] sm:$0xff] (%p908_p10), %v499_v55 }
 0x188   : > { %v493_v52 = vld [vmem:[%s952_s5] sm:$0xff]  ;;  %v505_v58 = vld [vmem:[%s952_s5 + $0x30] sm:$0xff] }
 0x189   : > { %494 = vst [vmem:[%s480_s6] sm:$0xff] %v493_v52  ;;  %506 = vst [vmem:[%s480_s6 + $0x70] sm:$0xff] %v505_v58 }
 0x18a   : > { %v495_v53 = vld [vmem:[%s952_s5 + $0x8] sm:$0xff]  ;;  %v507_v59 = vld [vmem:[%s952_s5 + $0x38] sm:$0xff] }
 0x18b   : > { %496 = vst [vmem:[%s480_s6 + $0x8] sm:$0xff] %v495_v53  ;;  %508 = vst [vmem:[%s480_s6 + $0x78] sm:$0xff] %v507_v59 }
 0x18c   : > { %v501_v56 = vld [vmem:[%s952_s5 + $0x20] sm:$0xff] }
 0x18d   : > { %502 = vst [vmem:[%s480_s6 + $0x60] sm:$0xff] %v501_v56 }
 0x18e   : > { %v503_v57 = vld [vmem:[%s952_s5 + $0x28] sm:$0xff] }
 0x18f   : > { %504 = vst [vmem:[%s480_s6 + $0x68] sm:$0xff] %v503_v57 }
 0x190 PF: > { %s14_s23 = sadd.s32 1, %s796_s23   ;;  %s1012_s15 = smov %s768_s16 }
 0x191   : > { %p11_p1 = scmp.ge.s32.totalorder %s14_s23, 8   ;;  %s1013_s16 = smov %s916_s14 }
 0x192   : > { %s1014_s17 = smov %s776_s18  ;;  %s1015_s18 = smov %s913_s13 }
 0x193   : > { %s1016_s19 = smov %s788_s21  ;;  %s1017_s20 = smov %s792_s22 }
 0x194   : > { %s1018_s21 = smov %s876_s28  ;;  %s1019_s22 = smov %s1023_s26 }
 0x195   :  { %13 = sbr.rel (!%p11_p1) target bundleno = 5 (0x5), region = 148 }

// kernel: tile.15
= control target key start
LH: loop header
LB: loop body
LE: loop exit
PB: predicated region body
PF: predicated region fallthrough
CT: control target
= control target key end

     0   :  { %s22_s0 = inlined_call_operand.vmem [shape: f32[32], index: 0, kind: input, shape index: {}]   ;;  %s23_s1 = inlined_call_operand.vmem [shape: f32[4,32], index: 1, kind: output, shape index: {}]  }
   0x1   :  { %v4_v0 = vld [vmem:[%s22_s0] ss:$0 sm:$0xff] }
   0x2   :  { %5 = vst [vmem:[%s23_s1] sm:$0xf] %v4_v0 }

// kernel: tile.1
= control target key start
LH: loop header
LB: loop body
LE: loop exit
PB: predicated region body
PF: predicated region fallthrough
CT: control target
= control target key end

     0   :  { %s547_s8 = smov 125   ;;  %s548_s9 = smov 126   ;;  %vm8_vm0 = vcmask 7168   ;;  %s1102_s0 = inlined_call_operand.vmem [shape: f32[4,32], index: 0, kind: input, shape index: {}]   ;;  %s1103_s1 = inlined_call_operand.vmem [shape: f32[128,1], index: 1, kind: output, shape index: {}]  }
   0x1   :  { %v5_v0 = vld [vmem:[%s1102_s0] sm:$0xf]  ;;  %s546_s0 = smov 127   ;;  %s549_s10 = smov 124  }
   0x2   :  { %6 = vst [vmem:[#allocation0] sm:$0xf] %v5_v0  ;;  %s550_s11 = smov 123   ;;  %s551_s12 = smov 122  }
   0x3   :  { %s552_s13 = smov 121   ;;  %s553_s14 = smov 120  }
   0x4   :  { %s554_s15 = smov 119   ;;  %s555_s16 = smov 118  }
   0x5   :  { %s556_s17 = smov 117   ;;  %s557_s18 = smov 116  }
   0x6   :  { %s558_s19 = smov 115   ;;  %s559_s20 = smov 114  }
   0x7   :  { %s560_s21 = smov 113   ;;  %s561_s22 = smov 112  }
   0x8   :  { %s562_s23 = smov 111   ;;  %s563_s24 = smov 110  }
   0x9   :  { %v16_v1 = vld [vmem:[#allocation0] sm:$0xf]   ;;  %s564_s25 = smov 109   ;;  %s565_s26 = smov 108  }
   0xa   :  { %v40_v2 = vld [vmem:[#allocation0] sm:$0xf]   ;;  %17 = vrot.lane.b32.xlu0 %v16_v1, %s546_s0  ;;  %s566_s27 = smov 107   ;;  %s567_s28 = smov 106  }
   0xb   :  { %41 = vrot.lane.b32.xlu1 %v40_v2, %s547_s8  ;;  %v28_v3 = vld [vmem:[#allocation0] sm:$0xf]   ;;  %s568_s29 = smov 105   ;;  %s569_s30 = smov 104  }
   0xc   :  { %v52_v4 = vld [vmem:[#allocation0] sm:$0xf]  }
   0xd   :  { %v64_v5 = vld [vmem:[#allocation0] sm:$0xf]  }
   0xe   :  { %29 = vrot.lane.b32.xlu0 %v28_v3, %s548_s9  ;;  %v76_v6 = vld [vmem:[#allocation0] sm:$0xf]   ;;  %s570_s9 = smov 103  }
   0xf   :  { %53 = vrot.lane.b32.xlu1 %v52_v4, %s549_s10  ;;  %v88_v7 = vld [vmem:[#allocation0] sm:$0xf]   ;;  %s571_s10 = smov 102  }
  0x10   :  { %v100_v8 = vld [vmem:[#allocation0] sm:$0xf]  }
  0x11   :  { %v112_v9 = vld [vmem:[#allocation0] sm:$0xf]  }
  0x12   :  { %65 = vrot.lane.b32.xlu0 %v64_v5, %s550_s11  ;;  %v124_v10 = vld [vmem:[#allocation0] sm:$0xf]   ;;  %s572_s11 = smov 101  }
  0x13   :  { %77 = vrot.lane.b32.xlu1 %v76_v6, %s551_s12  ;;  %v136_v11 = vld [vmem:[#allocation0] sm:$0xf]   ;;  %s573_s12 = smov 100  }
  0x14   :  { %v148_v12 = vld [vmem:[#allocation0] sm:$0xf]  }
  0x15   :  { %v160_v13 = vld [vmem:[#allocation0] sm:$0xf]  }
  0x16   :  { %89 = vrot.lane.b32.xlu0 %v88_v7, %s552_s13  ;;  %v172_v14 = vld [vmem:[#allocation0] sm:$0xf]   ;;  %s574_s13 = smov 99  }
  0x17   :  { %101 = vrot.lane.b32.xlu1 %v100_v8, %s553_s14  ;;  %v184_v15 = vld [vmem:[#allocation0] sm:$0xf]   ;;  %s575_s14 = smov 98  }
  0x18   :  { %v196_v16 = vld [vmem:[#allocation0] sm:$0xf]  }
  0x19   :  { %v208_v17 = vld [vmem:[#allocation0] sm:$0xf]  }
  0x1a   :  { %113 = vrot.lane.b32.xlu0 %v112_v9, %s554_s15  ;;  %v220_v18 = vld [vmem:[#allocation0] sm:$0xf]   ;;  %s576_s15 = smov 97  }
  0x1b   :  { %125 = vrot.lane.b32.xlu1 %v124_v10, %s555_s16  ;;  %v232_v19 = vld [vmem:[#allocation0] sm:$0xf]  }
  0x1c   :  { %v244_v20 = vld [vmem:[#allocation0] sm:$0xf]  }
  0x1d   :  { %v256_v21 = vld [vmem:[#allocation0] sm:$0xf]  }
  0x1e   :  { %137 = vrot.lane.b32.xlu0 %v136_v11, %s556_s17  ;;  %v268_v22 = vld [vmem:[#allocation0] sm:$0xf]  }
  0x1f   :  { %149 = vrot.lane.b32.xlu1 %v148_v12, %s557_s18  ;;  %v280_v23 = vld [vmem:[#allocation0] sm:$0xf]  }
  0x20   :  { %v292_v24 = vld [vmem:[#allocation0] sm:$0xf]  }
  0x21   :  { %v304_v25 = vld [vmem:[#allocation0] sm:$0xf]  }
  0x22   :  { %161 = vrot.lane.b32.xlu0 %v160_v13, %s558_s19  ;;  %v316_v26 = vld [vmem:[#allocation0] sm:$0xf]  }
  0x23   :  { %173 = vrot.lane.b32.xlu1 %v172_v14, %s559_s20  ;;  %v7_v27 = vld [vmem:[#allocation0] sm:$0xf]  }
  0x24   :  { %9 = vst.msk [vmem:[%s1103_s1] sm:$0x1] %vm8_vm0, %v7_v27   ;;  %388 = vst.msk [vmem:[%s1103_s1 + $0x1f] sm:$0x2] %vm8_vm0, %v7_v27   ;;  %v328_v28 = vld [vmem:[#allocation0] sm:$0xf]  }
  0x25   :  { %389 = vst.msk [vmem:[%s1103_s1 + $0x3e] sm:$0x4] %vm8_vm0, %v7_v27   ;;  %390 = vst.msk [vmem:[%s1103_s1 + $0x5d] sm:$0x8] %vm8_vm0, %v7_v27   ;;  %v340_v29 = vld [vmem:[#allocation0] sm:$0xf]  }
  0x26   :  { %185 = vrot.lane.b32.xlu0 %v184_v15, %s560_s21  ;;  %v352_v30 = vld [vmem:[#allocation0] sm:$0xf]  }
  0x27   :  { %197 = vrot.lane.b32.xlu1 %v196_v16, %s561_s22  ;;  %v364_v31 = vld [vmem:[#allocation0] sm:$0xf]  }
  0x28   :  { %v376_v32 = vld [vmem:[#allocation0] sm:$0xf]  }
  0x2a   :  { %209 = vrot.lane.b32.xlu0 %v208_v17, %s562_s23 }
  0x2b   :  { %221 = vrot.lane.b32.xlu1 %v220_v18, %s563_s24 }
  0x2e   :  { %233 = vrot.lane.b32.xlu0 %v232_v19, %s564_s25 }
  0x2f   :  { %245 = vrot.lane.b32.xlu1 %v244_v20, %s565_s26 }
  0x32   :  { %257 = vrot.lane.b32.xlu0 %v256_v21, %s566_s27 }
  0x33   :  { %269 = vrot.lane.b32.xlu1 %v268_v22, %s567_s28 }
  0x36   :  { %281 = vrot.lane.b32.xlu0 %v280_v23, %s568_s29 }
  0x37   :  { %293 = vrot.lane.b32.xlu1 %v292_v24, %s569_s30 }
  0x3a   :  { %305 = vrot.lane.b32.xlu0 %v304_v25, %s570_s9 }
  0x3b   :  { %317 = vrot.lane.b32.xlu1 %v316_v26, %s571_s10 }
  0x3e   :  { %329 = vrot.lane.b32.xlu0 %v328_v28, %s572_s11 }
  0x3f   :  { %341 = vrot.lane.b32.xlu1 %v340_v29, %s573_s12 }
  0x42   :  { %353 = vrot.lane.b32.xlu0 %v352_v30, %s574_s13 }
  0x43   :  { %365 = vrot.lane.b32.xlu1 %v364_v31, %s575_s14 }
  0x46   :  { %377 = vrot.lane.b32.xlu0 %v376_v32, %s576_s15 }
  0x7c   :  { %v18_v33 = vpop.permute.xlu0 %17  }
  0x7d   :  { %v42_v34 = vpop.permute.xlu1 %41   ;;  %391 = vst.msk [vmem:[%s1103_s1 + $0x1] sm:$0x1] %vm8_vm0, %v18_v33   ;;  %392 = vst.msk [vmem:[%s1103_s1 + $0x20] sm:$0x2] %vm8_vm0, %v18_v33  }
  0x7e   :  { %393 = vst.msk [vmem:[%s1103_s1 + $0x3f] sm:$0x4] %vm8_vm0, %v18_v33   ;;  %394 = vst.msk [vmem:[%s1103_s1 + $0x5e] sm:$0x8] %vm8_vm0, %v18_v33  }
  0x7f   :  { %399 = vst.msk [vmem:[%s1103_s1 + $0x3] sm:$0x1] %vm8_vm0, %v42_v34   ;;  %400 = vst.msk [vmem:[%s1103_s1 + $0x22] sm:$0x2] %vm8_vm0, %v42_v34  }
  0x80   :  { %401 = vst.msk [vmem:[%s1103_s1 + $0x41] sm:$0x4] %vm8_vm0, %v42_v34   ;;  %402 = vst.msk [vmem:[%s1103_s1 + $0x60] sm:$0x8] %vm8_vm0, %v42_v34   ;;  %v30_v35 = vpop.permute.xlu0 %29  }
  0x81   :  { %v54_v36 = vpop.permute.xlu1 %53   ;;  %395 = vst.msk [vmem:[%s1103_s1 + $0x2] sm:$0x1] %vm8_vm0, %v30_v35   ;;  %396 = vst.msk [vmem:[%s1103_s1 + $0x21] sm:$0x2] %vm8_vm0, %v30_v35  }
  0x82   :  { %397 = vst.msk [vmem:[%s1103_s1 + $0x40] sm:$0x4] %vm8_vm0, %v30_v35   ;;  %398 = vst.msk [vmem:[%s1103_s1 + $0x5f] sm:$0x8] %vm8_vm0, %v30_v35  }
  0x83   :  { %403 = vst.msk [vmem:[%s1103_s1 + $0x4] sm:$0x1] %vm8_vm0, %v54_v36   ;;  %404 = vst.msk [vmem:[%s1103_s1 + $0x23] sm:$0x2] %vm8_vm0, %v54_v36  }
  0x84   :  { %405 = vst.msk [vmem:[%s1103_s1 + $0x42] sm:$0x4] %vm8_vm0, %v54_v36   ;;  %406 = vst.msk [vmem:[%s1103_s1 + $0x61] sm:$0x8] %vm8_vm0, %v54_v36   ;;  %v66_v37 = vpop.permute.xlu0 %65  }
  0x85   :  { %v78_v38 = vpop.permute.xlu1 %77   ;;  %407 = vst.msk [vmem:[%s1103_s1 + $0x5] sm:$0x1] %vm8_vm0, %v66_v37   ;;  %408 = vst.msk [vmem:[%s1103_s1 + $0x24] sm:$0x2] %vm8_vm0, %v66_v37  }
  0x86   :  { %409 = vst.msk [vmem:[%s1103_s1 + $0x43] sm:$0x4] %vm8_vm0, %v66_v37   ;;  %410 = vst.msk [vmem:[%s1103_s1 + $0x62] sm:$0x8] %vm8_vm0, %v66_v37  }
  0x87   :  { %411 = vst.msk [vmem:[%s1103_s1 + $0x6] sm:$0x1] %vm8_vm0, %v78_v38   ;;  %412 = vst.msk [vmem:[%s1103_s1 + $0x25] sm:$0x2] %vm8_vm0, %v78_v38  }
  0x88   :  { %413 = vst.msk [vmem:[%s1103_s1 + $0x44] sm:$0x4] %vm8_vm0, %v78_v38   ;;  %414 = vst.msk [vmem:[%s1103_s1 + $0x63] sm:$0x8] %vm8_vm0, %v78_v38   ;;  %v90_v39 = vpop.permute.xlu0 %89  }
  0x89   :  { %v102_v40 = vpop.permute.xlu1 %101   ;;  %415 = vst.msk [vmem:[%s1103_s1 + $0x7] sm:$0x1] %vm8_vm0, %v90_v39   ;;  %416 = vst.msk [vmem:[%s1103_s1 + $0x26] sm:$0x2] %vm8_vm0, %v90_v39  }
  0x8a   :  { %417 = vst.msk [vmem:[%s1103_s1 + $0x45] sm:$0x4] %vm8_vm0, %v90_v39   ;;  %418 = vst.msk [vmem:[%s1103_s1 + $0x64] sm:$0x8] %vm8_vm0, %v90_v39  }
  0x8b   :  { %419 = vst.msk [vmem:[%s1103_s1 + $0x8] sm:$0x1] %vm8_vm0, %v102_v40   ;;  %420 = vst.msk [vmem:[%s1103_s1 + $0x27] sm:$0x2] %vm8_vm0, %v102_v40  }
  0x8c   :  { %421 = vst.msk [vmem:[%s1103_s1 + $0x46] sm:$0x4] %vm8_vm0, %v102_v40   ;;  %422 = vst.msk [vmem:[%s1103_s1 + $0x65] sm:$0x8] %vm8_vm0, %v102_v40   ;;  %v114_v41 = vpop.permute.xlu0 %113  }
  0x8d   :  { %v126_v42 = vpop.permute.xlu1 %125   ;;  %423 = vst.msk [vmem:[%s1103_s1 + $0x9] sm:$0x1] %vm8_vm0, %v114_v41   ;;  %424 = vst.msk [vmem:[%s1103_s1 + $0x28] sm:$0x2] %vm8_vm0, %v114_v41  }
  0x8e   :  { %425 = vst.msk [vmem:[%s1103_s1 + $0x47] sm:$0x4] %vm8_vm0, %v114_v41   ;;  %426 = vst.msk [vmem:[%s1103_s1 + $0x66] sm:$0x8] %vm8_vm0, %v114_v41  }
  0x8f   :  { %427 = vst.msk [vmem:[%s1103_s1 + $0xa] sm:$0x1] %vm8_vm0, %v126_v42   ;;  %428 = vst.msk [vmem:[%s1103_s1 + $0x29] sm:$0x2] %vm8_vm0, %v126_v42  }
  0x90   :  { %429 = vst.msk [vmem:[%s1103_s1 + $0x48] sm:$0x4] %vm8_vm0, %v126_v42   ;;  %430 = vst.msk [vmem:[%s1103_s1 + $0x67] sm:$0x8] %vm8_vm0, %v126_v42   ;;  %v138_v43 = vpop.permute.xlu0 %137  }
  0x91   :  { %v150_v44 = vpop.permute.xlu1 %149   ;;  %431 = vst.msk [vmem:[%s1103_s1 + $0xb] sm:$0x1] %vm8_vm0, %v138_v43   ;;  %432 = vst.msk [vmem:[%s1103_s1 + $0x2a] sm:$0x2] %vm8_vm0, %v138_v43  }
  0x92   :  { %433 = vst.msk [vmem:[%s1103_s1 + $0x49] sm:$0x4] %vm8_vm0, %v138_v43   ;;  %434 = vst.msk [vmem:[%s1103_s1 + $0x68] sm:$0x8] %vm8_vm0, %v138_v43  }
  0x93   :  { %435 = vst.msk [vmem:[%s1103_s1 + $0xc] sm:$0x1] %vm8_vm0, %v150_v44   ;;  %436 = vst.msk [vmem:[%s1103_s1 + $0x2b] sm:$0x2] %vm8_vm0, %v150_v44  }
  0x94   :  { %437 = vst.msk [vmem:[%s1103_s1 + $0x4a] sm:$0x4] %vm8_vm0, %v150_v44   ;;  %438 = vst.msk [vmem:[%s1103_s1 + $0x69] sm:$0x8] %vm8_vm0, %v150_v44   ;;  %v162_v45 = vpop.permute.xlu0 %161  }
  0x95   :  { %v174_v46 = vpop.permute.xlu1 %173   ;;  %439 = vst.msk [vmem:[%s1103_s1 + $0xd] sm:$0x1] %vm8_vm0, %v162_v45   ;;  %440 = vst.msk [vmem:[%s1103_s1 + $0x2c] sm:$0x2] %vm8_vm0, %v162_v45  }
  0x96   :  { %441 = vst.msk [vmem:[%s1103_s1 + $0x4b] sm:$0x4] %vm8_vm0, %v162_v45   ;;  %442 = vst.msk [vmem:[%s1103_s1 + $0x6a] sm:$0x8] %vm8_vm0, %v162_v45  }
  0x97   :  { %443 = vst.msk [vmem:[%s1103_s1 + $0xe] sm:$0x1] %vm8_vm0, %v174_v46   ;;  %444 = vst.msk [vmem:[%s1103_s1 + $0x2d] sm:$0x2] %vm8_vm0, %v174_v46  }
  0x98   :  { %445 = vst.msk [vmem:[%s1103_s1 + $0x4c] sm:$0x4] %vm8_vm0, %v174_v46   ;;  %446 = vst.msk [vmem:[%s1103_s1 + $0x6b] sm:$0x8] %vm8_vm0, %v174_v46   ;;  %v186_v47 = vpop.permute.xlu0 %185  }
  0x99   :  { %v198_v48 = vpop.permute.xlu1 %197   ;;  %447 = vst.msk [vmem:[%s1103_s1 + $0xf] sm:$0x1] %vm8_vm0, %v186_v47   ;;  %448 = vst.msk [vmem:[%s1103_s1 + $0x2e] sm:$0x2] %vm8_vm0, %v186_v47  }
  0x9a   :  { %449 = vst.msk [vmem:[%s1103_s1 + $0x4d] sm:$0x4] %vm8_vm0, %v186_v47   ;;  %450 = vst.msk [vmem:[%s1103_s1 + $0x6c] sm:$0x8] %vm8_vm0, %v186_v47  }
  0x9b   :  { %451 = vst.msk [vmem:[%s1103_s1 + $0x10] sm:$0x1] %vm8_vm0, %v198_v48   ;;  %452 = vst.msk [vmem:[%s1103_s1 + $0x2f] sm:$0x2] %vm8_vm0, %v198_v48  }
  0x9c   :  { %453 = vst.msk [vmem:[%s1103_s1 + $0x4e] sm:$0x4] %vm8_vm0, %v198_v48   ;;  %454 = vst.msk [vmem:[%s1103_s1 + $0x6d] sm:$0x8] %vm8_vm0, %v198_v48   ;;  %v210_v49 = vpop.permute.xlu0 %209  }
  0x9d   :  { %v222_v50 = vpop.permute.xlu1 %221   ;;  %455 = vst.msk [vmem:[%s1103_s1 + $0x11] sm:$0x1] %vm8_vm0, %v210_v49   ;;  %456 = vst.msk [vmem:[%s1103_s1 + $0x30] sm:$0x2] %vm8_vm0, %v210_v49  }
  0x9e   :  { %457 = vst.msk [vmem:[%s1103_s1 + $0x4f] sm:$0x4] %vm8_vm0, %v210_v49   ;;  %458 = vst.msk [vmem:[%s1103_s1 + $0x6e] sm:$0x8] %vm8_vm0, %v210_v49  }
  0x9f   :  { %459 = vst.msk [vmem:[%s1103_s1 + $0x12] sm:$0x1] %vm8_vm0, %v222_v50   ;;  %460 = vst.msk [vmem:[%s1103_s1 + $0x31] sm:$0x2] %vm8_vm0, %v222_v50  }
  0xa0   :  { %461 = vst.msk [vmem:[%s1103_s1 + $0x50] sm:$0x4] %vm8_vm0, %v222_v50   ;;  %462 = vst.msk [vmem:[%s1103_s1 + $0x6f] sm:$0x8] %vm8_vm0, %v222_v50   ;;  %v234_v51 = vpop.permute.xlu0 %233  }
  0xa1   :  { %v246_v52 = vpop.permute.xlu1 %245   ;;  %463 = vst.msk [vmem:[%s1103_s1 + $0x13] sm:$0x1] %vm8_vm0, %v234_v51   ;;  %464 = vst.msk [vmem:[%s1103_s1 + $0x32] sm:$0x2] %vm8_vm0, %v234_v51  }
  0xa2   :  { %465 = vst.msk [vmem:[%s1103_s1 + $0x51] sm:$0x4] %vm8_vm0, %v234_v51   ;;  %466 = vst.msk [vmem:[%s1103_s1 + $0x70] sm:$0x8] %vm8_vm0, %v234_v51  }
  0xa3   :  { %467 = vst.msk [vmem:[%s1103_s1 + $0x14] sm:$0x1] %vm8_vm0, %v246_v52   ;;  %468 = vst.msk [vmem:[%s1103_s1 + $0x33] sm:$0x2] %vm8_vm0, %v246_v52  }
  0xa4   :  { %469 = vst.msk [vmem:[%s1103_s1 + $0x52] sm:$0x4] %vm8_vm0, %v246_v52   ;;  %470 = vst.msk [vmem:[%s1103_s1 + $0x71] sm:$0x8] %vm8_vm0, %v246_v52   ;;  %v258_v53 = vpop.permute.xlu0 %257  }
  0xa5   :  { %v270_v54 = vpop.permute.xlu1 %269   ;;  %471 = vst.msk [vmem:[%s1103_s1 + $0x15] sm:$0x1] %vm8_vm0, %v258_v53   ;;  %472 = vst.msk [vmem:[%s1103_s1 + $0x34] sm:$0x2] %vm8_vm0, %v258_v53  }
  0xa6   :  { %473 = vst.msk [vmem:[%s1103_s1 + $0x53] sm:$0x4] %vm8_vm0, %v258_v53   ;;  %474 = vst.msk [vmem:[%s1103_s1 + $0x72] sm:$0x8] %vm8_vm0, %v258_v53  }
  0xa7   :  { %475 = vst.msk [vmem:[%s1103_s1 + $0x16] sm:$0x1] %vm8_vm0, %v270_v54   ;;  %476 = vst.msk [vmem:[%s1103_s1 + $0x35] sm:$0x2] %vm8_vm0, %v270_v54  }
  0xa8   :  { %477 = vst.msk [vmem:[%s1103_s1 + $0x54] sm:$0x4] %vm8_vm0, %v270_v54   ;;  %478 = vst.msk [vmem:[%s1103_s1 + $0x73] sm:$0x8] %vm8_vm0, %v270_v54   ;;  %v282_v55 = vpop.permute.xlu0 %281  }
  0xa9   :  { %v294_v56 = vpop.permute.xlu1 %293   ;;  %479 = vst.msk [vmem:[%s1103_s1 + $0x17] sm:$0x1] %vm8_vm0, %v282_v55   ;;  %480 = vst.msk [vmem:[%s1103_s1 + $0x36] sm:$0x2] %vm8_vm0, %v282_v55  }
  0xaa   :  { %481 = vst.msk [vmem:[%s1103_s1 + $0x55] sm:$0x4] %vm8_vm0, %v282_v55   ;;  %482 = vst.msk [vmem:[%s1103_s1 + $0x74] sm:$0x8] %vm8_vm0, %v282_v55  }
  0xab   :  { %483 = vst.msk [vmem:[%s1103_s1 + $0x18] sm:$0x1] %vm8_vm0, %v294_v56   ;;  %484 = vst.msk [vmem:[%s1103_s1 + $0x37] sm:$0x2] %vm8_vm0, %v294_v56  }
  0xac   :  { %485 = vst.msk [vmem:[%s1103_s1 + $0x56] sm:$0x4] %vm8_vm0, %v294_v56   ;;  %486 = vst.msk [vmem:[%s1103_s1 + $0x75] sm:$0x8] %vm8_vm0, %v294_v56   ;;  %v306_v57 = vpop.permute.xlu0 %305  }
  0xad   :  { %v318_v58 = vpop.permute.xlu1 %317   ;;  %487 = vst.msk [vmem:[%s1103_s1 + $0x19] sm:$0x1] %vm8_vm0, %v306_v57   ;;  %488 = vst.msk [vmem:[%s1103_s1 + $0x38] sm:$0x2] %vm8_vm0, %v306_v57  }
  0xae   :  { %489 = vst.msk [vmem:[%s1103_s1 + $0x57] sm:$0x4] %vm8_vm0, %v306_v57   ;;  %490 = vst.msk [vmem:[%s1103_s1 + $0x76] sm:$0x8] %vm8_vm0, %v306_v57  }
  0xaf   :  { %491 = vst.msk [vmem:[%s1103_s1 + $0x1a] sm:$0x1] %vm8_vm0, %v318_v58   ;;  %492 = vst.msk [vmem:[%s1103_s1 + $0x39] sm:$0x2] %vm8_vm0, %v318_v58  }
  0xb0   :  { %493 = vst.msk [vmem:[%s1103_s1 + $0x58] sm:$0x4] %vm8_vm0, %v318_v58   ;;  %494 = vst.msk [vmem:[%s1103_s1 + $0x77] sm:$0x8] %vm8_vm0, %v318_v58   ;;  %v330_v59 = vpop.permute.xlu0 %329  }
  0xb1   :  { %v342_v60 = vpop.permute.xlu1 %341   ;;  %495 = vst.msk [vmem:[%s1103_s1 + $0x1b] sm:$0x1] %vm8_vm0, %v330_v59   ;;  %496 = vst.msk [vmem:[%s1103_s1 + $0x3a] sm:$0x2] %vm8_vm0, %v330_v59  }
  0xb2   :  { %497 = vst.msk [vmem:[%s1103_s1 + $0x59] sm:$0x4] %vm8_vm0, %v330_v59   ;;  %498 = vst.msk [vmem:[%s1103_s1 + $0x78] sm:$0x8] %vm8_vm0, %v330_v59  }
  0xb3   :  { %499 = vst.msk [vmem:[%s1103_s1 + $0x1c] sm:$0x1] %vm8_vm0, %v342_v60   ;;  %500 = vst.msk [vmem:[%s1103_s1 + $0x3b] sm:$0x2] %vm8_vm0, %v342_v60  }
  0xb4   :  { %501 = vst.msk [vmem:[%s1103_s1 + $0x5a] sm:$0x4] %vm8_vm0, %v342_v60   ;;  %502 = vst.msk [vmem:[%s1103_s1 + $0x79] sm:$0x8] %vm8_vm0, %v342_v60   ;;  %v354_v61 = vpop.permute.xlu0 %353  }
  0xb5   :  { %v366_v62 = vpop.permute.xlu1 %365   ;;  %503 = vst.msk [vmem:[%s1103_s1 + $0x1d] sm:$0x1] %vm8_vm0, %v354_v61   ;;  %504 = vst.msk [vmem:[%s1103_s1 + $0x3c] sm:$0x2] %vm8_vm0, %v354_v61  }
  0xb6   :  { %505 = vst.msk [vmem:[%s1103_s1 + $0x5b] sm:$0x4] %vm8_vm0, %v354_v61   ;;  %506 = vst.msk [vmem:[%s1103_s1 + $0x7a] sm:$0x8] %vm8_vm0, %v354_v61  }
  0xb7   :  { %507 = vst.msk [vmem:[%s1103_s1 + $0x1e] sm:$0x1] %vm8_vm0, %v366_v62   ;;  %508 = vst.msk [vmem:[%s1103_s1 + $0x3d] sm:$0x2] %vm8_vm0, %v366_v62  }
  0xb8   :  { %509 = vst.msk [vmem:[%s1103_s1 + $0x5c] sm:$0x4] %vm8_vm0, %v366_v62   ;;  %510 = vst.msk [vmem:[%s1103_s1 + $0x7b] sm:$0x8] %vm8_vm0, %v366_v62   ;;  %v378_v63 = vpop.permute.xlu0 %377  }
  0xb9   :  { %511 = vst.msk [vmem:[%s1103_s1 + $0x1f] sm:$0x1] %vm8_vm0, %v378_v63   ;;  %512 = vst.msk [vmem:[%s1103_s1 + $0x3e] sm:$0x2] %vm8_vm0, %v378_v63  }
  0xba   :  { %513 = vst.msk [vmem:[%s1103_s1 + $0x5d] sm:$0x4] %vm8_vm0, %v378_v63   ;;  %514 = vst.msk [vmem:[%s1103_s1 + $0x7c] sm:$0x8] %vm8_vm0, %v378_v63  }

// kernel: convnet_forward.5
= control target key start
LH: loop header
LB: loop body
LE: loop exit
PB: predicated region body
PF: predicated region fallthrough
CT: control target
= control target key end

     0   :  { %s1977_s15 = smov 0   ;;  %s1979_s16 = smov 0   ;;  %s2479_s0 = inlined_call_operand.vmem [shape: bf16[128,512], index: 0, kind: input, shape index: {}]   ;;  %s2480_s1 = inlined_call_operand.vmem [shape: f32[128,1], index: 1, kind: input, shape index: {}]   ;;  %s2481_s2 = inlined_call_operand.vmem [shape: bf16[2,256,256], index: 2, kind: input, shape index: {}, may-alias: {2,3}]   ;;  %s2482_s3 = inlined_call_operand.vmem [shape: bf16[2,256,256], index: 3, kind: input, shape index: {}, may-alias: {2,3}]   ;;  %s2483_s4 = inlined_call_operand.vmem [shape: f32[2,32,128], index: 4, kind: output, shape index: {}]  }
   0x1   :  { %s1981_s17 = smov 0   ;;  %s1983_s18 = smov 0  }
   0x2   :  { %s1985_s19 = smov 0  }
   0x3 LB: > { %s26_s20 = sadd.s32 1, %s1944_s18  ;;  %p84_p1 = scmp.ne.s32.totalorder %s1936_s16, %s1932_s15  ;;  %s1948_s19 = sphi %s1985_s19, %s14_s19   ;;  %s1944_s18 = sphi %s1983_s18, %s2506_s18   ;;  %s1940_s17 = sphi %s1981_s17, %s2505_s17   ;;  %s1936_s16 = sphi %s1979_s16, %s2504_s16   ;;  %s1932_s15 = sphi %s1977_s15, %s2503_s15  }
   0x4   : > { %p28_p0 = scmp.ge.s32.totalorder %s26_s20, 2  ;;  %p85_p2 = scmp.eq.s32.totalorder %s1948_s19, 0 }
   0x5   : > { %s77_s23 = sadd.s32 1, %s1936_s16  ;;  %p1545_p5 = scmp.ge.s32.totalorder %s1948_s19, 2 }
   0x6   : > { %s2508_s20 = smov (%p28_p0, %s26_s20), 0  ;;  %p2008_p3 = por %p85_p2, %p84_p1 }
   0x7   : > { %s72_s22 = ssub.s32 %s1944_s18, %s2508_s20  ;;  %174 = sbr.rel (%p1545_p5) target bundleno = 62 (0x3e), region = 24 }
   0x8   : > { %p75_p4 = scmp.eq.s32.totalorder %s72_s22, 0 }
   0xa   : > { %s2016_s24 = scalar_select %p75_p4, %s1936_s16, %s77_s23  }
   0xc   : > { %177 = sbr.rel (!%p2008_p3) target bundleno = 37 (0x25), region = 28  ;;  %s179_s25 = sand.u32 (%p2008_p3), 1, %s1936_s16  }
   0xd   : > { %s1655_s26 = sshll.u32 (%p2008_p3), %s1944_s18, 8  ;;  %s1546_s27 = sshll.u32 (%p2008_p3), %s179_s25, 7 }
   0xe   : > { %s2026_s30 = scalar_lea.vmem (%p2008_p3), %s2481_s2, %s1655_s26  ;;  %s2030_s5 = scalar_lea.vmem (%p2008_p3), [#allocation2], %s1546_s27 }
   0xf   : > { %v202_v0 = vld [vmem:[%s2026_s30] sm:$0xf] (%p2008_p3)  ;;  %v204_v1 = vld [vmem:[%s2026_s30 + $0x8] sm:$0xf] (%p2008_p3)  ;;  %v206_v2 = vld [vmem:[%s2026_s30 + $0x10] sm:$0xf] (%p2008_p3) }
  0x10   : > { %203 = vst [vmem:[%s2030_s5] sm:$0xf] (%p2008_p3), %v202_v0  ;;  %205 = vst [vmem:[%s2030_s5 + $0x4] sm:$0xf] (%p2008_p3), %v204_v1  ;;  %v208_v3 = vld [vmem:[%s2026_s30 + $0x18] sm:$0xf] (%p2008_p3) }
  0x11   : > { %v210_v4 = vld [vmem:[%s2026_s30 + $0x20] sm:$0xf]  ;;  %207 = vst [vmem:[%s2030_s5 + $0x8] sm:$0xf] %v206_v2  ;;  %209 = vst [vmem:[%s2030_s5 + $0xc] sm:$0xf] %v208_v3 }
  0x12   : > { %211 = vst [vmem:[%s2030_s5 + $0x10] sm:$0xf] %v210_v4  ;;  %v212_v5 = vld [vmem:[%s2026_s30 + $0x28] sm:$0xf]  ;;  %v214_v6 = vld [vmem:[%s2026_s30 + $0x30] sm:$0xf] }
  0x13   : > { %v216_v7 = vld [vmem:[%s2026_s30 + $0x38] sm:$0xf]  ;;  %213 = vst [vmem:[%s2030_s5 + $0x14] sm:$0xf] %v212_v5  ;;  %215 = vst [vmem:[%s2030_s5 + $0x18] sm:$0xf] %v214_v6 }
  0x14   : > { %217 = vst [vmem:[%s2030_s5 + $0x1c] sm:$0xf] %v216_v7  ;;  %v218_v8 = vld [vmem:[%s2026_s30 + $0x40] sm:$0xf]  ;;  %v220_v9 = vld [vmem:[%s2026_s30 + $0x48] sm:$0xf] }
  0x15   : > { %v222_v10 = vld [vmem:[%s2026_s30 + $0x50] sm:$0xf]  ;;  %219 = vst [vmem:[%s2030_s5 + $0x20] sm:$0xf] %v218_v8  ;;  %221 = vst [vmem:[%s2030_s5 + $0x24] sm:$0xf] %v220_v9 }
  0x16   : > { %223 = vst [vmem:[%s2030_s5 + $0x28] sm:$0xf] %v222_v10  ;;  %v224_v11 = vld [vmem:[%s2026_s30 + $0x58] sm:$0xf]  ;;  %v226_v12 = vld [vmem:[%s2026_s30 + $0x60] sm:$0xf] }
  0x17   : > { %v228_v13 = vld [vmem:[%s2026_s30 + $0x68] sm:$0xf]  ;;  %225 = vst [vmem:[%s2030_s5 + $0x2c] sm:$0xf] %v224_v11  ;;  %227 = vst [vmem:[%s2030_s5 + $0x30] sm:$0xf] %v226_v12 }
  0x18   : > { %229 = vst [vmem:[%s2030_s5 + $0x34] sm:$0xf] %v228_v13  ;;  %v230_v14 = vld [vmem:[%s2026_s30 + $0x70] sm:$0xf]  ;;  %v232_v15 = vld [vmem:[%s2026_s30 + $0x78] sm:$0xf] }
  0x19   : > { %v234_v16 = vld [vmem:[%s2026_s30 + $0x80] sm:$0xf]  ;;  %231 = vst [vmem:[%s2030_s5 + $0x38] sm:$0xf] %v230_v14  ;;  %233 = vst [vmem:[%s2030_s5 + $0x3c] sm:$0xf] %v232_v15 }
  0x1a   : > { %235 = vst [vmem:[%s2030_s5 + $0x40] sm:$0xf] %v234_v16  ;;  %v236_v17 = vld [vmem:[%s2026_s30 + $0x88] sm:$0xf]  ;;  %v238_v18 = vld [vmem:[%s2026_s30 + $0x90] sm:$0xf] }
  0x1b   : > { %v240_v19 = vld [vmem:[%s2026_s30 + $0x98] sm:$0xf]  ;;  %237 = vst [vmem:[%s2030_s5 + $0x44] sm:$0xf] %v236_v17  ;;  %239 = vst [vmem:[%s2030_s5 + $0x48] sm:$0xf] %v238_v18 }
  0x1c   : > { %241 = vst [vmem:[%s2030_s5 + $0x4c] sm:$0xf] %v240_v19  ;;  %v242_v20 = vld [vmem:[%s2026_s30 + $0xa0] sm:$0xf]  ;;  %v244_v21 = vld [vmem:[%s2026_s30 + $0xa8] sm:$0xf] }
  0x1d   : > { %v246_v22 = vld [vmem:[%s2026_s30 + $0xb0] sm:$0xf]  ;;  %243 = vst [vmem:[%s2030_s5 + $0x50] sm:$0xf] %v242_v20  ;;  %245 = vst [vmem:[%s2030_s5 + $0x54] sm:$0xf] %v244_v21 }
  0x1e   : > { %247 = vst [vmem:[%s2030_s5 + $0x58] sm:$0xf] %v246_v22  ;;  %v248_v23 = vld [vmem:[%s2026_s30 + $0xb8] sm:$0xf]  ;;  %v250_v24 = vld [vmem:[%s2026_s30 + $0xc0] sm:$0xf] }
  0x1f   : > { %v252_v25 = vld [vmem:[%s2026_s30 + $0xc8] sm:$0xf]  ;;  %249 = vst [vmem:[%s2030_s5 + $0x5c] sm:$0xf] %v248_v23  ;;  %251 = vst [vmem:[%s2030_s5 + $0x60] sm:$0xf] %v250_v24 }
  0x20   : > { %253 = vst [vmem:[%s2030_s5 + $0x64] sm:$0xf] %v252_v25  ;;  %v254_v26 = vld [vmem:[%s2026_s30 + $0xd0] sm:$0xf]  ;;  %v256_v27 = vld [vmem:[%s2026_s30 + $0xd8] sm:$0xf] }
  0x21   : > { %v258_v28 = vld [vmem:[%s2026_s30 + $0xe0] sm:$0xf]  ;;  %255 = vst [vmem:[%s2030_s5 + $0x68] sm:$0xf] %v254_v26  ;;  %257 = vst [vmem:[%s2030_s5 + $0x6c] sm:$0xf] %v256_v27 }
  0x22   : > { %259 = vst [vmem:[%s2030_s5 + $0x70] sm:$0xf] %v258_v28  ;;  %v260_v29 = vld [vmem:[%s2026_s30 + $0xe8] sm:$0xf]  ;;  %v262_v30 = vld [vmem:[%s2026_s30 + $0xf0] sm:$0xf] }
  0x23   : > { %v264_v31 = vld [vmem:[%s2026_s30 + $0xf8] sm:$0xf]  ;;  %261 = vst [vmem:[%s2030_s5 + $0x74] sm:$0xf] %v260_v29  ;;  %263 = vst [vmem:[%s2030_s5 + $0x78] sm:$0xf] %v262_v30 }
  0x24   : > { %265 = vst [vmem:[%s2030_s5 + $0x7c] sm:$0xf] %v264_v31 }
  0x25 PF: > { %353 = sbr.rel (!%p2008_p3) target bundleno = 62 (0x3e), region = 69  ;;  %s355_s6 = sand.u32 (%p2008_p3), 1, %s1936_s16  }
  0x26   : > { %s1656_s7 = sshll.u32 (%p2008_p3), %s1944_s18, 8  ;;  %s1549_s8 = sshll.u32 (%p2008_p3), %s355_s6, 7 }
  0x27   : > { %s2101_s11 = scalar_lea.vmem (%p2008_p3), %s2482_s3, %s1656_s7  ;;  %s2105_s12 = scalar_lea.vmem (%p2008_p3), [#allocation3], %s1549_s8 }
  0x28   : > { %v1552_v32 = vld [vmem:[%s2101_s11 + $0x4] sm:$0xf] (%p2008_p3)  ;;  %v1553_v33 = vld [vmem:[%s2101_s11 + $0xc] sm:$0xf] (%p2008_p3)  ;;  %v1554_v34 = vld [vmem:[%s2101_s11 + $0x14] sm:$0xf] (%p2008_p3) }
  0x29   : > { %380 = vst [vmem:[%s2105_s12] sm:$0xf] (%p2008_p3), %v1552_v32  ;;  %382 = vst [vmem:[%s2105_s12 + $0x4] sm:$0xf] (%p2008_p3), %v1553_v33  ;;  %v1555_v35 = vld [vmem:[%s2101_s11 + $0x1c] sm:$0xf] (%p2008_p3) }
  0x2a   : > { %v1556_v36 = vld [vmem:[%s2101_s11 + $0x24] sm:$0xf]  ;;  %384 = vst [vmem:[%s2105_s12 + $0x8] sm:$0xf] %v1554_v34  ;;  %386 = vst [vmem:[%s2105_s12 + $0xc] sm:$0xf] %v1555_v35 }
  0x2b   : > { %388 = vst [vmem:[%s2105_s12 + $0x10] sm:$0xf] %v1556_v36  ;;  %v1557_v37 = vld [vmem:[%s2101_s11 + $0x2c] sm:$0xf]  ;;  %v1558_v38 = vld [vmem:[%s2101_s11 + $0x34] sm:$0xf] }
  0x2c   : > { %v1559_v39 = vld [vmem:[%s2101_s11 + $0x3c] sm:$0xf]  ;;  %390 = vst [vmem:[%s2105_s12 + $0x14] sm:$0xf] %v1557_v37  ;;  %392 = vst [vmem:[%s2105_s12 + $0x18] sm:$0xf] %v1558_v38 }
  0x2d   : > { %394 = vst [vmem:[%s2105_s12 + $0x1c] sm:$0xf] %v1559_v39  ;;  %v1560_v40 = vld [vmem:[%s2101_s11 + $0x44] sm:$0xf]  ;;  %v1561_v41 = vld [vmem:[%s2101_s11 + $0x4c] sm:$0xf] }
  0x2e   : > { %v1562_v42 = vld [vmem:[%s2101_s11 + $0x54] sm:$0xf]  ;;  %396 = vst [vmem:[%s2105_s12 + $0x20] sm:$0xf] %v1560_v40  ;;  %398 = vst [vmem:[%s2105_s12 + $0x24] sm:$0xf] %v1561_v41 }
  0x2f   : > { %400 = vst [vmem:[%s2105_s12 + $0x28] sm:$0xf] %v1562_v42  ;;  %v1563_v43 = vld [vmem:[%s2101_s11 + $0x5c] sm:$0xf]  ;;  %v1564_v44 = vld [vmem:[%s2101_s11 + $0x64] sm:$0xf] }
  0x30   : > { %v1565_v45 = vld [vmem:[%s2101_s11 + $0x6c] sm:$0xf]  ;;  %402 = vst [vmem:[%s2105_s12 + $0x2c] sm:$0xf] %v1563_v43  ;;  %404 = vst [vmem:[%s2105_s12 + $0x30] sm:$0xf] %v1564_v44 }
  0x31   : > { %406 = vst [vmem:[%s2105_s12 + $0x34] sm:$0xf] %v1565_v45  ;;  %v1566_v46 = vld [vmem:[%s2101_s11 + $0x74] sm:$0xf]  ;;  %v1567_v47 = vld [vmem:[%s2101_s11 + $0x7c] sm:$0xf] }
  0x32   : > { %v1568_v48 = vld [vmem:[%s2101_s11 + $0x84] sm:$0xf]  ;;  %408 = vst [vmem:[%s2105_s12 + $0x38] sm:$0xf] %v1566_v46  ;;  %410 = vst [vmem:[%s2105_s12 + $0x3c] sm:$0xf] %v1567_v47 }
  0x33   : > { %412 = vst [vmem:[%s2105_s12 + $0x40] sm:$0xf] %v1568_v48  ;;  %v1569_v49 = vld [vmem:[%s2101_s11 + $0x8c] sm:$0xf]  ;;  %v1570_v50 = vld [vmem:[%s2101_s11 + $0x94] sm:$0xf] }
  0x34   : > { %v1571_v51 = vld [vmem:[%s2101_s11 + $0x9c] sm:$0xf]  ;;  %414 = vst [vmem:[%s2105_s12 + $0x44] sm:$0xf] %v1569_v49  ;;  %416 = vst [vmem:[%s2105_s12 + $0x48] sm:$0xf] %v1570_v50 }
  0x35   : > { %418 = vst [vmem:[%s2105_s12 + $0x4c] sm:$0xf] %v1571_v51  ;;  %v1572_v52 = vld [vmem:[%s2101_s11 + $0xa4] sm:$0xf]  ;;  %v1573_v53 = vld [vmem:[%s2101_s11 + $0xac] sm:$0xf] }
  0x36   : > { %v1574_v54 = vld [vmem:[%s2101_s11 + $0xb4] sm:$0xf]  ;;  %420 = vst [vmem:[%s2105_s12 + $0x50] sm:$0xf] %v1572_v52  ;;  %422 = vst [vmem:[%s2105_s12 + $0x54] sm:$0xf] %v1573_v53 }
  0x37   : > { %424 = vst [vmem:[%s2105_s12 + $0x58] sm:$0xf] %v1574_v54  ;;  %v1575_v55 = vld [vmem:[%s2101_s11 + $0xbc] sm:$0xf]  ;;  %v1576_v56 = vld [vmem:[%s2101_s11 + $0xc4] sm:$0xf] }
  0x38   : > { %v1577_v57 = vld [vmem:[%s2101_s11 + $0xcc] sm:$0xf]  ;;  %426 = vst [vmem:[%s2105_s12 + $0x5c] sm:$0xf] %v1575_v55  ;;  %428 = vst [vmem:[%s2105_s12 + $0x60] sm:$0xf] %v1576_v56 }
  0x39   : > { %430 = vst [vmem:[%s2105_s12 + $0x64] sm:$0xf] %v1577_v57  ;;  %v1578_v58 = vld [vmem:[%s2101_s11 + $0xd4] sm:$0xf]  ;;  %v1579_v59 = vld [vmem:[%s2101_s11 + $0xdc] sm:$0xf] }
  0x3a   : > { %v1580_v60 = vld [vmem:[%s2101_s11 + $0xe4] sm:$0xf]  ;;  %432 = vst [vmem:[%s2105_s12 + $0x68] sm:$0xf] %v1578_v58  ;;  %434 = vst [vmem:[%s2105_s12 + $0x6c] sm:$0xf] %v1579_v59 }
  0x3b   : > { %436 = vst [vmem:[%s2105_s12 + $0x70] sm:$0xf] %v1580_v60  ;;  %v1581_v61 = vld [vmem:[%s2101_s11 + $0xec] sm:$0xf]  ;;  %v1582_v62 = vld [vmem:[%s2101_s11 + $0xf4] sm:$0xf] }
  0x3c   : > { %v1583_v63 = vld [vmem:[%s2101_s11 + $0xfc] sm:$0xf]  ;;  %438 = vst [vmem:[%s2105_s12 + $0x74] sm:$0xf] %v1581_v61  ;;  %440 = vst [vmem:[%s2105_s12 + $0x78] sm:$0xf] %v1582_v62 }
  0x3d   : > { %442 = vst [vmem:[%s2105_s12 + $0x7c] sm:$0xf] %v1583_v63 }
  0x3e PF: > { %p1584_p6 = scmp.ge.s32.totalorder %s1948_s19, 1  ;;  %p529_p7 = scmp.lt.s32.totalorder %s1948_s19, 3 }
  0x40   : > { %p530_p8 = pnand %p1584_p6, %p529_p7 }
  0x42   : > { %533 = sbr.rel (%p530_p8) target bundleno = 519 (0x207), region = 110 }
  0x47   : > { %s536_s13 = sand.u32 1, %s1932_s15   ;;  %s1950_s22 = smov 127   ;;  %v1862_v25 = vld [vmem:[%s2479_s0] ss:$16 sps:$4 sm:$0xff]   ;;  %v1864_v26 = vld [vmem:[%s2479_s0 + $0x4] ss:$16 sps:$4 sm:$0xff]  }
  0x48   : > { %s1585_s14 = sshll.u32 %s536_s13, 7  ;;  %v1865_v28 = vld [vmem:[%s2479_s0 + $0x24] ss:$16 sps:$4 sm:$0xff]   ;;  %1242 = vmatprep.mubr.bf16.mxu0 %v1864_v26  ;;  %v1867_v30 = vld [vmem:[%s2479_s0 + $0x20] ss:$16 sps:$4 sm:$0xff]   ;;  %v955_v49 = vld [vmem:[%s2480_s1 + $0x8] sm:$0xff] }
  0x49   : > { %s2172_s21 = scalar_lea.vmem [#allocation2], %s1585_s14  ;;  %s2177_s23 = scalar_lea.vmem [#allocation3], %s1585_s14  ;;  %v1868_v31 = vld [vmem:[%s2479_s0 + $0x44] ss:$16 sps:$4 sm:$0xff]   ;;  %v1870_v34 = vld [vmem:[%s2479_s0 + $0x40] ss:$16 sps:$4 sm:$0xff]  }
  0x4a   : > { %v1830_v0 = vld [vmem:[%s2172_s21 + $0x78] sm:$0xff]   ;;  %v1834_v4 = vld [vmem:[%s2172_s21 + $0x70] sm:$0xff]   ;;  %v1839_v7 = vld [vmem:[%s2172_s21 + $0x68] sm:$0xff]   ;;  %v1951_v51 = vmov 0   ;;  %vm889_vm0 = vcmask 1039360   ;;  %p576_p9 = scmp.lt.s32.totalorder %s1940_s17, 1 }
  0x4b   : > { %v1831_v1 = vld [vmem:[%s2172_s21 + $0x38] sm:$0xff]   ;;  %885 = vrot.lane.b32.xlu0 %v1830_v0, %s1950_s22  ;;  %1658 = vmatprep.subr.bf16.mxu0 %v1830_v0  ;;  %v1835_v5 = vld [vmem:[%s2177_s23 + $0x70] sm:$0xff]   ;;  %v1841_v9 = vld [vmem:[%s2172_s21 + $0x28] sm:$0xff]  }
  0x4c   : > { %v1832_v2 = vld [vmem:[%s2177_s23 + $0x78] sm:$0xff]   ;;  %853 = vrot.lane.b32.xlu1 %v1831_v1, %s1950_s22  ;;  %1659 = vmatpush3.bf16.msra.mxu0 %v1831_v1  ;;  %v1837_v6 = vld [vmem:[%s2172_s21 + $0x30] sm:$0xff]   ;;  %v1843_v10 = vld [vmem:[%s2172_s21 + $0x60] sm:$0xff]   ;;  %s2510_s17 = smov (!%p576_p9, %s1940_s17), 1 }
  0x4d   : > { %v1833_v3 = vld [vmem:[%s2177_s23 + $0x38] sm:$0xff]   ;;  %1660 = vmatprep.subr.bf16.mxu0 %v1834_v4  ;;  %v1836_v8 = vld [vmem:[%s2177_s23 + $0x30] sm:$0xff]   ;;  %v1838_v11 = vld [vmem:[%s2177_s23 + $0x68] sm:$0xff]   ;;  %1829 = vset.pattern.permute.xlu1 %v1951_v51  ;;  %s1657_s14 = sshll.u32 %s2510_s17, 5 }
  0x4e   : > { %v1845_v12 = vld [vmem:[%s2172_s21 + $0x20] sm:$0xff]   ;;  %v1847_v13 = vld [vmem:[%s2172_s21 + $0x58] sm:$0xff]   ;;  %v1840_v14 = vld [vmem:[%s2177_s23 + $0x28] sm:$0xff]   ;;  %1828 = vset.pattern.permute.xlu0 %v1951_v51  ;;  %s2458_s15 = scalar_lea.vmem %s2483_s4, %s1657_s14 }
  0x4f   : > { %887 = vrot.lane.b32.xlu0 %v1832_v2, %s1950_s22  ;;  %v1849_v15 = vld [vmem:[%s2172_s21 + $0x18] sm:$0xff]   ;;  %v1851_v16 = vld [vmem:[%s2172_s21 + $0x50] sm:$0xff]   ;;  %v1842_v17 = vld [vmem:[%s2177_s23 + $0x60] sm:$0xff]  }
  0x50   : > { %855 = vrot.lane.b32.xlu1 %v1833_v3, %s1950_s22  ;;  %1661 = vmatpush3.bf16.msra.mxu0 %v1837_v6  ;;  %v1853_v18 = vld [vmem:[%s2172_s21 + $0x10] sm:$0xff]   ;;  %v1855_v19 = vld [vmem:[%s2172_s21 + $0x48] sm:$0xff]   ;;  %v1844_v20 = vld [vmem:[%s2177_s23 + $0x20] sm:$0xff]  }
  0x51   : > { %1662 = vmatprep.subr.bf16.mxu0 %v1839_v7  ;;  %v1857_v21 = vld [vmem:[%s2172_s21 + $0x8] sm:$0xff]   ;;  %v1859_v22 = vld [vmem:[%s2172_s21 + $0x40] sm:$0xff]   ;;  %v1846_v23 = vld [vmem:[%s2177_s23 + $0x58] sm:$0xff]  }
  0x52   : > { %v1861_v24 = vld [vmem:[%s2172_s21] sm:$0xff]   ;;  %v1848_v27 = vld [vmem:[%s2177_s23 + $0x18] sm:$0xff]   ;;  %v1850_v29 = vld [vmem:[%s2177_s23 + $0x50] sm:$0xff]  }
  0x53   : > { %881 = vrot.lane.b32.xlu0 %v1834_v4, %s1950_s22  ;;  %v1852_v32 = vld [vmem:[%s2177_s23 + $0x10] sm:$0xff]   ;;  %v1854_v33 = vld [vmem:[%s2177_s23 + $0x48] sm:$0xff]   ;;  %v1858_v38 = vld [vmem:[%s2177_s23 + $0x40] sm:$0xff]  }
  0x54   : > { %883 = vrot.lane.b32.xlu1 %v1835_v5, %s1950_s22  ;;  %1663 = vmatpush3.bf16.msra.mxu0 %v1841_v9  ;;  %v1871_v35 = vld [vmem:[%s2479_s0 + $0x64] ss:$16 sps:$4 sm:$0xff]   ;;  %v1856_v36 = vld [vmem:[%s2177_s23 + $0x8] sm:$0xff]   ;;  %v1873_v39 = vld [vmem:[%s2479_s0 + $0x60] ss:$16 sps:$4 sm:$0xff]  }
  0x55   : > { %1664 = vmatprep.subr.bf16.mxu0 %v1843_v10  ;;  %v1876_v37 = vld [vmem:[%s2479_s0 + $0xc] ss:$16 sps:$4 sm:$0xff]   ;;  %v1877_v40 = vld [vmem:[%s2479_s0 + $0x84] ss:$16 sps:$4 sm:$0xff]   ;;  %v1879_v42 = vld [vmem:[%s2479_s0 + $0x80] ss:$16 sps:$4 sm:$0xff]  }
  0x56   : > { %1339 = vmatprep.mubr.bf16.mxu1 %v1876_v37  ;;  %v1860_v41 = vld [vmem:[%s2177_s23] sm:$0xff]   ;;  %v956_v52 = vld [vmem:[%s2480_s1 + $0x10] sm:$0xff]  ;;  %v957_v53 = vld [vmem:[%s2480_s1 + $0x18] sm:$0xff] }
  0x57   : > { %849 = vrot.lane.b32.xlu0 %v1837_v6, %s1950_s22  ;;  %v1883_v43 = vld [vmem:[%s2479_s0 + $0xa4] ss:$16 sps:$4 sm:$0xff]   ;;  %v1885_v44 = vld [vmem:[%s2479_s0 + $0xa0] ss:$16 sps:$4 sm:$0xff]   ;;  %v959_v57 = vld [vmem:[%s2480_s1 + $0x28] sm:$0xff] }
  0x58   : > { %851 = vrot.lane.b32.xlu1 %v1836_v8, %s1950_s22  ;;  %1665 = vmatpush3.bf16.msra.mxu0 %v1845_v12  ;;  %v1889_v45 = vld [vmem:[%s2479_s0 + $0xc4] ss:$16 sps:$4 sm:$0xff]   ;;  %v1891_v46 = vld [vmem:[%s2479_s0 + $0xc0] ss:$16 sps:$4 sm:$0xff]   ;;  %v961_v62 = vld [vmem:[%s2480_s1 + $0x38] sm:$0xff] }
  0x59   : > { %1666 = vmatprep.subr.bf16.mxu0 %v1847_v13  ;;  %v1895_v47 = vld [vmem:[%s2479_s0 + $0xe4] ss:$16 sps:$4 sm:$0xff]   ;;  %v1897_v48 = vld [vmem:[%s2479_s0 + $0xe0] ss:$16 sps:$4 sm:$0xff]   ;;  %v963_v3 = vld [vmem:[%s2480_s1 + $0x48] sm:$0xff] }
  0x5a   : > { %v954_v50 = vld [vmem:[%s2480_s1] sm:$0xff]  ;;  %v960_v61 = vld [vmem:[%s2480_s1 + $0x30] sm:$0xff]  ;;  %v965_v8 = vld [vmem:[%s2480_s1 + $0x58] sm:$0xff] }
  0x5b   : > { %877 = vrot.lane.b32.xlu0 %v1839_v7, %s1950_s22  ;;  %v958_v56 = vld [vmem:[%s2480_s1 + $0x20] sm:$0xff]  ;;  %v964_v7 = vld [vmem:[%s2480_s1 + $0x50] sm:$0xff]  ;;  %v1880_v51 = vld [vmem:[%s2479_s0 + $0x2c] ss:$16 sps:$4 sm:$0xff]  }
  0x5c   : > { %879 = vrot.lane.b32.xlu1 %v1838_v11, %s1950_s22  ;;  %1667 = vmatpush3.bf16.msra.mxu0 %v1849_v15  ;;  %v962_v2 = vld [vmem:[%s2480_s1 + $0x40] sm:$0xff] }
  0x5d   : > { %1668 = vmatprep.subr.bf16.mxu0 %v1851_v16 }
  0x5f   : > { %845 = vrot.lane.b32.xlu0 %v1841_v9, %s1950_s22 }
  0x60   : > { %847 = vrot.lane.b32.xlu1 %v1840_v14, %s1950_s22  ;;  %1669 = vmatpush3.bf16.msra.mxu0 %v1853_v18 }
  0x61   : > { %1670 = vmatprep.subr.bf16.mxu0 %v1855_v19 }
  0x63   : > { %873 = vrot.lane.b32.xlu0 %v1843_v10, %s1950_s22 }
  0x64   : > { %875 = vrot.lane.b32.xlu1 %v1842_v17, %s1950_s22  ;;  %1671 = vmatpush3.bf16.msra.mxu0 %v1857_v21  ;;  %v968_v17 = vld [vmem:[%s2480_s1 + $0x70] sm:$0xff] }
  0x65   : > { %1672 = vmatprep.subr.bf16.mxu0 %v1859_v22 }
  0x67   : > { %841 = vrot.lane.b32.xlu0 %v1845_v12, %s1950_s22  ;;  %v966_v12 = vld [vmem:[%s2480_s1 + $0x60] sm:$0xff] }
  0x68   : > { %843 = vrot.lane.b32.xlu1 %v1844_v20, %s1950_s22  ;;  %1673 = vmatpush3.bf16.msra.mxu0 %v1861_v24 }
  0x6b   : > { %869 = vrot.lane.b32.xlu0 %v1847_v13, %s1950_s22  ;;  %1243 = vmatmul.mubr.bf16.vlgmr.msra.gmra.mxu0 %v1862_v25  ;;  %v967_v13 = vld [vmem:[%s2480_s1 + $0x68] sm:$0xff] }
  0x6c   : > { %871 = vrot.lane.b32.xlu1 %v1846_v23, %s1950_s22  ;;  %1250 = vmatprep.mubr.bf16.mxu0 %v1865_v28 }
  0x6f   : > { %837 = vrot.lane.b32.xlu0 %v1849_v15, %s1950_s22 }
  0x70   : > { %839 = vrot.lane.b32.xlu1 %v1848_v27, %s1950_s22 }
  0x73   : > { %865 = vrot.lane.b32.xlu0 %v1851_v16, %s1950_s22  ;;  %1251 = vmatmul.mubr.bf16.gmra.mxu0 %v1867_v30 }
  0x74   : > { %867 = vrot.lane.b32.xlu1 %v1850_v29, %s1950_s22  ;;  %1258 = vmatprep.mubr.bf16.mxu0 %v1868_v31 }
  0x77   : > { %833 = vrot.lane.b32.xlu0 %v1853_v18, %s1950_s22  ;;  %v969_v18 = vld [vmem:[%s2480_s1 + $0x78] sm:$0xff] }
  0x78   : > { %835 = vrot.lane.b32.xlu1 %v1852_v32, %s1950_s22 }
  0x7b   : > { %861 = vrot.lane.b32.xlu0 %v1855_v19, %s1950_s22  ;;  %1259 = vmatmul.mubr.bf16.gmra.mxu0 %v1870_v34 }
  0x7c   : > { %863 = vrot.lane.b32.xlu1 %v1854_v33, %s1950_s22  ;;  %1266 = vmatprep.mubr.bf16.mxu0 %v1871_v35 }
  0x7f   : > { %829 = vrot.lane.b32.xlu0 %v1857_v21, %s1950_s22 }
  0x80   : > { %831 = vrot.lane.b32.xlu1 %v1856_v36, %s1950_s22 }
  0x83   : > { %857 = vrot.lane.b32.xlu0 %v1859_v22, %s1950_s22  ;;  %1267 = vmatmul.mubr.bf16.gmra.mxu0 %v1873_v39 }
  0x84   : > { %859 = vrot.lane.b32.xlu1 %v1858_v38, %s1950_s22  ;;  %1274 = vmatprep.mubr.bf16.mxu0 %v1877_v40 }
  0x87   : > { %825 = vrot.lane.b32.xlu0 %v1861_v24, %s1950_s22 }
  0x88   : > { %827 = vrot.lane.b32.xlu1 %v1860_v41, %s1950_s22 }
  0x8b   : > { %1275 = vmatmul.mubr.bf16.gmra.mxu0 %v1879_v42  ;;  %972 = vperm.xlu0 %1828, %v954_v50   ;;  %v1874_v50 = vld [vmem:[%s2479_s0 + $0x8] ss:$16 sps:$4 sm:$0xff]  }
  0x8c   : > { %1282 = vmatprep.mubr.bf16.mxu0 %v1883_v43  ;;  %977 = vperm.xlu1 %1829, %v955_v49  }
  0x8f   : > { %987 = vperm.xlu0 %1828, %v957_v53   ;;  %v1886_v53 = vld [vmem:[%s2479_s0 + $0x4c] ss:$16 sps:$4 sm:$0xff]  }
  0x90   : > { %982 = vperm.xlu1 %1829, %v956_v52   ;;  %v1882_v52 = vld [vmem:[%s2479_s0 + $0x28] ss:$16 sps:$4 sm:$0xff]  }
  0x93   : > { %1283 = vmatmul.mubr.bf16.gmra.mxu0 %v1885_v44  ;;  %997 = vperm.xlu0 %1828, %v959_v57   ;;  %v1898_v57 = vld [vmem:[%s2479_s0 + $0x8c] ss:$16 sps:$4 sm:$0xff]  }
  0x94   : > { %1290 = vmatprep.mubr.bf16.mxu0 %v1889_v45  ;;  %992 = vperm.xlu1 %1829, %v958_v56   ;;  %v1894_v56 = vld [vmem:[%s2479_s0 + $0x68] ss:$16 sps:$4 sm:$0xff]  }
  0x97   : > { %1007 = vperm.xlu0 %1828, %v961_v62   ;;  %v1906_v62 = vld [vmem:[%s2479_s0 + $0xc8] ss:$16 sps:$4 sm:$0xff]  }
  0x98   : > { %1002 = vperm.xlu1 %1829, %v960_v61   ;;  %v1904_v61 = vld [vmem:[%s2479_s0 + $0xcc] ss:$16 sps:$4 sm:$0xff]  }
  0x9b   : > { %1291 = vmatmul.mubr.bf16.gmra.mxu0 %v1891_v46  ;;  %1017 = vperm.xlu0 %1828, %v963_v3  }
  0x9c   : > { %1298 = vmatprep.mubr.bf16.mxu0 %v1895_v47  ;;  %1012 = vperm.xlu1 %1829, %v962_v2  }
  0x9f   : > { %1027 = vperm.xlu0 %1828, %v965_v8  }
  0xa0   : > { %1022 = vperm.xlu1 %1829, %v964_v7  }
  0xa3   : > { %1299 = vmatmul.mubr.bf16.gmra.mxu0 %v1897_v48  ;;  %1037 = vperm.xlu0 %1828, %v967_v13  }
  0xa4   : > { %1032 = vperm.xlu1 %1829, %v966_v12  }
  0xa7   : > { %1047 = vperm.xlu0 %1828, %v969_v18  }
  0xa8   : > { %1042 = vperm.xlu1 %1829, %v968_v17  }
  0xbd   : > { %v886_v54 = vpop.permute.xlu0 %885 }
  0xbe   : > { %v854_v55 = vpop.permute.xlu1 %853 }
  0xc1   : > { %v888_v58 = vpop.permute.xlu0 %887 }
  0xc2   : > { %v856_v59 = vpop.permute.xlu1 %855  ;;  %v905_v60 = vsel %vm889_vm0, %v886_v54, %v888_v58  ;;  %v1888_v54 = vld [vmem:[%s2479_s0 + $0x48] ss:$16 sps:$4 sm:$0xff]  }
  0xc3   : > { %1722 = vmatprep.subr.bf16.mxu1 %v905_v60  ;;  %v897_v63 = vsel %vm889_vm0, %v854_v55, %v856_v59  ;;  %v1892_v55 = vld [vmem:[%s2479_s0 + $0x6c] ss:$16 sps:$4 sm:$0xff]   ;;  %v1900_v58 = vld [vmem:[%s2479_s0 + $0x88] ss:$16 sps:$4 sm:$0xff]  }
  0xc4   : > { %1723 = vmatpush3.bf16.msra.mxu1 %v897_v63  ;;  %v1901_v59 = vld [vmem:[%s2479_s0 + $0xac] ss:$16 sps:$4 sm:$0xff]   ;;  %v1903_v60 = vld [vmem:[%s2479_s0 + $0xa8] ss:$16 sps:$4 sm:$0xff]  }
  0xc5   : > { %v882_v0 = vpop.permute.xlu0 %881  ;;  %v1907_v63 = vld [vmem:[%s2479_s0 + $0xec] ss:$16 sps:$4 sm:$0xff]  }
  0xc6   : > { %v884_v1 = vpop.permute.xlu1 %883 }
  0xc7   : > { %v904_v4 = vsel %vm889_vm0, %v882_v0, %v884_v1  ;;  %v1909_v0 = vld [vmem:[%s2479_s0 + $0xe8] ss:$16 sps:$4 sm:$0xff]  }
  0xc8   : > { %1724 = vmatprep.subr.bf16.mxu1 %v904_v4 }
  0xc9   : > { %v850_v5 = vpop.permute.xlu0 %849 }
  0xca   : > { %v852_v6 = vpop.permute.xlu1 %851 }
  0xcb   : > { %v896_v9 = vsel %vm889_vm0, %v850_v5, %v852_v6 }
  0xcc   : > { %1725 = vmatpush3.bf16.msra.mxu1 %v896_v9 }
  0xcd   : > { %v878_v10 = vpop.permute.xlu0 %877 }
  0xce   : > { %v880_v11 = vpop.permute.xlu1 %879 }
  0xcf   : > { %v903_v14 = vsel %vm889_vm0, %v878_v10, %v880_v11 }
  0xd0   : > { %1726 = vmatprep.subr.bf16.mxu1 %v903_v14 }
  0xd1   : > { %v846_v15 = vpop.permute.xlu0 %845 }
  0xd2   : > { %v848_v16 = vpop.permute.xlu1 %847 }
  0xd3   : > { %v895_v19 = vsel %vm889_vm0, %v846_v15, %v848_v16 }
  0xd4   : > { %1727 = vmatpush3.bf16.msra.mxu1 %v895_v19 }
  0xd5   : > { %v874_v20 = vpop.permute.xlu0 %873 }
  0xd6   : > { %v876_v21 = vpop.permute.xlu1 %875 }
  0xd7   : > { %v902_v22 = vsel %vm889_vm0, %v874_v20, %v876_v21 }
  0xd8   : > { %1728 = vmatprep.subr.bf16.mxu1 %v902_v22 }
  0xd9   : > { %v842_v23 = vpop.permute.xlu0 %841 }
  0xda   : > { %v844_v24 = vpop.permute.xlu1 %843 }
  0xdb   : > { %v894_v25 = vsel %vm889_vm0, %v842_v23, %v844_v24 }
  0xdc   : > { %1729 = vmatpush3.bf16.msra.mxu1 %v894_v25 }
  0xdd   : > { %v870_v26 = vpop.permute.xlu0 %869 }
  0xde   : > { %v872_v27 = vpop.permute.xlu1 %871 }
  0xdf   : > { %v901_v28 = vsel %vm889_vm0, %v870_v26, %v872_v27 }
  0xe0   : > { %1730 = vmatprep.subr.bf16.mxu1 %v901_v28 }
  0xe1   : > { %v838_v29 = vpop.permute.xlu0 %837 }
  0xe2   : > { %v840_v30 = vpop.permute.xlu1 %839 }
  0xe3   : > { %v893_v31 = vsel %vm889_vm0, %v838_v29, %v840_v30 }
  0xe4   : > { %1731 = vmatpush3.bf16.msra.mxu1 %v893_v31 }
  0xe5   : > { %v866_v32 = vpop.permute.xlu0 %865 }
  0xe6   : > { %v868_v33 = vpop.permute.xlu1 %867 }
  0xe7   : > { %v900_v34 = vsel %vm889_vm0, %v866_v32, %v868_v33 }
  0xe8   : > { %1732 = vmatprep.subr.bf16.mxu1 %v900_v34 }
  0xe9   : > { %v834_v35 = vpop.permute.xlu0 %833 }
  0xea   : > { %v836_v36 = vpop.permute.xlu1 %835 }
  0xeb   : > { %v892_v37 = vsel %vm889_vm0, %v834_v35, %v836_v36 }
  0xec   : > { %1733 = vmatpush3.bf16.msra.mxu1 %v892_v37 }
  0xed   : > { %v862_v38 = vpop.permute.xlu0 %861 }
  0xee   : > { %v864_v39 = vpop.permute.xlu1 %863 }
  0xef   : > { %v899_v40 = vsel %vm889_vm0, %v862_v38, %v864_v39 }
  0xf0   : > { %1734 = vmatprep.subr.bf16.mxu1 %v899_v40 }
  0xf1   : > { %v830_v41 = vpop.permute.xlu0 %829 }
  0xf2   : > { %v832_v42 = vpop.permute.xlu1 %831 }
  0xf3   : > { %v891_v43 = vsel %vm889_vm0, %v830_v41, %v832_v42 }
  0xf4   : > { %1735 = vmatpush3.bf16.msra.mxu1 %v891_v43 }
  0xf5   : > { %v858_v44 = vpop.permute.xlu0 %857 }
  0xf6   : > { %v860_v45 = vpop.permute.xlu1 %859 }
  0xf7   : > { %v898_v46 = vsel %vm889_vm0, %v858_v44, %v860_v45 }
  0xf8   : > { %1736 = vmatprep.subr.bf16.mxu1 %v898_v46 }
  0xf9   : > { %v826_v47 = vpop.permute.xlu0 %825 }
  0xfa   : > { %v828_v48 = vpop.permute.xlu1 %827 }
  0xfb   : > { %v890_v49 = vsel %vm889_vm0, %v826_v47, %v828_v48 }
  0xfc   : > { %1737 = vmatpush3.bf16.msra.mxu1 %v890_v49 }
  0xff   : > { %1340 = vmatmul.mubr.bf16.vlgmr.msra.gmra.mxu1 %v1874_v50 }
 0x100   : > { %1347 = vmatprep.mubr.bf16.mxu1 %v1880_v51 }
 0x106   : > { %v973_v33 = vpop.permute.xlu0 %972 }
 0x107   : > { %1348 = vmatmul.mubr.bf16.gmra.mxu1 %v1882_v52  ;;  %v978_v30 = vpop.permute.xlu1 %977 }
 0x108   : > { %1355 = vmatprep.mubr.bf16.mxu1 %v1886_v53 }
 0x10a   : > { %v2424_v38 = vpop.permute.xlu0 %987 }
 0x10b   : > { %v983_v35 = vpop.permute.xlu1 %982  ;;  %2490 = vst [vmem:[#allocation9_spill] sm:$0xff] %v2424_v38 }
 0x10e   : > { %v998_v44 = vpop.permute.xlu0 %997 }
 0x10f   : > { %1356 = vmatmul.mubr.bf16.gmra.mxu1 %v1888_v54  ;;  %v993_v40 = vpop.permute.xlu1 %992 }
 0x110   : > { %1363 = vmatprep.mubr.bf16.mxu1 %v1892_v55 }
 0x112   : > { %v1008_v51 = vpop.permute.xlu0 %1007 }
 0x113   : > { %v1003_v47 = vpop.permute.xlu1 %1002 }
 0x117   : > { %1364 = vmatmul.mubr.bf16.gmra.mxu1 %v1894_v56  ;;  %v1013_v53 = vpop.permute.xlu1 %1012 }
 0x118   : > { %1371 = vmatprep.mubr.bf16.mxu1 %v1898_v57 }
 0x11b   : > { %v1023_v38 = vpop.permute.xlu1 %1022 }
 0x11f   : > { %1372 = vmatmul.mubr.bf16.gmra.mxu1 %v1900_v58 }
 0x120   : > { %1379 = vmatprep.mubr.bf16.mxu1 %v1901_v59  ;;  %v1018_v59 = vpop.permute.xlu0 %1017 }
 0x127   : > { %1380 = vmatmul.mubr.bf16.gmra.mxu1 %v1903_v60 }
 0x128   : > { %1387 = vmatprep.mubr.bf16.mxu1 %v1904_v61 }
 0x12b   : > { %v1674_v1 = vpop.f32.mrf.mxu0 }
 0x12d   : > { %v1675_v2 = vpop.f32.mrf.mxu0 }
 0x12e   : > { %v1676_v58 = vadd.f32 %v1675_v2, %v1674_v1 }
 0x12f   : > { %1388 = vmatmul.mubr.bf16.gmra.mxu1 %v1906_v62  ;;  %v1677_v3 = vpop.f32.mrf.mxu0 }
 0x130   : > { %1395 = vmatprep.mubr.bf16.mxu1 %v1907_v63 }
 0x131   : > { %v1678_v4 = vpop.f32.mrf.mxu0 }
 0x133   : > { %v2400_v5 = vpop.f32.mrf.mxu0 }
 0x135   : > { %v2402_v6 = vpop.f32.mrf.mxu0 }
 0x137   : > { %1396 = vmatmul.mubr.bf16.gmra.mxu1 %v1909_v0  ;;  %v2404_v7 = vpop.f32.mrf.mxu0  ;;  %v1679_v0 = vadd.f32 %v1678_v4, %v1677_v3 }
 0x139   : > { %v2406_v8 = vpop.f32.mrf.mxu0  ;;  %v1248_v4 = vadd.f32 %v1679_v0, %v978_v30 }
 0x13a   : > { %v1685_v3 = vadd.f32 %v2406_v8, %v2404_v7  ;;  %v1033_v8 = vpop.permute.xlu1 %1032 }
 0x13b   : > { %v1686_v9 = vpop.f32.mrf.mxu0 }
 0x13d   : > { %v1687_v10 = vpop.f32.mrf.mxu0 }
 0x13e   : > { %v1688_v56 = vadd.f32 %v1687_v10, %v1686_v9  ;;  %v1245_v9 = vadd.f32 %v1676_v58, %v973_v33 }
 0x13f   : > { %v1689_v11 = vpop.f32.mrf.mxu0 }
 0x141   : > { %v1690_v12 = vpop.f32.mrf.mxu0 }
 0x143   : > { %v1692_v13 = vpop.f32.mrf.mxu0 }
 0x145   : > { %v1693_v14 = vpop.f32.mrf.mxu0 }
 0x147   : > { %v2408_v15 = vpop.f32.mrf.mxu0 }
 0x149   : > { %v2410_v16 = vpop.f32.mrf.mxu0 }
 0x14b   : > { %v1698_v17 = vpop.f32.mrf.mxu0 }
 0x14d   : > { %v1699_v18 = vpop.f32.mrf.mxu0 }
 0x14e   : > { %v1700_v61 = vadd.f32 %v1699_v18, %v1698_v17 }
 0x14f   : > { %v1701_v21 = vpop.f32.mrf.mxu0 }
 0x151   : > { %v1702_v24 = vpop.f32.mrf.mxu0 }
 0x152   : > { %v1703_v1 = vadd.f32 %v1702_v24, %v1701_v21 }
 0x153   : > { %v2416_v27 = vpop.f32.mrf.mxu0 }
 0x155   : > { %v1705_v31 = vpop.f32.mrf.mxu0 }
 0x156   : > { %v1706_v24 = vadd.f32 %v1705_v31, %v2416_v27 }
 0x157   : > { %v2422_v36 = vpop.f32.mrf.mxu0 }
 0x158   : > { %2489 = vst [vmem:[#allocation8_spill] sm:$0xff] %v2422_v36  ;;  %v1277_v36 = vadd.f32 %v1700_v61, %v1013_v53 }
 0x159   : > { %v1708_v41 = vpop.f32.mrf.mxu0 }
 0x15b   : > { %v1710_v45 = vpop.f32.mrf.mxu0 }
 0x15d   : > { %v1711_v49 = vpop.f32.mrf.mxu0 }
 0x15e   : > { %v1712_v33 = vadd.f32 %v1711_v49, %v1710_v45  ;;  %v1285_v45 = vadd.f32 %v1706_v24, %v1023_v38 }
 0x15f   : > { %v1713_v54 = vpop.f32.mrf.mxu0 }
 0x161   : > { %v1714_v60 = vpop.f32.mrf.mxu0 }
 0x163   : > { %v1716_v10 = vpop.f32.mrf.mxu0 }
 0x165   : > { %v1717_v7 = vpop.f32.mrf.mxu0 }
 0x1bf   : > { %v1738_v19 = vpop.f32.mrf.mxu1 }
 0x1c1   : > { %v1739_v20 = vpop.f32.mrf.mxu1 }
 0x1c3   : > { %v1741_v22 = vpop.f32.mrf.mxu1 }
 0x1c5   : > { %v1742_v23 = vpop.f32.mrf.mxu1 }
 0x1c7   : > { %v2412_v25 = vpop.f32.mrf.mxu1 }
 0x1c8   : > { %2485 = vst [vmem:[#allocation4_spill] sm:$0xff] %v2412_v25  ;;  %v1682_v25 = vadd.f32 %v2402_v6, %v2400_v5 }
 0x1c9   : > { %v2414_v26 = vpop.f32.mrf.mxu1 }
 0x1ca   : > { %2486 = vst [vmem:[#allocation5_spill] sm:$0xff] %v2414_v26  ;;  %v1253_v21 = vadd.f32 %v1682_v25, %v983_v35 }
 0x1cb   : > { %v2418_v28 = vpop.f32.mrf.mxu1 }
 0x1cc   : > { %2487 = vst [vmem:[#allocation6_spill] sm:$0xff] %v2418_v28  ;;  %v1740_v28 = vadd.f32 %v1739_v20, %v1738_v19  ;;  %v1028_v19 = vpop.permute.xlu0 %1027 }
 0x1cd   : > { %v2420_v29 = vpop.f32.mrf.mxu1 }
 0x1ce   : > { %2488 = vst [vmem:[#allocation7_spill] sm:$0xff] %v2420_v29  ;;  %v1691_v29 = vadd.f32 %v1690_v12, %v1689_v11  ;;  %v1697_v11 = vadd.f32 %v2410_v16, %v2408_v15  ;;  %v1743_v12 = vadd.f32 %v1742_v23, %v1741_v22  ;;  %v1342_v20 = vadd.f32 %v1740_v28, %v1245_v9  ;;  %v2494_v28 = vld [vmem:[#allocation8_spill] sm:$0xff] }
 0x1cf   : > { %v1750_v32 = vpop.f32.mrf.mxu1  ;;  %v1280_v15 = vadd.f32 %v1703_v1, %v1018_v59  ;;  %v1715_v16 = vadd.f32 %v1714_v60, %v1713_v54  ;;  %v2496_v27 = vld [vmem:[#allocation4_spill] sm:$0xff]  ;;  %v1043_v59 = vpop.permute.xlu1 %1042 }
 0x1d0   : > { %v1264_v5 = vadd.f32 %v1691_v29, %v998_v44  ;;  %v1345_v23 = vadd.f32 %v1743_v12, %v1248_v4  ;;  %v1709_v29 = vadd.f32 %v1708_v41, %v2494_v28  ;;  %v1404_v25 = vmax.f32 %v1342_v20, 0.0 }
 0x1d1   : > { %v1751_v34 = vpop.f32.mrf.mxu1  ;;  %v2497_v31 = vld [vmem:[#allocation5_spill] sm:$0xff] }
 0x1d2   : > { %v1752_v62 = vadd.f32 %v1751_v34, %v1750_v32  ;;  %v1746_v35 = vadd.f32 %v2497_v31, %v2496_v27  ;;  %v1405_v54 = vmax.f32 %v1345_v23, 0.0 }
 0x1d3   : > { %v1753_v37 = vpop.f32.mrf.mxu1  ;;  %v2500_v38 = vld [vmem:[#allocation6_spill] sm:$0xff] }
 0x1d4   : > { %v1350_v61 = vadd.f32 %v1746_v35, %v1253_v21 }
 0x1d5   : > { %v1754_v39 = vpop.f32.mrf.mxu1 }
 0x1d6   : > { %v1755_v17 = vadd.f32 %v1754_v39, %v1753_v37 }
 0x1d7   : > { %v2426_v42 = vpop.f32.mrf.mxu1 }
 0x1d8   : > { %2491 = vst [vmem:[#allocation10_spill] sm:$0xff] %v2426_v42  ;;  %v1694_v42 = vadd.f32 %v1693_v14, %v1692_v13  ;;  %v1361_v34 = vadd.f32 %v1755_v17, %v1264_v5  ;;  %v1288_v5 = vadd.f32 %v1709_v29, %v1028_v19 }
 0x1d9   : > { %v1757_v43 = vpop.f32.mrf.mxu1 }
 0x1da   : > { %v1269_v32 = vadd.f32 %v1694_v42, %v1003_v47  ;;  %v1038_v47 = vpop.permute.xlu0 %1037 }
 0x1db   : > { %v2428_v46 = vpop.f32.mrf.mxu1 }
 0x1dc   : > { %2492 = vst [vmem:[#allocation11_spill] sm:$0xff] %v2428_v46 }
 0x1dd   : > { %v2430_v48 = vpop.f32.mrf.mxu1 }
 0x1de   : > { %2493 = vst [vmem:[#allocation12_spill] sm:$0xff] %v2430_v48  ;;  %v1261_v48 = vadd.f32 %v1688_v56, %v993_v40 }
 0x1df   : > { %v1762_v50 = vpop.f32.mrf.mxu1  ;;  %v2495_v37 = vld [vmem:[#allocation10_spill] sm:$0xff] }
 0x1e0   : > { %v1358_v2 = vadd.f32 %v1752_v62, %v1261_v48  ;;  %v1758_v39 = vadd.f32 %v1757_v43, %v2495_v37  ;;  %v1719_v48 = vpop.f32.mrf.mxu0  ;;  %v1718_v43 = vadd.f32 %v1717_v7, %v1716_v10  ;;  %v2501_v62 = vld [vmem:[#allocation7_spill] sm:$0xff]  ;;  %v1406_v7 = vmax.f32 %v1350_v61, 0.0 }
 0x1e1   : > { %v1763_v52 = vpop.f32.mrf.mxu1  ;;  %v1749_v0 = vadd.f32 %v2501_v62, %v2500_v38 }
 0x1e2   : > { %v1764_v46 = vadd.f32 %v1763_v52, %v1762_v50  ;;  %v1408_v30 = vmax.f32 %v1358_v2, 0.0  ;;  %v1296_v52 = vadd.f32 %v1715_v16, %v1038_v47  ;;  %v1720_v1 = vpop.f32.mrf.mxu0 }
 0x1e3   : > { %v1765_v55 = vpop.f32.mrf.mxu1  ;;  %v2498_v56 = vld [vmem:[#allocation11_spill] sm:$0xff] }
 0x1e4   : > { %v1374_v6 = vadd.f32 %v1764_v46, %v1277_v36  ;;  %v1272_v36 = vadd.f32 %v1697_v11, %v1008_v51  ;;  %v1293_v46 = vadd.f32 %v1712_v33, %v1033_v8  ;;  %v1420_v50 = vmax.f32 %v1404_v25, %v1408_v30  ;;  %v2502_v11 = vld [vmem:[#allocation9_spill] sm:$0xff] }
 0x1e5   : > { %v1766_v57 = vpop.f32.mrf.mxu1  ;;  %v1409_v51 = vmax.f32 %v1361_v34, 0.0  ;;  %v1256_v12 = vadd.f32 %v1685_v3, %v2502_v11  ;;  %v1048_v3 = vpop.permute.xlu0 %1047 }
 0x1e6   : > { %v1767_v13 = vadd.f32 %v1766_v57, %v1765_v55  ;;  %v1412_v40 = vmax.f32 %v1374_v6, 0.0  ;;  %v1366_v55 = vadd.f32 %v1758_v39, %v1269_v32  ;;  %v2499_v57 = vld [vmem:[#allocation12_spill] sm:$0xff]  ;;  %v1301_v6 = vadd.f32 %v1718_v43, %v1043_v59 }
 0x1e7   : > { %v1768_v63 = vpop.f32.mrf.mxu1  ;;  %v1761_v58 = vadd.f32 %v2499_v57, %v2498_v56  ;;  %v1421_v20 = vmax.f32 %v1405_v54, %v1409_v51 }
 0x1e8   : > { %v1377_v42 = vadd.f32 %v1767_v13, %v1280_v15  ;;  %v1424_v9 = vmax.f32 %v1420_v50, %v1412_v40  ;;  %v1410_v21 = vmax.f32 %v1366_v55, 0.0 }
 0x1e9   : > { %v1769_v26 = vpop.f32.mrf.mxu1  ;;  %v1369_v24 = vadd.f32 %v1761_v58, %v1272_v36 }
 0x1ea   : > { %v1770_v49 = vadd.f32 %v1769_v26, %v1768_v63  ;;  %v1413_v26 = vmax.f32 %v1377_v42, 0.0  ;;  %v1422_v23 = vmax.f32 %v1406_v7, %v1410_v21 }
 0x1eb   : > { %v1771_v18 = vpop.f32.mrf.mxu1  ;;  %v1411_v28 = vmax.f32 %v1369_v24, 0.0 }
 0x1ec   : > { %v1382_v2 = vadd.f32 %v1770_v49, %v1285_v45  ;;  %v1425_v8 = vmax.f32 %v1421_v20, %v1413_v26 }
 0x1ed   : > { %v1772_v14 = vpop.f32.mrf.mxu1 }
 0x1ee   : > { %v1773_v10 = vadd.f32 %v1772_v14, %v1771_v18  ;;  %v1353_v18 = vadd.f32 %v1749_v0, %v1256_v12  ;;  %v1721_v14 = vadd.f32 %v1720_v1, %v1719_v48  ;;  %v1414_v19 = vmax.f32 %v1382_v2, 0.0 }
 0x1ef   : > { %v1774_v22 = vpop.f32.mrf.mxu1 }
 0x1f0   : > { %v1385_v34 = vadd.f32 %v1773_v10, %v1288_v5  ;;  %v1407_v37 = vmax.f32 %v1353_v18, 0.0  ;;  %v1304_v39 = vadd.f32 %v1721_v14, %v1048_v3  ;;  %v1426_v27 = vmax.f32 %v1422_v23, %v1414_v19 }
 0x1f1   : > { %v1775_v44 = vpop.f32.mrf.mxu1 }
 0x1f2   : > { %v1776_v41 = vadd.f32 %v1775_v44, %v1774_v22  ;;  %v1415_v31 = vmax.f32 %v1385_v34, 0.0  ;;  %v1423_v42 = vmax.f32 %v1407_v37, %v1411_v28 }
 0x1f3   : > { %v1777_v53 = vpop.f32.mrf.mxu1 }
 0x1f4   : > { %v1390_v60 = vadd.f32 %v1776_v41, %v1293_v46  ;;  %v1427_v46 = vmax.f32 %v1423_v42, %v1415_v31 }
 0x1f5   : > { %v1778_v63 = vpop.f32.mrf.mxu1 }
 0x1f6   : > { %v1416_v17 = vmax.f32 %v1390_v60, 0.0  ;;  %v1779_v4 = vadd.f32 %v1778_v63, %v1777_v53 }
 0x1f7   : > { %v1780_v13 = vpop.f32.mrf.mxu1 }
 0x1f8   : > { %v1428_v32 = vmax.f32 %v1424_v9, %v1416_v17  ;;  %v1393_v33 = vadd.f32 %v1779_v4, %v1296_v52 }
 0x1f9   : > { %v1781_v30 = vpop.f32.mrf.mxu1 }
 0x1fa   : > { %1432 = vst [vmem:[%s2458_s15] sm:$0xff] %v1428_v32  ;;  %v1417_v15 = vmax.f32 %v1393_v33, 0.0  ;;  %v1782_v16 = vadd.f32 %v1781_v30, %v1780_v13 }
 0x1fb   : > { %v1783_v22 = vpop.f32.mrf.mxu1 }
 0x1fc   : > { %v1429_v29 = vmax.f32 %v1425_v8, %v1417_v15  ;;  %v1398_v36 = vadd.f32 %v1782_v16, %v1301_v6 }
 0x1fd   : > { %v1784_v25 = vpop.f32.mrf.mxu1 }
 0x1fe   : > { %1433 = vst [vmem:[%s2458_s15 + $0x8] sm:$0xff] %v1429_v29  ;;  %v1418_v35 = vmax.f32 %v1398_v36, 0.0  ;;  %v1785_v40 = vadd.f32 %v1784_v25, %v1783_v22 }
 0x200   : > { %v1430_v44 = vmax.f32 %v1426_v27, %v1418_v35  ;;  %v1401_v45 = vadd.f32 %v1785_v40, %v1304_v39 }
 0x202   : > { %1434 = vst [vmem:[%s2458_s15 + $0x10] sm:$0xff] %v1430_v44  ;;  %v1419_v47 = vmax.f32 %v1401_v45, 0.0 }
 0x204   : > { %v1431_v48 = vmax.f32 %v1427_v46, %v1419_v47 }
 0x206   : > { %1435 = vst [vmem:[%s2458_s15 + $0x18] sm:$0xff] %v1431_v48 }
 0x207 PF: > { %s14_s19 = sadd.s32 1, %s1948_s19   ;;  %s2503_s15 = smov %s1936_s16 }
 0x208   : > { %p11_p10 = scmp.ge.s32.totalorder %s14_s19, 4   ;;  %s2504_s16 = smov %s2016_s24 }
 0x209   : > { %s2505_s17 = smov %s1944_s18  ;;  %s2506_s18 = smov %s2508_s20 }
 0x20a   :  { %13 = sbr.rel (!%p11_p10) target bundleno = 3 (0x3), region = 161 }

// kernel: tile.20
= control target key start
LH: loop header
LB: loop body
LE: loop exit
PB: predicated region body
PF: predicated region fallthrough
CT: control target
= control target key end

     0   :  { %s22_s0 = inlined_call_operand.vmem [shape: f32[64], index: 0, kind: input, shape index: {}]   ;;  %s23_s1 = inlined_call_operand.vmem [shape: f32[4,64], index: 1, kind: output, shape index: {}]  }
   0x1   :  { %v4_v0 = vld [vmem:[%s22_s0] ss:$0 sm:$0xff] }
   0x2   :  { %5 = vst [vmem:[%s23_s1] sm:$0xf] %v4_v0 }

// kernel: tile.0
= control target key start
LH: loop header
LB: loop body
LE: loop exit
PB: predicated region body
PF: predicated region fallthrough
CT: control target
= control target key end

     0   :  { %s1091_s8 = smov 125   ;;  %s1092_s9 = smov 126   ;;  %vm8_vm0 = vcmask 7168   ;;  %s2190_s0 = inlined_call_operand.vmem [shape: f32[4,64], index: 0, kind: input, shape index: {}]   ;;  %s2191_s1 = inlined_call_operand.vmem [shape: f32[256,1], index: 1, kind: output, shape index: {}]  }
   0x1   :  { %v5_v0 = vld [vmem:[%s2190_s0] sm:$0xf]  ;;  %s1090_s0 = smov 127   ;;  %s1093_s10 = smov 124  }
   0x2   :  { %6 = vst [vmem:[#allocation0] sm:$0xf] %v5_v0  ;;  %s1094_s11 = smov 123   ;;  %s1095_s12 = smov 122  }
   0x3   :  { %s1096_s13 = smov 121   ;;  %s1097_s14 = smov 120  }
   0x4   :  { %s1098_s15 = smov 119   ;;  %s1099_s16 = smov 118  }
   0x5   :  { %s1100_s17 = smov 117   ;;  %s1101_s18 = smov 116  }
   0x6   :  { %s1102_s19 = smov 115   ;;  %s1103_s20 = smov 114  }
   0x7   :  { %s1104_s21 = smov 113   ;;  %s1105_s22 = smov 112  }
   0x8   :  { %s1106_s23 = smov 111   ;;  %s1107_s24 = smov 110  }
   0x9   :  { %v16_v1 = vld [vmem:[#allocation0] sm:$0xf]   ;;  %s1108_s25 = smov 109   ;;  %s1109_s26 = smov 108  }
   0xa   :  { %v40_v2 = vld [vmem:[#allocation0] sm:$0xf]   ;;  %17 = vrot.lane.b32.xlu0 %v16_v1, %s1090_s0  ;;  %s1110_s27 = smov 107   ;;  %s1111_s28 = smov 106  }
   0xb   :  { %41 = vrot.lane.b32.xlu1 %v40_v2, %s1091_s8  ;;  %v28_v3 = vld [vmem:[#allocation0] sm:$0xf]   ;;  %s1112_s29 = smov 105   ;;  %s1113_s30 = smov 104  }
   0xc   :  { %v52_v4 = vld [vmem:[#allocation0] sm:$0xf]   ;;  %s1114_s2 = smov 103   ;;  %s1115_s3 = smov 102  }
   0xd   :  { %v64_v5 = vld [vmem:[#allocation0] sm:$0xf]   ;;  %s1116_s4 = smov 101   ;;  %s1117_s5 = smov 100  }
   0xe   :  { %29 = vrot.lane.b32.xlu0 %v28_v3, %s1092_s9  ;;  %v76_v6 = vld [vmem:[#allocation0] sm:$0xf]   ;;  %s1118_s6 = smov 99   ;;  %s1119_s7 = smov 98  }
   0xf   :  { %53 = vrot.lane.b32.xlu1 %v52_v4, %s1093_s10  ;;  %v88_v7 = vld [vmem:[#allocation0] sm:$0xf]   ;;  %s1120_s0 = smov 97   ;;  %s1121_s8 = smov 96  }
  0x10   :  { %v100_v8 = vld [vmem:[#allocation0] sm:$0xf]   ;;  %s1122_s9 = smov 95   ;;  %s1123_s10 = smov 94  }
  0x11   :  { %v112_v9 = vld [vmem:[#allocation0] sm:$0xf]  }
  0x12   :  { %65 = vrot.lane.b32.xlu0 %v64_v5, %s1094_s11  ;;  %v124_v10 = vld [vmem:[#allocation0] sm:$0xf]   ;;  %s1124_s11 = smov 93  }
  0x13   :  { %77 = vrot.lane.b32.xlu1 %v76_v6, %s1095_s12  ;;  %v136_v11 = vld [vmem:[#allocation0] sm:$0xf]   ;;  %s1125_s12 = smov 92  }
  0x14   :  { %v148_v12 = vld [vmem:[#allocation0] sm:$0xf]  }
  0x15   :  { %v160_v13 = vld [vmem:[#allocation0] sm:$0xf]  }
  0x16   :  { %89 = vrot.lane.b32.xlu0 %v88_v7, %s1096_s13  ;;  %v172_v14 = vld [vmem:[#allocation0] sm:$0xf]   ;;  %s1126_s13 = smov 91  }
  0x17   :  { %101 = vrot.lane.b32.xlu1 %v100_v8, %s1097_s14  ;;  %v184_v15 = vld [vmem:[#allocation0] sm:$0xf]   ;;  %s1127_s14 = smov 90  }
  0x18   :  { %v196_v16 = vld [vmem:[#allocation0] sm:$0xf]  }
  0x19   :  { %v208_v17 = vld [vmem:[#allocation0] sm:$0xf]  }
  0x1a   :  { %113 = vrot.lane.b32.xlu0 %v112_v9, %s1098_s15  ;;  %v220_v18 = vld [vmem:[#allocation0] sm:$0xf]   ;;  %s1128_s15 = smov 89  }
  0x1b   :  { %125 = vrot.lane.b32.xlu1 %v124_v10, %s1099_s16  ;;  %v232_v19 = vld [vmem:[#allocation0] sm:$0xf]   ;;  %s1129_s16 = smov 88  }
  0x1c   :  { %v244_v20 = vld [vmem:[#allocation0] sm:$0xf]  }
  0x1d   :  { %v256_v21 = vld [vmem:[#allocation0] sm:$0xf]  }
  0x1e   :  { %137 = vrot.lane.b32.xlu0 %v136_v11, %s1100_s17  ;;  %v268_v22 = vld [vmem:[#allocation0] sm:$0xf]   ;;  %s1130_s17 = smov 87  }
  0x1f   :  { %149 = vrot.lane.b32.xlu1 %v148_v12, %s1101_s18  ;;  %v280_v23 = vld [vmem:[#allocation0] sm:$0xf]   ;;  %s1131_s18 = smov 86  }
  0x20   :  { %v292_v24 = vld [vmem:[#allocation0] sm:$0xf]  }
  0x21   :  { %v304_v25 = vld [vmem:[#allocation0] sm:$0xf]  }
  0x22   :  { %161 = vrot.lane.b32.xlu0 %v160_v13, %s1102_s19  ;;  %v316_v26 = vld [vmem:[#allocation0] sm:$0xf]   ;;  %s1132_s19 = smov 85  }
  0x23   :  { %173 = vrot.lane.b32.xlu1 %v172_v14, %s1103_s20  ;;  %v328_v27 = vld [vmem:[#allocation0] sm:$0xf]   ;;  %s1133_s20 = smov 84  }
  0x24   :  { %v340_v28 = vld [vmem:[#allocation0] sm:$0xf]  }
  0x25   :  { %v352_v29 = vld [vmem:[#allocation0] sm:$0xf]  }
  0x26   :  { %185 = vrot.lane.b32.xlu0 %v184_v15, %s1104_s21  ;;  %v364_v30 = vld [vmem:[#allocation0] sm:$0xf]   ;;  %s1134_s21 = smov 83  }
  0x27   :  { %197 = vrot.lane.b32.xlu1 %v196_v16, %s1105_s22  ;;  %v376_v31 = vld [vmem:[#allocation0] sm:$0xf]   ;;  %s1135_s22 = smov 82  }
  0x28   :  { %v388_v32 = vld [vmem:[#allocation0] sm:$0xf]  }
  0x29   :  { %v400_v33 = vld [vmem:[#allocation0] sm:$0xf]  }
  0x2a   :  { %209 = vrot.lane.b32.xlu0 %v208_v17, %s1106_s23  ;;  %v412_v34 = vld [vmem:[#allocation0] sm:$0xf]   ;;  %s1136_s23 = smov 81  }
  0x2b   :  { %221 = vrot.lane.b32.xlu1 %v220_v18, %s1107_s24  ;;  %v424_v35 = vld [vmem:[#allocation0] sm:$0xf]   ;;  %s1137_s24 = smov 80  }
  0x2c   :  { %v436_v36 = vld [vmem:[#allocation0] sm:$0xf]  }
  0x2d   :  { %v448_v37 = vld [vmem:[#allocation0] sm:$0xf]  }
  0x2e   :  { %233 = vrot.lane.b32.xlu0 %v232_v19, %s1108_s25  ;;  %v460_v38 = vld [vmem:[#allocation0] sm:$0xf]   ;;  %s1138_s25 = smov 79  }
  0x2f   :  { %245 = vrot.lane.b32.xlu1 %v244_v20, %s1109_s26  ;;  %v472_v39 = vld [vmem:[#allocation0] sm:$0xf]   ;;  %s1139_s26 = smov 78  }
  0x30   :  { %v484_v40 = vld [vmem:[#allocation0] sm:$0xf]  }
  0x31   :  { %v496_v41 = vld [vmem:[#allocation0] sm:$0xf]  }
  0x32   :  { %257 = vrot.lane.b32.xlu0 %v256_v21, %s1110_s27  ;;  %v508_v42 = vld [vmem:[#allocation0] sm:$0xf]   ;;  %s1140_s27 = smov 77  }
  0x33   :  { %269 = vrot.lane.b32.xlu1 %v268_v22, %s1111_s28  ;;  %v520_v43 = vld [vmem:[#allocation0] sm:$0xf]   ;;  %s1141_s28 = smov 76  }
  0x34   :  { %v532_v44 = vld [vmem:[#allocation0] sm:$0xf]  }
  0x35   :  { %v544_v45 = vld [vmem:[#allocation0] sm:$0xf]  }
  0x36   :  { %281 = vrot.lane.b32.xlu0 %v280_v23, %s1112_s29  ;;  %v556_v46 = vld [vmem:[#allocation0] sm:$0xf]   ;;  %s1142_s29 = smov 75  }
  0x37   :  { %293 = vrot.lane.b32.xlu1 %v292_v24, %s1113_s30  ;;  %v568_v47 = vld [vmem:[#allocation0] sm:$0xf]   ;;  %s1143_s30 = smov 74  }
  0x38   :  { %v580_v48 = vld [vmem:[#allocation0] sm:$0xf]  }
  0x39   :  { %v592_v49 = vld [vmem:[#allocation0] sm:$0xf]  }
  0x3a   :  { %305 = vrot.lane.b32.xlu0 %v304_v25, %s1114_s2  ;;  %v604_v50 = vld [vmem:[#allocation0] sm:$0xf]   ;;  %s1144_s2 = smov 73  }
  0x3b   :  { %317 = vrot.lane.b32.xlu1 %v316_v26, %s1115_s3  ;;  %v616_v51 = vld [vmem:[#allocation0] sm:$0xf]   ;;  %s1145_s3 = smov 72  }
  0x3c   :  { %v628_v52 = vld [vmem:[#allocation0] sm:$0xf]  }
  0x3d   :  { %v640_v53 = vld [vmem:[#allocation0] sm:$0xf]  }
  0x3e   :  { %329 = vrot.lane.b32.xlu0 %v328_v27, %s1116_s4  ;;  %v652_v54 = vld [vmem:[#allocation0] sm:$0xf]  }
  0x3f   :  { %341 = vrot.lane.b32.xlu1 %v340_v28, %s1117_s5  ;;  %v664_v55 = vld [vmem:[#allocation0] sm:$0xf]  }
  0x40   :  { %v676_v56 = vld [vmem:[#allocation0] sm:$0xf]  }
  0x41   :  { %v688_v57 = vld [vmem:[#allocation0] sm:$0xf]  }
  0x42   :  { %353 = vrot.lane.b32.xlu0 %v352_v29, %s1118_s6  ;;  %v700_v58 = vld [vmem:[#allocation0] sm:$0xf]   ;;  %s1152_s6 = smov 65  }
  0x43   :  { %365 = vrot.lane.b32.xlu1 %v364_v30, %s1119_s7  ;;  %v7_v59 = vld [vmem:[#allocation0] sm:$0xf]  }
  0x44   :  { %9 = vst.msk [vmem:[%s2191_s1] sm:$0x1] %vm8_vm0, %v7_v59   ;;  %772 = vst.msk [vmem:[%s2191_s1 + $0x3f] sm:$0x2] %vm8_vm0, %v7_v59   ;;  %v712_v60 = vld [vmem:[#allocation0] sm:$0xf]  }
  0x45   :  { %773 = vst.msk [vmem:[%s2191_s1 + $0x7e] sm:$0x4] %vm8_vm0, %v7_v59   ;;  %774 = vst.msk [vmem:[%s2191_s1 + $0xbd] sm:$0x8] %vm8_vm0, %v7_v59   ;;  %v724_v61 = vld [vmem:[#allocation0] sm:$0xf]  }
  0x46   :  { %377 = vrot.lane.b32.xlu0 %v376_v31, %s1120_s0  ;;  %v736_v0 = vld [vmem:[#allocation0] sm:$0xf]  }
  0x47   :  { %389 = vrot.lane.b32.xlu1 %v388_v32, %s1121_s8  ;;  %v748_v1 = vld [vmem:[#allocation0] sm:$0xf]  }
  0x48   :  { %v760_v4 = vld [vmem:[#allocation0] sm:$0xf]  }
  0x4a   :  { %401 = vrot.lane.b32.xlu0 %v400_v33, %s1122_s9 }
  0x4b   :  { %413 = vrot.lane.b32.xlu1 %v412_v34, %s1123_s10 }
  0x4e   :  { %425 = vrot.lane.b32.xlu0 %v424_v35, %s1124_s11  ;;  %s1146_s11 = smov 71  }
  0x4f   :  { %437 = vrot.lane.b32.xlu1 %v436_v36, %s1125_s12  ;;  %s1147_s12 = smov 70  }
  0x52   :  { %449 = vrot.lane.b32.xlu0 %v448_v37, %s1126_s13 }
  0x53   :  { %461 = vrot.lane.b32.xlu1 %v460_v38, %s1127_s14 }
  0x56   :  { %473 = vrot.lane.b32.xlu0 %v472_v39, %s1128_s15 }
  0x57   :  { %485 = vrot.lane.b32.xlu1 %v484_v40, %s1129_s16 }
  0x5a   :  { %497 = vrot.lane.b32.xlu0 %v496_v41, %s1130_s17  ;;  %s1150_s17 = smov 67  }
  0x5b   :  { %509 = vrot.lane.b32.xlu1 %v508_v42, %s1131_s18  ;;  %s1151_s18 = smov 66  }
  0x5e   :  { %521 = vrot.lane.b32.xlu0 %v520_v43, %s1132_s19 }
  0x5f   :  { %533 = vrot.lane.b32.xlu1 %v532_v44, %s1133_s20 }
  0x62   :  { %545 = vrot.lane.b32.xlu0 %v544_v45, %s1134_s21 }
  0x63   :  { %557 = vrot.lane.b32.xlu1 %v556_v46, %s1135_s22 }
  0x66   :  { %569 = vrot.lane.b32.xlu0 %v568_v47, %s1136_s23 }
  0x67   :  { %581 = vrot.lane.b32.xlu1 %v580_v48, %s1137_s24 }
  0x6a   :  { %593 = vrot.lane.b32.xlu0 %v592_v49, %s1138_s25 }
  0x6b   :  { %605 = vrot.lane.b32.xlu1 %v604_v50, %s1139_s26 }
  0x6e   :  { %617 = vrot.lane.b32.xlu0 %v616_v51, %s1140_s27 }
  0x6f   :  { %629 = vrot.lane.b32.xlu1 %v628_v52, %s1141_s28 }
  0x72   :  { %641 = vrot.lane.b32.xlu0 %v640_v53, %s1142_s29  ;;  %s1148_s29 = smov 69  }
  0x73   :  { %653 = vrot.lane.b32.xlu1 %v652_v54, %s1143_s30  ;;  %s1149_s30 = smov 68  }
  0x76   :  { %665 = vrot.lane.b32.xlu0 %v664_v55, %s1144_s2 }
  0x77   :  { %677 = vrot.lane.b32.xlu1 %v676_v56, %s1145_s3 }
  0x7a   :  { %689 = vrot.lane.b32.xlu0 %v688_v57, %s1146_s11 }
  0x7b   :  { %701 = vrot.lane.b32.xlu1 %v700_v58, %s1147_s12 }
  0x7c   :  { %v18_v62 = vpop.permute.xlu0 %17  }
  0x7d   :  { %v42_v63 = vpop.permute.xlu1 %41   ;;  %775 = vst.msk [vmem:[%s2191_s1 + $0x1] sm:$0x1] %vm8_vm0, %v18_v62   ;;  %776 = vst.msk [vmem:[%s2191_s1 + $0x40] sm:$0x2] %vm8_vm0, %v18_v62  }
  0x7e   :  { %777 = vst.msk [vmem:[%s2191_s1 + $0x7f] sm:$0x4] %vm8_vm0, %v18_v62   ;;  %778 = vst.msk [vmem:[%s2191_s1 + $0xbe] sm:$0x8] %vm8_vm0, %v18_v62   ;;  %713 = vrot.lane.b32.xlu0 %v712_v60, %s1148_s29 }
  0x7f   :  { %783 = vst.msk [vmem:[%s2191_s1 + $0x3] sm:$0x1] %vm8_vm0, %v42_v63   ;;  %784 = vst.msk [vmem:[%s2191_s1 + $0x42] sm:$0x2] %vm8_vm0, %v42_v63   ;;  %725 = vrot.lane.b32.xlu1 %v724_v61, %s1149_s30 }
  0x80   :  { %785 = vst.msk [vmem:[%s2191_s1 + $0x81] sm:$0x4] %vm8_vm0, %v42_v63   ;;  %786 = vst.msk [vmem:[%s2191_s1 + $0xc0] sm:$0x8] %vm8_vm0, %v42_v63   ;;  %v30_v2 = vpop.permute.xlu0 %29  }
  0x81   :  { %v54_v3 = vpop.permute.xlu1 %53   ;;  %779 = vst.msk [vmem:[%s2191_s1 + $0x2] sm:$0x1] %vm8_vm0, %v30_v2   ;;  %780 = vst.msk [vmem:[%s2191_s1 + $0x41] sm:$0x2] %vm8_vm0, %v30_v2  }
  0x82   :  { %781 = vst.msk [vmem:[%s2191_s1 + $0x80] sm:$0x4] %vm8_vm0, %v30_v2   ;;  %782 = vst.msk [vmem:[%s2191_s1 + $0xbf] sm:$0x8] %vm8_vm0, %v30_v2   ;;  %737 = vrot.lane.b32.xlu0 %v736_v0, %s1150_s17 }
  0x83   :  { %787 = vst.msk [vmem:[%s2191_s1 + $0x4] sm:$0x1] %vm8_vm0, %v54_v3   ;;  %788 = vst.msk [vmem:[%s2191_s1 + $0x43] sm:$0x2] %vm8_vm0, %v54_v3   ;;  %749 = vrot.lane.b32.xlu1 %v748_v1, %s1151_s18 }
  0x84   :  { %789 = vst.msk [vmem:[%s2191_s1 + $0x82] sm:$0x4] %vm8_vm0, %v54_v3   ;;  %790 = vst.msk [vmem:[%s2191_s1 + $0xc1] sm:$0x8] %vm8_vm0, %v54_v3   ;;  %v66_v5 = vpop.permute.xlu0 %65  }
  0x85   :  { %v78_v6 = vpop.permute.xlu1 %77   ;;  %791 = vst.msk [vmem:[%s2191_s1 + $0x5] sm:$0x1] %vm8_vm0, %v66_v5   ;;  %792 = vst.msk [vmem:[%s2191_s1 + $0x44] sm:$0x2] %vm8_vm0, %v66_v5  }
  0x86   :  { %793 = vst.msk [vmem:[%s2191_s1 + $0x83] sm:$0x4] %vm8_vm0, %v66_v5   ;;  %794 = vst.msk [vmem:[%s2191_s1 + $0xc2] sm:$0x8] %vm8_vm0, %v66_v5   ;;  %761 = vrot.lane.b32.xlu0 %v760_v4, %s1152_s6 }
  0x87   :  { %795 = vst.msk [vmem:[%s2191_s1 + $0x6] sm:$0x1] %vm8_vm0, %v78_v6   ;;  %796 = vst.msk [vmem:[%s2191_s1 + $0x45] sm:$0x2] %vm8_vm0, %v78_v6  }
  0x88   :  { %797 = vst.msk [vmem:[%s2191_s1 + $0x84] sm:$0x4] %vm8_vm0, %v78_v6   ;;  %798 = vst.msk [vmem:[%s2191_s1 + $0xc3] sm:$0x8] %vm8_vm0, %v78_v6   ;;  %v90_v7 = vpop.permute.xlu0 %89  }
  0x89   :  { %v102_v8 = vpop.permute.xlu1 %101   ;;  %799 = vst.msk [vmem:[%s2191_s1 + $0x7] sm:$0x1] %vm8_vm0, %v90_v7   ;;  %800 = vst.msk [vmem:[%s2191_s1 + $0x46] sm:$0x2] %vm8_vm0, %v90_v7  }
  0x8a   :  { %801 = vst.msk [vmem:[%s2191_s1 + $0x85] sm:$0x4] %vm8_vm0, %v90_v7   ;;  %802 = vst.msk [vmem:[%s2191_s1 + $0xc4] sm:$0x8] %vm8_vm0, %v90_v7  }
  0x8b   :  { %803 = vst.msk [vmem:[%s2191_s1 + $0x8] sm:$0x1] %vm8_vm0, %v102_v8   ;;  %804 = vst.msk [vmem:[%s2191_s1 + $0x47] sm:$0x2] %vm8_vm0, %v102_v8  }
  0x8c   :  { %805 = vst.msk [vmem:[%s2191_s1 + $0x86] sm:$0x4] %vm8_vm0, %v102_v8   ;;  %806 = vst.msk [vmem:[%s2191_s1 + $0xc5] sm:$0x8] %vm8_vm0, %v102_v8   ;;  %v114_v9 = vpop.permute.xlu0 %113  }
  0x8d   :  { %v126_v10 = vpop.permute.xlu1 %125   ;;  %807 = vst.msk [vmem:[%s2191_s1 + $0x9] sm:$0x1] %vm8_vm0, %v114_v9   ;;  %808 = vst.msk [vmem:[%s2191_s1 + $0x48] sm:$0x2] %vm8_vm0, %v114_v9  }
  0x8e   :  { %809 = vst.msk [vmem:[%s2191_s1 + $0x87] sm:$0x4] %vm8_vm0, %v114_v9   ;;  %810 = vst.msk [vmem:[%s2191_s1 + $0xc6] sm:$0x8] %vm8_vm0, %v114_v9  }
  0x8f   :  { %811 = vst.msk [vmem:[%s2191_s1 + $0xa] sm:$0x1] %vm8_vm0, %v126_v10   ;;  %812 = vst.msk [vmem:[%s2191_s1 + $0x49] sm:$0x2] %vm8_vm0, %v126_v10  }
  0x90   :  { %813 = vst.msk [vmem:[%s2191_s1 + $0x88] sm:$0x4] %vm8_vm0, %v126_v10   ;;  %814 = vst.msk [vmem:[%s2191_s1 + $0xc7] sm:$0x8] %vm8_vm0, %v126_v10   ;;  %v138_v11 = vpop.permute.xlu0 %137  }
  0x91   :  { %v150_v12 = vpop.permute.xlu1 %149   ;;  %815 = vst.msk [vmem:[%s2191_s1 + $0xb] sm:$0x1] %vm8_vm0, %v138_v11   ;;  %816 = vst.msk [vmem:[%s2191_s1 + $0x4a] sm:$0x2] %vm8_vm0, %v138_v11  }
  0x92   :  { %817 = vst.msk [vmem:[%s2191_s1 + $0x89] sm:$0x4] %vm8_vm0, %v138_v11   ;;  %818 = vst.msk [vmem:[%s2191_s1 + $0xc8] sm:$0x8] %vm8_vm0, %v138_v11  }
  0x93   :  { %819 = vst.msk [vmem:[%s2191_s1 + $0xc] sm:$0x1] %vm8_vm0, %v150_v12   ;;  %820 = vst.msk [vmem:[%s2191_s1 + $0x4b] sm:$0x2] %vm8_vm0, %v150_v12  }
  0x94   :  { %821 = vst.msk [vmem:[%s2191_s1 + $0x8a] sm:$0x4] %vm8_vm0, %v150_v12   ;;  %822 = vst.msk [vmem:[%s2191_s1 + $0xc9] sm:$0x8] %vm8_vm0, %v150_v12   ;;  %v162_v13 = vpop.permute.xlu0 %161  }
  0x95   :  { %v174_v14 = vpop.permute.xlu1 %173   ;;  %823 = vst.msk [vmem:[%s2191_s1 + $0xd] sm:$0x1] %vm8_vm0, %v162_v13   ;;  %824 = vst.msk [vmem:[%s2191_s1 + $0x4c] sm:$0x2] %vm8_vm0, %v162_v13  }
  0x96   :  { %825 = vst.msk [vmem:[%s2191_s1 + $0x8b] sm:$0x4] %vm8_vm0, %v162_v13   ;;  %826 = vst.msk [vmem:[%s2191_s1 + $0xca] sm:$0x8] %vm8_vm0, %v162_v13  }
  0x97   :  { %827 = vst.msk [vmem:[%s2191_s1 + $0xe] sm:$0x1] %vm8_vm0, %v174_v14   ;;  %828 = vst.msk [vmem:[%s2191_s1 + $0x4d] sm:$0x2] %vm8_vm0, %v174_v14  }
  0x98   :  { %829 = vst.msk [vmem:[%s2191_s1 + $0x8c] sm:$0x4] %vm8_vm0, %v174_v14   ;;  %830 = vst.msk [vmem:[%s2191_s1 + $0xcb] sm:$0x8] %vm8_vm0, %v174_v14   ;;  %v186_v15 = vpop.permute.xlu0 %185  }
  0x99   :  { %v198_v16 = vpop.permute.xlu1 %197   ;;  %831 = vst.msk [vmem:[%s2191_s1 + $0xf] sm:$0x1] %vm8_vm0, %v186_v15   ;;  %832 = vst.msk [vmem:[%s2191_s1 + $0x4e] sm:$0x2] %vm8_vm0, %v186_v15  }
  0x9a   :  { %833 = vst.msk [vmem:[%s2191_s1 + $0x8d] sm:$0x4] %vm8_vm0, %v186_v15   ;;  %834 = vst.msk [vmem:[%s2191_s1 + $0xcc] sm:$0x8] %vm8_vm0, %v186_v15  }
  0x9b   :  { %835 = vst.msk [vmem:[%s2191_s1 + $0x10] sm:$0x1] %vm8_vm0, %v198_v16   ;;  %836 = vst.msk [vmem:[%s2191_s1 + $0x4f] sm:$0x2] %vm8_vm0, %v198_v16  }
  0x9c   :  { %837 = vst.msk [vmem:[%s2191_s1 + $0x8e] sm:$0x4] %vm8_vm0, %v198_v16   ;;  %838 = vst.msk [vmem:[%s2191_s1 + $0xcd] sm:$0x8] %vm8_vm0, %v198_v16   ;;  %v210_v17 = vpop.permute.xlu0 %209  }
  0x9d   :  { %v222_v18 = vpop.permute.xlu1 %221   ;;  %839 = vst.msk [vmem:[%s2191_s1 + $0x11] sm:$0x1] %vm8_vm0, %v210_v17   ;;  %840 = vst.msk [vmem:[%s2191_s1 + $0x50] sm:$0x2] %vm8_vm0, %v210_v17  }
  0x9e   :  { %841 = vst.msk [vmem:[%s2191_s1 + $0x8f] sm:$0x4] %vm8_vm0, %v210_v17   ;;  %842 = vst.msk [vmem:[%s2191_s1 + $0xce] sm:$0x8] %vm8_vm0, %v210_v17  }
  0x9f   :  { %843 = vst.msk [vmem:[%s2191_s1 + $0x12] sm:$0x1] %vm8_vm0, %v222_v18   ;;  %844 = vst.msk [vmem:[%s2191_s1 + $0x51] sm:$0x2] %vm8_vm0, %v222_v18  }
  0xa0   :  { %845 = vst.msk [vmem:[%s2191_s1 + $0x90] sm:$0x4] %vm8_vm0, %v222_v18   ;;  %846 = vst.msk [vmem:[%s2191_s1 + $0xcf] sm:$0x8] %vm8_vm0, %v222_v18   ;;  %v234_v19 = vpop.permute.xlu0 %233  }
  0xa1   :  { %v246_v20 = vpop.permute.xlu1 %245   ;;  %847 = vst.msk [vmem:[%s2191_s1 + $0x13] sm:$0x1] %vm8_vm0, %v234_v19   ;;  %848 = vst.msk [vmem:[%s2191_s1 + $0x52] sm:$0x2] %vm8_vm0, %v234_v19  }
  0xa2   :  { %849 = vst.msk [vmem:[%s2191_s1 + $0x91] sm:$0x4] %vm8_vm0, %v234_v19   ;;  %850 = vst.msk [vmem:[%s2191_s1 + $0xd0] sm:$0x8] %vm8_vm0, %v234_v19  }
  0xa3   :  { %851 = vst.msk [vmem:[%s2191_s1 + $0x14] sm:$0x1] %vm8_vm0, %v246_v20   ;;  %852 = vst.msk [vmem:[%s2191_s1 + $0x53] sm:$0x2] %vm8_vm0, %v246_v20  }
  0xa4   :  { %853 = vst.msk [vmem:[%s2191_s1 + $0x92] sm:$0x4] %vm8_vm0, %v246_v20   ;;  %854 = vst.msk [vmem:[%s2191_s1 + $0xd1] sm:$0x8] %vm8_vm0, %v246_v20   ;;  %v258_v21 = vpop.permute.xlu0 %257  }
  0xa5   :  { %v270_v22 = vpop.permute.xlu1 %269   ;;  %855 = vst.msk [vmem:[%s2191_s1 + $0x15] sm:$0x1] %vm8_vm0, %v258_v21   ;;  %856 = vst.msk [vmem:[%s2191_s1 + $0x54] sm:$0x2] %vm8_vm0, %v258_v21  }
  0xa6   :  { %857 = vst.msk [vmem:[%s2191_s1 + $0x93] sm:$0x4] %vm8_vm0, %v258_v21   ;;  %858 = vst.msk [vmem:[%s2191_s1 + $0xd2] sm:$0x8] %vm8_vm0, %v258_v21  }
  0xa7   :  { %859 = vst.msk [vmem:[%s2191_s1 + $0x16] sm:$0x1] %vm8_vm0, %v270_v22   ;;  %860 = vst.msk [vmem:[%s2191_s1 + $0x55] sm:$0x2] %vm8_vm0, %v270_v22  }
  0xa8   :  { %861 = vst.msk [vmem:[%s2191_s1 + $0x94] sm:$0x4] %vm8_vm0, %v270_v22   ;;  %862 = vst.msk [vmem:[%s2191_s1 + $0xd3] sm:$0x8] %vm8_vm0, %v270_v22   ;;  %v282_v23 = vpop.permute.xlu0 %281  }
  0xa9   :  { %v294_v24 = vpop.permute.xlu1 %293   ;;  %863 = vst.msk [vmem:[%s2191_s1 + $0x17] sm:$0x1] %vm8_vm0, %v282_v23   ;;  %864 = vst.msk [vmem:[%s2191_s1 + $0x56] sm:$0x2] %vm8_vm0, %v282_v23  }
  0xaa   :  { %865 = vst.msk [vmem:[%s2191_s1 + $0x95] sm:$0x4] %vm8_vm0, %v282_v23   ;;  %866 = vst.msk [vmem:[%s2191_s1 + $0xd4] sm:$0x8] %vm8_vm0, %v282_v23  }
  0xab   :  { %867 = vst.msk [vmem:[%s2191_s1 + $0x18] sm:$0x1] %vm8_vm0, %v294_v24   ;;  %868 = vst.msk [vmem:[%s2191_s1 + $0x57] sm:$0x2] %vm8_vm0, %v294_v24  }
  0xac   :  { %869 = vst.msk [vmem:[%s2191_s1 + $0x96] sm:$0x4] %vm8_vm0, %v294_v24   ;;  %870 = vst.msk [vmem:[%s2191_s1 + $0xd5] sm:$0x8] %vm8_vm0, %v294_v24   ;;  %v306_v25 = vpop.permute.xlu0 %305  }
  0xad   :  { %v318_v26 = vpop.permute.xlu1 %317   ;;  %871 = vst.msk [vmem:[%s2191_s1 + $0x19] sm:$0x1] %vm8_vm0, %v306_v25   ;;  %872 = vst.msk [vmem:[%s2191_s1 + $0x58] sm:$0x2] %vm8_vm0, %v306_v25  }
  0xae   :  { %873 = vst.msk [vmem:[%s2191_s1 + $0x97] sm:$0x4] %vm8_vm0, %v306_v25   ;;  %874 = vst.msk [vmem:[%s2191_s1 + $0xd6] sm:$0x8] %vm8_vm0, %v306_v25  }
  0xaf   :  { %875 = vst.msk [vmem:[%s2191_s1 + $0x1a] sm:$0x1] %vm8_vm0, %v318_v26   ;;  %876 = vst.msk [vmem:[%s2191_s1 + $0x59] sm:$0x2] %vm8_vm0, %v318_v26  }
  0xb0   :  { %877 = vst.msk [vmem:[%s2191_s1 + $0x98] sm:$0x4] %vm8_vm0, %v318_v26   ;;  %878 = vst.msk [vmem:[%s2191_s1 + $0xd7] sm:$0x8] %vm8_vm0, %v318_v26   ;;  %v330_v27 = vpop.permute.xlu0 %329  }
  0xb1   :  { %v342_v28 = vpop.permute.xlu1 %341   ;;  %879 = vst.msk [vmem:[%s2191_s1 + $0x1b] sm:$0x1] %vm8_vm0, %v330_v27   ;;  %880 = vst.msk [vmem:[%s2191_s1 + $0x5a] sm:$0x2] %vm8_vm0, %v330_v27  }
  0xb2   :  { %881 = vst.msk [vmem:[%s2191_s1 + $0x99] sm:$0x4] %vm8_vm0, %v330_v27   ;;  %882 = vst.msk [vmem:[%s2191_s1 + $0xd8] sm:$0x8] %vm8_vm0, %v330_v27  }
  0xb3   :  { %883 = vst.msk [vmem:[%s2191_s1 + $0x1c] sm:$0x1] %vm8_vm0, %v342_v28   ;;  %884 = vst.msk [vmem:[%s2191_s1 + $0x5b] sm:$0x2] %vm8_vm0, %v342_v28  }
  0xb4   :  { %885 = vst.msk [vmem:[%s2191_s1 + $0x9a] sm:$0x4] %vm8_vm0, %v342_v28   ;;  %886 = vst.msk [vmem:[%s2191_s1 + $0xd9] sm:$0x8] %vm8_vm0, %v342_v28   ;;  %v354_v29 = vpop.permute.xlu0 %353  }
  0xb5   :  { %v366_v30 = vpop.permute.xlu1 %365   ;;  %887 = vst.msk [vmem:[%s2191_s1 + $0x1d] sm:$0x1] %vm8_vm0, %v354_v29   ;;  %888 = vst.msk [vmem:[%s2191_s1 + $0x5c] sm:$0x2] %vm8_vm0, %v354_v29  }
  0xb6   :  { %889 = vst.msk [vmem:[%s2191_s1 + $0x9b] sm:$0x4] %vm8_vm0, %v354_v29   ;;  %890 = vst.msk [vmem:[%s2191_s1 + $0xda] sm:$0x8] %vm8_vm0, %v354_v29  }
  0xb7   :  { %891 = vst.msk [vmem:[%s2191_s1 + $0x1e] sm:$0x1] %vm8_vm0, %v366_v30   ;;  %892 = vst.msk [vmem:[%s2191_s1 + $0x5d] sm:$0x2] %vm8_vm0, %v366_v30  }
  0xb8   :  { %893 = vst.msk [vmem:[%s2191_s1 + $0x9c] sm:$0x4] %vm8_vm0, %v366_v30   ;;  %894 = vst.msk [vmem:[%s2191_s1 + $0xdb] sm:$0x8] %vm8_vm0, %v366_v30   ;;  %v378_v31 = vpop.permute.xlu0 %377  }
  0xb9   :  { %v390_v32 = vpop.permute.xlu1 %389   ;;  %895 = vst.msk [vmem:[%s2191_s1 + $0x1f] sm:$0x1] %vm8_vm0, %v378_v31   ;;  %896 = vst.msk [vmem:[%s2191_s1 + $0x5e] sm:$0x2] %vm8_vm0, %v378_v31  }
  0xba   :  { %897 = vst.msk [vmem:[%s2191_s1 + $0x9d] sm:$0x4] %vm8_vm0, %v378_v31   ;;  %898 = vst.msk [vmem:[%s2191_s1 + $0xdc] sm:$0x8] %vm8_vm0, %v378_v31  }
  0xbb   :  { %899 = vst.msk [vmem:[%s2191_s1 + $0x20] sm:$0x1] %vm8_vm0, %v390_v32   ;;  %900 = vst.msk [vmem:[%s2191_s1 + $0x5f] sm:$0x2] %vm8_vm0, %v390_v32  }
  0xbc   :  { %901 = vst.msk [vmem:[%s2191_s1 + $0x9e] sm:$0x4] %vm8_vm0, %v390_v32   ;;  %902 = vst.msk [vmem:[%s2191_s1 + $0xdd] sm:$0x8] %vm8_vm0, %v390_v32   ;;  %v402_v33 = vpop.permute.xlu0 %401  }
  0xbd   :  { %v414_v34 = vpop.permute.xlu1 %413   ;;  %903 = vst.msk [vmem:[%s2191_s1 + $0x21] sm:$0x1] %vm8_vm0, %v402_v33   ;;  %904 = vst.msk [vmem:[%s2191_s1 + $0x60] sm:$0x2] %vm8_vm0, %v402_v33  }
  0xbe   :  { %905 = vst.msk [vmem:[%s2191_s1 + $0x9f] sm:$0x4] %vm8_vm0, %v402_v33   ;;  %906 = vst.msk [vmem:[%s2191_s1 + $0xde] sm:$0x8] %vm8_vm0, %v402_v33  }
  0xbf   :  { %907 = vst.msk [vmem:[%s2191_s1 + $0x22] sm:$0x1] %vm8_vm0, %v414_v34   ;;  %908 = vst.msk [vmem:[%s2191_s1 + $0x61] sm:$0x2] %vm8_vm0, %v414_v34  }
  0xc0   :  { %909 = vst.msk [vmem:[%s2191_s1 + $0xa0] sm:$0x4] %vm8_vm0, %v414_v34   ;;  %910 = vst.msk [vmem:[%s2191_s1 + $0xdf] sm:$0x8] %vm8_vm0, %v414_v34   ;;  %v426_v35 = vpop.permute.xlu0 %425  }
  0xc1   :  { %v438_v36 = vpop.permute.xlu1 %437   ;;  %911 = vst.msk [vmem:[%s2191_s1 + $0x23] sm:$0x1] %vm8_vm0, %v426_v35   ;;  %912 = vst.msk [vmem:[%s2191_s1 + $0x62] sm:$0x2] %vm8_vm0, %v426_v35  }
  0xc2   :  { %913 = vst.msk [vmem:[%s2191_s1 + $0xa1] sm:$0x4] %vm8_vm0, %v426_v35   ;;  %914 = vst.msk [vmem:[%s2191_s1 + $0xe0] sm:$0x8] %vm8_vm0, %v426_v35  }
  0xc3   :  { %915 = vst.msk [vmem:[%s2191_s1 + $0x24] sm:$0x1] %vm8_vm0, %v438_v36   ;;  %916 = vst.msk [vmem:[%s2191_s1 + $0x63] sm:$0x2] %vm8_vm0, %v438_v36  }
  0xc4   :  { %917 = vst.msk [vmem:[%s2191_s1 + $0xa2] sm:$0x4] %vm8_vm0, %v438_v36   ;;  %918 = vst.msk [vmem:[%s2191_s1 + $0xe1] sm:$0x8] %vm8_vm0, %v438_v36   ;;  %v450_v37 = vpop.permute.xlu0 %449  }
  0xc5   :  { %v462_v38 = vpop.permute.xlu1 %461   ;;  %919 = vst.msk [vmem:[%s2191_s1 + $0x25] sm:$0x1] %vm8_vm0, %v450_v37   ;;  %920 = vst.msk [vmem:[%s2191_s1 + $0x64] sm:$0x2] %vm8_vm0, %v450_v37  }
  0xc6   :  { %921 = vst.msk [vmem:[%s2191_s1 + $0xa3] sm:$0x4] %vm8_vm0, %v450_v37   ;;  %922 = vst.msk [vmem:[%s2191_s1 + $0xe2] sm:$0x8] %vm8_vm0, %v450_v37  }
  0xc7   :  { %923 = vst.msk [vmem:[%s2191_s1 + $0x26] sm:$0x1] %vm8_vm0, %v462_v38   ;;  %924 = vst.msk [vmem:[%s2191_s1 + $0x65] sm:$0x2] %vm8_vm0, %v462_v38  }
  0xc8   :  { %925 = vst.msk [vmem:[%s2191_s1 + $0xa4] sm:$0x4] %vm8_vm0, %v462_v38   ;;  %926 = vst.msk [vmem:[%s2191_s1 + $0xe3] sm:$0x8] %vm8_vm0, %v462_v38   ;;  %v474_v39 = vpop.permute.xlu0 %473  }
  0xc9   :  { %v486_v40 = vpop.permute.xlu1 %485   ;;  %927 = vst.msk [vmem:[%s2191_s1 + $0x27] sm:$0x1] %vm8_vm0, %v474_v39   ;;  %928 = vst.msk [vmem:[%s2191_s1 + $0x66] sm:$0x2] %vm8_vm0, %v474_v39  }
  0xca   :  { %929 = vst.msk [vmem:[%s2191_s1 + $0xa5] sm:$0x4] %vm8_vm0, %v474_v39   ;;  %930 = vst.msk [vmem:[%s2191_s1 + $0xe4] sm:$0x8] %vm8_vm0, %v474_v39  }
  0xcb   :  { %931 = vst.msk [vmem:[%s2191_s1 + $0x28] sm:$0x1] %vm8_vm0, %v486_v40   ;;  %932 = vst.msk [vmem:[%s2191_s1 + $0x67] sm:$0x2] %vm8_vm0, %v486_v40  }
  0xcc   :  { %933 = vst.msk [vmem:[%s2191_s1 + $0xa6] sm:$0x4] %vm8_vm0, %v486_v40   ;;  %934 = vst.msk [vmem:[%s2191_s1 + $0xe5] sm:$0x8] %vm8_vm0, %v486_v40   ;;  %v498_v41 = vpop.permute.xlu0 %497  }
  0xcd   :  { %v510_v42 = vpop.permute.xlu1 %509   ;;  %935 = vst.msk [vmem:[%s2191_s1 + $0x29] sm:$0x1] %vm8_vm0, %v498_v41   ;;  %936 = vst.msk [vmem:[%s2191_s1 + $0x68] sm:$0x2] %vm8_vm0, %v498_v41  }
  0xce   :  { %937 = vst.msk [vmem:[%s2191_s1 + $0xa7] sm:$0x4] %vm8_vm0, %v498_v41   ;;  %938 = vst.msk [vmem:[%s2191_s1 + $0xe6] sm:$0x8] %vm8_vm0, %v498_v41  }
  0xcf   :  { %939 = vst.msk [vmem:[%s2191_s1 + $0x2a] sm:$0x1] %vm8_vm0, %v510_v42   ;;  %940 = vst.msk [vmem:[%s2191_s1 + $0x69] sm:$0x2] %vm8_vm0, %v510_v42  }
  0xd0   :  { %941 = vst.msk [vmem:[%s2191_s1 + $0xa8] sm:$0x4] %vm8_vm0, %v510_v42   ;;  %942 = vst.msk [vmem:[%s2191_s1 + $0xe7] sm:$0x8] %vm8_vm0, %v510_v42   ;;  %v522_v43 = vpop.permute.xlu0 %521  }
  0xd1   :  { %v534_v44 = vpop.permute.xlu1 %533   ;;  %943 = vst.msk [vmem:[%s2191_s1 + $0x2b] sm:$0x1] %vm8_vm0, %v522_v43   ;;  %944 = vst.msk [vmem:[%s2191_s1 + $0x6a] sm:$0x2] %vm8_vm0, %v522_v43  }
  0xd2   :  { %945 = vst.msk [vmem:[%s2191_s1 + $0xa9] sm:$0x4] %vm8_vm0, %v522_v43   ;;  %946 = vst.msk [vmem:[%s2191_s1 + $0xe8] sm:$0x8] %vm8_vm0, %v522_v43  }
  0xd3   :  { %947 = vst.msk [vmem:[%s2191_s1 + $0x2c] sm:$0x1] %vm8_vm0, %v534_v44   ;;  %948 = vst.msk [vmem:[%s2191_s1 + $0x6b] sm:$0x2] %vm8_vm0, %v534_v44  }
  0xd4   :  { %949 = vst.msk [vmem:[%s2191_s1 + $0xaa] sm:$0x4] %vm8_vm0, %v534_v44   ;;  %950 = vst.msk [vmem:[%s2191_s1 + $0xe9] sm:$0x8] %vm8_vm0, %v534_v44   ;;  %v546_v45 = vpop.permute.xlu0 %545  }
  0xd5   :  { %v558_v46 = vpop.permute.xlu1 %557   ;;  %951 = vst.msk [vmem:[%s2191_s1 + $0x2d] sm:$0x1] %vm8_vm0, %v546_v45   ;;  %952 = vst.msk [vmem:[%s2191_s1 + $0x6c] sm:$0x2] %vm8_vm0, %v546_v45  }
  0xd6   :  { %953 = vst.msk [vmem:[%s2191_s1 + $0xab] sm:$0x4] %vm8_vm0, %v546_v45   ;;  %954 = vst.msk [vmem:[%s2191_s1 + $0xea] sm:$0x8] %vm8_vm0, %v546_v45  }
  0xd7   :  { %955 = vst.msk [vmem:[%s2191_s1 + $0x2e] sm:$0x1] %vm8_vm0, %v558_v46   ;;  %956 = vst.msk [vmem:[%s2191_s1 + $0x6d] sm:$0x2] %vm8_vm0, %v558_v46  }
  0xd8   :  { %957 = vst.msk [vmem:[%s2191_s1 + $0xac] sm:$0x4] %vm8_vm0, %v558_v46   ;;  %958 = vst.msk [vmem:[%s2191_s1 + $0xeb] sm:$0x8] %vm8_vm0, %v558_v46   ;;  %v570_v47 = vpop.permute.xlu0 %569  }
  0xd9   :  { %v582_v48 = vpop.permute.xlu1 %581   ;;  %959 = vst.msk [vmem:[%s2191_s1 + $0x2f] sm:$0x1] %vm8_vm0, %v570_v47   ;;  %960 = vst.msk [vmem:[%s2191_s1 + $0x6e] sm:$0x2] %vm8_vm0, %v570_v47  }
  0xda   :  { %961 = vst.msk [vmem:[%s2191_s1 + $0xad] sm:$0x4] %vm8_vm0, %v570_v47   ;;  %962 = vst.msk [vmem:[%s2191_s1 + $0xec] sm:$0x8] %vm8_vm0, %v570_v47  }
  0xdb   :  { %963 = vst.msk [vmem:[%s2191_s1 + $0x30] sm:$0x1] %vm8_vm0, %v582_v48   ;;  %964 = vst.msk [vmem:[%s2191_s1 + $0x6f] sm:$0x2] %vm8_vm0, %v582_v48  }
  0xdc   :  { %965 = vst.msk [vmem:[%s2191_s1 + $0xae] sm:$0x4] %vm8_vm0, %v582_v48   ;;  %966 = vst.msk [vmem:[%s2191_s1 + $0xed] sm:$0x8] %vm8_vm0, %v582_v48   ;;  %v594_v49 = vpop.permute.xlu0 %593  }
  0xdd   :  { %v606_v50 = vpop.permute.xlu1 %605   ;;  %967 = vst.msk [vmem:[%s2191_s1 + $0x31] sm:$0x1] %vm8_vm0, %v594_v49   ;;  %968 = vst.msk [vmem:[%s2191_s1 + $0x70] sm:$0x2] %vm8_vm0, %v594_v49  }
  0xde   :  { %969 = vst.msk [vmem:[%s2191_s1 + $0xaf] sm:$0x4] %vm8_vm0, %v594_v49   ;;  %970 = vst.msk [vmem:[%s2191_s1 + $0xee] sm:$0x8] %vm8_vm0, %v594_v49  }
  0xdf   :  { %971 = vst.msk [vmem:[%s2191_s1 + $0x32] sm:$0x1] %vm8_vm0, %v606_v50   ;;  %972 = vst.msk [vmem:[%s2191_s1 + $0x71] sm:$0x2] %vm8_vm0, %v606_v50  }
  0xe0   :  { %973 = vst.msk [vmem:[%s2191_s1 + $0xb0] sm:$0x4] %vm8_vm0, %v606_v50   ;;  %974 = vst.msk [vmem:[%s2191_s1 + $0xef] sm:$0x8] %vm8_vm0, %v606_v50   ;;  %v618_v51 = vpop.permute.xlu0 %617  }
  0xe1   :  { %v630_v52 = vpop.permute.xlu1 %629   ;;  %975 = vst.msk [vmem:[%s2191_s1 + $0x33] sm:$0x1] %vm8_vm0, %v618_v51   ;;  %976 = vst.msk [vmem:[%s2191_s1 + $0x72] sm:$0x2] %vm8_vm0, %v618_v51  }
  0xe2   :  { %977 = vst.msk [vmem:[%s2191_s1 + $0xb1] sm:$0x4] %vm8_vm0, %v618_v51   ;;  %978 = vst.msk [vmem:[%s2191_s1 + $0xf0] sm:$0x8] %vm8_vm0, %v618_v51  }
  0xe3   :  { %979 = vst.msk [vmem:[%s2191_s1 + $0x34] sm:$0x1] %vm8_vm0, %v630_v52   ;;  %980 = vst.msk [vmem:[%s2191_s1 + $0x73] sm:$0x2] %vm8_vm0, %v630_v52  }
  0xe4   :  { %981 = vst.msk [vmem:[%s2191_s1 + $0xb2] sm:$0x4] %vm8_vm0, %v630_v52   ;;  %982 = vst.msk [vmem:[%s2191_s1 + $0xf1] sm:$0x8] %vm8_vm0, %v630_v52   ;;  %v642_v53 = vpop.permute.xlu0 %641  }
  0xe5   :  { %v654_v54 = vpop.permute.xlu1 %653   ;;  %983 = vst.msk [vmem:[%s2191_s1 + $0x35] sm:$0x1] %vm8_vm0, %v642_v53   ;;  %984 = vst.msk [vmem:[%s2191_s1 + $0x74] sm:$0x2] %vm8_vm0, %v642_v53  }
  0xe6   :  { %985 = vst.msk [vmem:[%s2191_s1 + $0xb3] sm:$0x4] %vm8_vm0, %v642_v53   ;;  %986 = vst.msk [vmem:[%s2191_s1 + $0xf2] sm:$0x8] %vm8_vm0, %v642_v53  }
  0xe7   :  { %987 = vst.msk [vmem:[%s2191_s1 + $0x36] sm:$0x1] %vm8_vm0, %v654_v54   ;;  %988 = vst.msk [vmem:[%s2191_s1 + $0x75] sm:$0x2] %vm8_vm0, %v654_v54  }
  0xe8   :  { %989 = vst.msk [vmem:[%s2191_s1 + $0xb4] sm:$0x4] %vm8_vm0, %v654_v54   ;;  %990 = vst.msk [vmem:[%s2191_s1 + $0xf3] sm:$0x8] %vm8_vm0, %v654_v54   ;;  %v666_v55 = vpop.permute.xlu0 %665  }
  0xe9   :  { %v678_v56 = vpop.permute.xlu1 %677   ;;  %991 = vst.msk [vmem:[%s2191_s1 + $0x37] sm:$0x1] %vm8_vm0, %v666_v55   ;;  %992 = vst.msk [vmem:[%s2191_s1 + $0x76] sm:$0x2] %vm8_vm0, %v666_v55  }
  0xea   :  { %993 = vst.msk [vmem:[%s2191_s1 + $0xb5] sm:$0x4] %vm8_vm0, %v666_v55   ;;  %994 = vst.msk [vmem:[%s2191_s1 + $0xf4] sm:$0x8] %vm8_vm0, %v666_v55  }
  0xeb   :  { %995 = vst.msk [vmem:[%s2191_s1 + $0x38] sm:$0x1] %vm8_vm0, %v678_v56   ;;  %996 = vst.msk [vmem:[%s2191_s1 + $0x77] sm:$0x2] %vm8_vm0, %v678_v56  }
  0xec   :  { %997 = vst.msk [vmem:[%s2191_s1 + $0xb6] sm:$0x4] %vm8_vm0, %v678_v56   ;;  %998 = vst.msk [vmem:[%s2191_s1 + $0xf5] sm:$0x8] %vm8_vm0, %v678_v56   ;;  %v690_v57 = vpop.permute.xlu0 %689  }
  0xed   :  { %v702_v58 = vpop.permute.xlu1 %701   ;;  %999 = vst.msk [vmem:[%s2191_s1 + $0x39] sm:$0x1] %vm8_vm0, %v690_v57   ;;  %1000 = vst.msk [vmem:[%s2191_s1 + $0x78] sm:$0x2] %vm8_vm0, %v690_v57  }
  0xee   :  { %1001 = vst.msk [vmem:[%s2191_s1 + $0xb7] sm:$0x4] %vm8_vm0, %v690_v57   ;;  %1002 = vst.msk [vmem:[%s2191_s1 + $0xf6] sm:$0x8] %vm8_vm0, %v690_v57  }
  0xef   :  { %1003 = vst.msk [vmem:[%s2191_s1 + $0x3a] sm:$0x1] %vm8_vm0, %v702_v58   ;;  %1004 = vst.msk [vmem:[%s2191_s1 + $0x79] sm:$0x2] %vm8_vm0, %v702_v58  }
  0xf0   :  { %1005 = vst.msk [vmem:[%s2191_s1 + $0xb8] sm:$0x4] %vm8_vm0, %v702_v58   ;;  %1006 = vst.msk [vmem:[%s2191_s1 + $0xf7] sm:$0x8] %vm8_vm0, %v702_v58   ;;  %v714_v59 = vpop.permute.xlu0 %713  }
  0xf1   :  { %v726_v60 = vpop.permute.xlu1 %725   ;;  %1007 = vst.msk [vmem:[%s2191_s1 + $0x3b] sm:$0x1] %vm8_vm0, %v714_v59   ;;  %1008 = vst.msk [vmem:[%s2191_s1 + $0x7a] sm:$0x2] %vm8_vm0, %v714_v59  }
  0xf2   :  { %1009 = vst.msk [vmem:[%s2191_s1 + $0xb9] sm:$0x4] %vm8_vm0, %v714_v59   ;;  %1010 = vst.msk [vmem:[%s2191_s1 + $0xf8] sm:$0x8] %vm8_vm0, %v714_v59  }
  0xf3   :  { %1011 = vst.msk [vmem:[%s2191_s1 + $0x3c] sm:$0x1] %vm8_vm0, %v726_v60   ;;  %1012 = vst.msk [vmem:[%s2191_s1 + $0x7b] sm:$0x2] %vm8_vm0, %v726_v60  }
  0xf4   :  { %1013 = vst.msk [vmem:[%s2191_s1 + $0xba] sm:$0x4] %vm8_vm0, %v726_v60   ;;  %1014 = vst.msk [vmem:[%s2191_s1 + $0xf9] sm:$0x8] %vm8_vm0, %v726_v60   ;;  %v738_v61 = vpop.permute.xlu0 %737  }
  0xf5   :  { %v750_v62 = vpop.permute.xlu1 %749   ;;  %1015 = vst.msk [vmem:[%s2191_s1 + $0x3d] sm:$0x1] %vm8_vm0, %v738_v61   ;;  %1016 = vst.msk [vmem:[%s2191_s1 + $0x7c] sm:$0x2] %vm8_vm0, %v738_v61  }
  0xf6   :  { %1017 = vst.msk [vmem:[%s2191_s1 + $0xbb] sm:$0x4] %vm8_vm0, %v738_v61   ;;  %1018 = vst.msk [vmem:[%s2191_s1 + $0xfa] sm:$0x8] %vm8_vm0, %v738_v61  }
  0xf7   :  { %1019 = vst.msk [vmem:[%s2191_s1 + $0x3e] sm:$0x1] %vm8_vm0, %v750_v62   ;;  %1020 = vst.msk [vmem:[%s2191_s1 + $0x7d] sm:$0x2] %vm8_vm0, %v750_v62  }
  0xf8   :  { %1021 = vst.msk [vmem:[%s2191_s1 + $0xbc] sm:$0x4] %vm8_vm0, %v750_v62   ;;  %1022 = vst.msk [vmem:[%s2191_s1 + $0xfb] sm:$0x8] %vm8_vm0, %v750_v62   ;;  %v762_v63 = vpop.permute.xlu0 %761  }
  0xf9   :  { %1023 = vst.msk [vmem:[%s2191_s1 + $0x3f] sm:$0x1] %vm8_vm0, %v762_v63   ;;  %1024 = vst.msk [vmem:[%s2191_s1 + $0x7e] sm:$0x2] %vm8_vm0, %v762_v63  }
  0xfa   :  { %1025 = vst.msk [vmem:[%s2191_s1 + $0xbd] sm:$0x4] %vm8_vm0, %v762_v63   ;;  %1026 = vst.msk [vmem:[%s2191_s1 + $0xfc] sm:$0x8] %vm8_vm0, %v762_v63  }

// kernel: convnet_forward.6
= control target key start
LH: loop header
LB: loop body
LE: loop exit
PB: predicated region body
PF: predicated region fallthrough
CT: control target
= control target key end

     0   :  { %s3263_s12 = smov 0   ;;  %s3265_s13 = smov 0   ;;  %s4040_s0 = inlined_call_operand.vmem [shape: bf16[256,1024], index: 0, kind: input, shape index: {}]   ;;  %s4041_s1 = inlined_call_operand.vmem [shape: f32[256,1], index: 1, kind: input, shape index: {}]   ;;  %s4042_s2 = inlined_call_operand.vmem [shape: bf16[2,1024,128], index: 2, kind: input, shape index: {}]   ;;  %s4043_s3 = inlined_call_operand.vmem [shape: f32[2,64,128], index: 3, kind: output, shape index: {}]  }
   0x1   :  { %s3267_s14 = smov 0  }
   0x2 LB: > { %s25_s15 = sadd.s32 1, %s3236_s13  ;;  %p2478_p0 = scmp.ge.s32.totalorder %s3240_s14, 1  ;;  %s3240_s14 = sphi %s3267_s14, %s13_s14   ;;  %s3236_s13 = sphi %s3265_s13, %s4045_s13   ;;  %s3232_s12 = sphi %s3263_s12, %s4044_s12  }
   0x3   : > { %p27_p1 = scmp.ge.s32.totalorder %s25_s15, 2  ;;  %p156_p2 = scmp.lt.s32.totalorder %s3240_s14, 3 }
   0x5   : > { %s4047_s15 = smov (%p27_p1, %s25_s15), 0  ;;  %p157_p3 = pnand %p2478_p0, %p156_p2 }
   0x6   : > { %p186_p4 = scmp.lt.s32.totalorder (!%p157_p3), %s3232_s12, 1 }
   0x7   : > { %160 = sbr.rel (%p157_p3) target bundleno = 509 (0x1fd), region = 32 }
   0xc   : > { %v3284_v0 = vld [vmem:[%s4040_s0] sm:$0xff]  ;;  %v3294_v2 = vld [vmem:[%s4040_s0 + $0x8] sm:$0xff]  ;;  %v3242_v5 = vmov 0   ;;  %s4049_s12 = smov (!%p186_p4, %s3232_s12), 1 }
   0xd   : > { %v3289_v1 = vld [vmem:[%s4040_s0 + $0x20] sm:$0xff]  ;;  %v3301_v4 = vld [vmem:[%s4040_s0 + $0x28] sm:$0xff]  ;;  %3152 = vset.pattern.permute.xlu0 %v3242_v5  ;;  %3153 = vset.pattern.permute.xlu1 %v3242_v5  ;;  %s2677_s24 = sshll.u32 %s4049_s12, 9  ;;  %s2678_s21 = sshll.u32 %s4049_s12, 6 }
   0xe   : > { %v2484_v3 = vcombine.high %v3284_v0, %v3289_v1  ;;  %v2486_v6 = vcombine.high %v3294_v2, %v3301_v4  ;;  %s3311_s27 = scalar_lea.vmem %s4042_s2, %s2677_s24  ;;  %v339_v36 = vld [vmem:[%s4040_s0 + $0x40] sm:$0xff]  ;;  %v340_v39 = vld [vmem:[%s4040_s0 + $0x48] sm:$0xff]  ;;  %v2483_v43 = vcombine.low %v3284_v0, %v3289_v1  ;;  %v2485_v44 = vcombine.low %v3294_v2, %v3301_v4  ;;  %s4008_s23 = scalar_lea.vmem %s4043_s3, %s2678_s21 }
   0xf   : > { %v3154_v7 = vld [vmem:[%s3311_s27 + $0x78] sm:$0xff]   ;;  %v3158_v11 = vld [vmem:[%s3311_s27 + $0x70] sm:$0xff]   ;;  %v3162_v15 = vld [vmem:[%s3311_s27 + $0x68] sm:$0xff]  }
  0x10   : > { %1707 = vmatprep.mubr.bf16.mxu0 %v2484_v3  ;;  %1868 = vmatprep.mubr.bf16.mxu1 %v2486_v6  ;;  %v3155_v8 = vld [vmem:[%s3311_s27 + $0xf8] sm:$0xff]   ;;  %v3159_v12 = vld [vmem:[%s3311_s27 + $0xf0] sm:$0xff]   ;;  %v3163_v16 = vld [vmem:[%s3311_s27 + $0xe8] sm:$0xff]  }
  0x11   : > { %2679 = vmatprep.subr.bf16.mxu0 %v3154_v7  ;;  %v3156_v9 = vld [vmem:[%s3311_s27 + $0x38] sm:$0xff]   ;;  %2791 = vmatprep.subr.bf16.mxu1 %v3155_v8  ;;  %v3160_v13 = vld [vmem:[%s3311_s27 + $0x30] sm:$0xff]   ;;  %v3164_v17 = vld [vmem:[%s3311_s27 + $0x28] sm:$0xff]  }
  0x12   : > { %v3157_v10 = vld [vmem:[%s3311_s27 + $0xb8] sm:$0xff]   ;;  %2680 = vmatpush3.bf16.msra.mxu0 %v3156_v9  ;;  %v3161_v14 = vld [vmem:[%s3311_s27 + $0xb0] sm:$0xff]   ;;  %v3165_v18 = vld [vmem:[%s3311_s27 + $0xa8] sm:$0xff]  }
  0x13   : > { %2792 = vmatpush3.bf16.msra.mxu1 %v3157_v10  ;;  %2681 = vmatprep.subr.bf16.mxu0 %v3158_v11  ;;  %v3166_v19 = vld [vmem:[%s3311_s27 + $0x60] sm:$0xff]   ;;  %v3170_v23 = vld [vmem:[%s3311_s27 + $0x58] sm:$0xff]   ;;  %v3174_v27 = vld [vmem:[%s3311_s27 + $0x50] sm:$0xff]  }
  0x14   : > { %2793 = vmatprep.subr.bf16.mxu1 %v3159_v12  ;;  %v3167_v20 = vld [vmem:[%s3311_s27 + $0xe0] sm:$0xff]   ;;  %v3171_v24 = vld [vmem:[%s3311_s27 + $0xd8] sm:$0xff]   ;;  %v3175_v28 = vld [vmem:[%s3311_s27 + $0xd0] sm:$0xff]  }
  0x15   : > { %v3168_v21 = vld [vmem:[%s3311_s27 + $0x20] sm:$0xff]   ;;  %v3172_v25 = vld [vmem:[%s3311_s27 + $0x18] sm:$0xff]   ;;  %v3176_v29 = vld [vmem:[%s3311_s27 + $0x10] sm:$0xff]  }
  0x16   : > { %2682 = vmatpush3.bf16.msra.mxu0 %v3160_v13  ;;  %v3169_v22 = vld [vmem:[%s3311_s27 + $0xa0] sm:$0xff]   ;;  %v3173_v26 = vld [vmem:[%s3311_s27 + $0x98] sm:$0xff]   ;;  %v3177_v30 = vld [vmem:[%s3311_s27 + $0x90] sm:$0xff]  }
  0x17   : > { %2794 = vmatpush3.bf16.msra.mxu1 %v3161_v14  ;;  %2683 = vmatprep.subr.bf16.mxu0 %v3162_v15  ;;  %v3178_v31 = vld [vmem:[%s3311_s27 + $0x48] sm:$0xff]   ;;  %v3182_v35 = vld [vmem:[%s3311_s27 + $0x40] sm:$0xff]   ;;  %v3186_v45 = vld [vmem:[%s3311_s27 + $0x178] sm:$0xff]  }
  0x18   : > { %2795 = vmatprep.subr.bf16.mxu1 %v3163_v16  ;;  %v3179_v32 = vld [vmem:[%s3311_s27 + $0xc8] sm:$0xff]   ;;  %v343_v37 = vld [vmem:[%s4040_s0 + $0x60] sm:$0xff]  ;;  %v3187_v46 = vld [vmem:[%s3311_s27 + $0x138] sm:$0xff]  }
  0x19   : > { %v3180_v33 = vld [vmem:[%s3311_s27 + $0x8] sm:$0xff]   ;;  %v3183_v38 = vld [vmem:[%s3311_s27 + $0xc0] sm:$0xff]   ;;  %v2492_v47 = vcombine.high %v339_v36, %v343_v37  ;;  %v3188_v48 = vld [vmem:[%s3311_s27 + $0x1f8] sm:$0xff]   ;;  %v2491_v58 = vcombine.low %v339_v36, %v343_v37 }
  0x1a   : > { %2684 = vmatpush3.bf16.msra.mxu0 %v3164_v17  ;;  %v3181_v34 = vld [vmem:[%s3311_s27 + $0x88] sm:$0xff]   ;;  %v3184_v41 = vld [vmem:[%s3311_s27] sm:$0xff]   ;;  %v3189_v50 = vld [vmem:[%s3311_s27 + $0x1b8] sm:$0xff]  }
  0x1b   : > { %2796 = vmatpush3.bf16.msra.mxu1 %v3165_v18  ;;  %2685 = vmatprep.subr.bf16.mxu0 %v3166_v19  ;;  %v344_v40 = vld [vmem:[%s4040_s0 + $0x68] sm:$0xff]  ;;  %v3185_v42 = vld [vmem:[%s3311_s27 + $0x80] sm:$0xff]   ;;  %v3190_v55 = vld [vmem:[%s3311_s27 + $0x170] sm:$0xff]  }
  0x1c   : > { %2797 = vmatprep.subr.bf16.mxu1 %v3167_v20  ;;  %v2494_v49 = vcombine.high %v340_v39, %v344_v40  ;;  %v347_v51 = vld [vmem:[%s4040_s0 + $0x80] sm:$0xff]  ;;  %v348_v53 = vld [vmem:[%s4040_s0 + $0x88] sm:$0xff]  ;;  %v3191_v56 = vld [vmem:[%s3311_s27 + $0x130] sm:$0xff]   ;;  %v2493_v60 = vcombine.low %v340_v39, %v344_v40 }
  0x1d   : > { %v351_v52 = vld [vmem:[%s4040_s0 + $0xa0] sm:$0xff]  ;;  %v352_v54 = vld [vmem:[%s4040_s0 + $0xa8] sm:$0xff]  ;;  %v3192_v57 = vld [vmem:[%s3311_s27 + $0x1f0] sm:$0xff]  }
  0x1e   : > { %2686 = vmatpush3.bf16.msra.mxu0 %v3168_v21  ;;  %v3193_v59 = vld [vmem:[%s3311_s27 + $0x1b0] sm:$0xff]   ;;  %v2500_v61 = vcombine.high %v347_v51, %v351_v52  ;;  %v2502_v62 = vcombine.high %v348_v53, %v352_v54  ;;  %v3194_v63 = vld [vmem:[%s3311_s27 + $0x168] sm:$0xff]   ;;  %v355_v3 = vld [vmem:[%s4040_s0 + $0xc0] sm:$0xff]  ;;  %v2499_v7 = vcombine.low %v347_v51, %v351_v52  ;;  %v2501_v8 = vcombine.low %v348_v53, %v352_v54 }
  0x1f   : > { %2798 = vmatpush3.bf16.msra.mxu1 %v3169_v22  ;;  %2687 = vmatprep.subr.bf16.mxu0 %v3170_v23  ;;  %v3195_v0 = vld [vmem:[%s3311_s27 + $0x128] sm:$0xff]   ;;  %v359_v4 = vld [vmem:[%s4040_s0 + $0xe0] sm:$0xff]  ;;  %v3202_v19 = vld [vmem:[%s3311_s27 + $0x158] sm:$0xff]  }
  0x20   : > { %2799 = vmatprep.subr.bf16.mxu1 %v3171_v24  ;;  %v3196_v1 = vld [vmem:[%s3311_s27 + $0x1e8] sm:$0xff]   ;;  %v2508_v9 = vcombine.high %v355_v3, %v359_v4  ;;  %v3198_v10 = vld [vmem:[%s3311_s27 + $0x160] sm:$0xff]   ;;  %v2507_v20 = vcombine.low %v355_v3, %v359_v4  ;;  %v3203_v21 = vld [vmem:[%s3311_s27 + $0x118] sm:$0xff]  }
  0x21   : > { %v3197_v2 = vld [vmem:[%s3311_s27 + $0x1a8] sm:$0xff]   ;;  %v3199_v12 = vld [vmem:[%s3311_s27 + $0x120] sm:$0xff]   ;;  %v3204_v24 = vld [vmem:[%s3311_s27 + $0x1d8] sm:$0xff]  }
  0x22   : > { %2688 = vmatpush3.bf16.msra.mxu0 %v3172_v25  ;;  %v356_v5 = vld [vmem:[%s4040_s0 + $0xc8] sm:$0xff]  ;;  %v3200_v13 = vld [vmem:[%s3311_s27 + $0x1e0] sm:$0xff]   ;;  %v3207_v36 = vld [vmem:[%s3311_s27 + $0x110] sm:$0xff]  }
  0x23   : > { %2800 = vmatpush3.bf16.msra.mxu1 %v3173_v26  ;;  %2689 = vmatprep.subr.bf16.mxu0 %v3174_v27  ;;  %v360_v6 = vld [vmem:[%s4040_s0 + $0xe8] sm:$0xff]  ;;  %v3201_v14 = vld [vmem:[%s3311_s27 + $0x1a0] sm:$0xff]   ;;  %v3205_v26 = vld [vmem:[%s3311_s27 + $0x198] sm:$0xff]  }
  0x24   : > { %2801 = vmatprep.subr.bf16.mxu1 %v3175_v28  ;;  %v2510_v11 = vcombine.high %v356_v5, %v360_v6  ;;  %v363_v15 = vld [vmem:[%s4040_s0 + $0x100] sm:$0xff]  ;;  %v364_v17 = vld [vmem:[%s4040_s0 + $0x108] sm:$0xff]  ;;  %v2509_v22 = vcombine.low %v356_v5, %v360_v6  ;;  %v3208_v39 = vld [vmem:[%s3311_s27 + $0x1d0] sm:$0xff]  }
  0x25   : > { %v367_v16 = vld [vmem:[%s4040_s0 + $0x120] sm:$0xff]  ;;  %v368_v18 = vld [vmem:[%s4040_s0 + $0x128] sm:$0xff] }
  0x26   : > { %2690 = vmatpush3.bf16.msra.mxu0 %v3176_v29  ;;  %v2516_v23 = vcombine.high %v363_v15, %v367_v16  ;;  %v2518_v25 = vcombine.high %v364_v17, %v368_v18  ;;  %v371_v27 = vld [vmem:[%s4040_s0 + $0x140] sm:$0xff]  ;;  %v2517_v37 = vcombine.low %v364_v17, %v368_v18  ;;  %v3211_v52 = vld [vmem:[%s3311_s27 + $0x108] sm:$0xff]   ;;  %v473_v18 = vld [vmem:[%s4041_s1 + $0x70] sm:$0xff] }
  0x27   : > { %2802 = vmatpush3.bf16.msra.mxu1 %v3177_v30  ;;  %2691 = vmatprep.subr.bf16.mxu0 %v3178_v31  ;;  %v459_v28 = vld [vmem:[%s4041_s1] sm:$0xff]  ;;  %v372_v30 = vld [vmem:[%s4040_s0 + $0x148] sm:$0xff] }
  0x28   : > { %2803 = vmatprep.subr.bf16.mxu1 %v3179_v32  ;;  %v375_v29 = vld [vmem:[%s4040_s0 + $0x160] sm:$0xff]  ;;  %v376_v31 = vld [vmem:[%s4040_s0 + $0x168] sm:$0xff]  ;;  %493 = vperm.xlu0 %3152, %v459_v28  }
  0x29   : > { %v460_v32 = vld [vmem:[%s4041_s1 + $0x8] sm:$0xff]  ;;  %v2526_v40 = vcombine.high %v372_v30, %v376_v31  ;;  %v2523_v51 = vcombine.low %v371_v27, %v375_v29  ;;  %v2525_v53 = vcombine.low %v372_v30, %v376_v31  ;;  %v3215_v4 = vld [vmem:[%s3311_s27 + $0x100] sm:$0xff]   ;;  %v477_v30 = vld [vmem:[%s4041_s1 + $0x90] sm:$0xff] }
  0x2a   : > { %2692 = vmatpush3.bf16.msra.mxu0 %v3180_v33  ;;  %v3206_v33 = vld [vmem:[%s3311_s27 + $0x150] sm:$0xff]   ;;  %v476_v28 = vld [vmem:[%s4041_s1 + $0x88] sm:$0xff] }
  0x2b   : > { %2804 = vmatpush3.bf16.msra.mxu1 %v3181_v34  ;;  %2693 = vmatprep.subr.bf16.mxu0 %v3182_v35  ;;  %v461_v34 = vld [vmem:[%s4041_s1 + $0x10] sm:$0xff]  ;;  %v2515_v35 = vcombine.low %v363_v15, %v367_v16  ;;  %v400_v15 = vld [vmem:[%s4040_s0 + $0x228] sm:$0xff] }
  0x2c   : > { %2805 = vmatprep.subr.bf16.mxu1 %v3183_v38  ;;  %503 = vperm.xlu1 %3153, %v461_v34   ;;  %v2524_v38 = vcombine.high %v371_v27, %v375_v29  ;;  %v472_v16 = vld [vmem:[%s4041_s1 + $0x68] sm:$0xff]  ;;  %v478_v34 = vld [vmem:[%s4041_s1 + $0x98] sm:$0xff] }
  0x2d   : > { %498 = vperm.xlu0 %3152, %v460_v32   ;;  %v408_v27 = vld [vmem:[%s4040_s0 + $0x268] sm:$0xff] }
  0x2e   : > { %2694 = vmatpush3.bf16.msra.mxu0 %v3184_v41  ;;  %v3209_v41 = vld [vmem:[%s3311_s27 + $0x190] sm:$0xff]  }
  0x2f   : > { %2806 = vmatpush3.bf16.msra.mxu1 %v3185_v42  ;;  %2903 = vmatprep.subr.bf16.mxu0 %v3186_v45  ;;  %v462_v42 = vld [vmem:[%s4041_s1 + $0x18] sm:$0xff]  ;;  %v383_v45 = vld [vmem:[%s4040_s0 + $0x1a0] sm:$0xff] }
  0x30   : > { %3015 = vmatprep.subr.bf16.mxu1 %v3188_v48  ;;  %508 = vperm.xlu1 %3153, %v462_v42   ;;  %v464_v48 = vld [vmem:[%s4041_s1 + $0x28] sm:$0xff]  ;;  %v481_v42 = vld [vmem:[%s4041_s1 + $0xb0] sm:$0xff] }
  0x31   : > { %1708 = vmatmul.mubr.bf16.vlgmr.msra.gmra.mxu0 %v2483_v43  ;;  %v379_v43 = vld [vmem:[%s4040_s0 + $0x180] sm:$0xff] }
  0x32   : > { %1869 = vmatmul.mubr.bf16.vlgmr.msra.gmra.mxu1 %v2485_v44  ;;  %2904 = vmatpush3.bf16.msra.mxu0 %v3187_v46  ;;  %v463_v44 = vld [vmem:[%s4041_s1 + $0x20] sm:$0xff]  ;;  %v380_v46 = vld [vmem:[%s4040_s0 + $0x188] sm:$0xff]  ;;  %v2532_v54 = vcombine.high %v379_v43, %v383_v45  ;;  %v2531_v3 = vcombine.low %v379_v43, %v383_v45 }
  0x33   : > { %1715 = vmatprep.mubr.bf16.mxu0 %v2492_v47  ;;  %3016 = vmatpush3.bf16.msra.mxu1 %v3189_v50  ;;  %v384_v47 = vld [vmem:[%s4040_s0 + $0x1a8] sm:$0xff]  ;;  %v465_v50 = vld [vmem:[%s4041_s1 + $0x30] sm:$0xff] }
  0x34   : > { %1876 = vmatprep.mubr.bf16.mxu1 %v2494_v49  ;;  %2905 = vmatprep.subr.bf16.mxu0 %v3190_v55  ;;  %v3210_v49 = vld [vmem:[%s3311_s27 + $0x148] sm:$0xff]   ;;  %v2533_v5 = vcombine.low %v380_v46, %v384_v47 }
  0x35   : > { %3017 = vmatprep.subr.bf16.mxu1 %v3192_v57  ;;  %513 = vperm.xlu0 %3152, %v463_v44   ;;  %v3212_v55 = vld [vmem:[%s3311_s27 + $0x1c8] sm:$0xff]  }
  0x36   : > { %2906 = vmatpush3.bf16.msra.mxu0 %v3191_v56  ;;  %v2534_v56 = vcombine.high %v380_v46, %v384_v47  ;;  %518 = vperm.xlu1 %3153, %v464_v48   ;;  %v3213_v57 = vld [vmem:[%s3311_s27 + $0x188] sm:$0xff]   ;;  %v482_v46 = vld [vmem:[%s4041_s1 + $0xb8] sm:$0xff]  ;;  %v483_v47 = vld [vmem:[%s4041_s1 + $0xc0] sm:$0xff] }
  0x37   : > { %3018 = vmatpush3.bf16.msra.mxu1 %v3193_v59  ;;  %2907 = vmatprep.subr.bf16.mxu0 %v3194_v63  ;;  %v387_v59 = vld [vmem:[%s4040_s0 + $0x1c0] sm:$0xff]  ;;  %v392_v63 = vld [vmem:[%s4040_s0 + $0x1e8] sm:$0xff] }
  0x38   : > { %3019 = vmatprep.subr.bf16.mxu1 %v3196_v1  ;;  %v3214_v1 = vld [vmem:[%s3311_s27 + $0x140] sm:$0xff]  }
  0x39   : > { %1716 = vmatmul.mubr.bf16.gmra.mxu0 %v2491_v58  ;;  %523 = vperm.xlu0 %3152, %v465_v50   ;;  %v466_v58 = vld [vmem:[%s4041_s1 + $0x38] sm:$0xff]  ;;  %v419_v48 = vld [vmem:[%s4040_s0 + $0x2c0] sm:$0xff]  ;;  %v420_v50 = vld [vmem:[%s4040_s0 + $0x2c8] sm:$0xff] }
  0x3a   : > { %1877 = vmatmul.mubr.bf16.gmra.mxu1 %v2493_v60  ;;  %1723 = vmatprep.mubr.bf16.mxu0 %v2500_v61  ;;  %v467_v60 = vld [vmem:[%s4041_s1 + $0x40] sm:$0xff] }
  0x3b   : > { %1884 = vmatprep.mubr.bf16.mxu1 %v2502_v62  ;;  %2908 = vmatpush3.bf16.msra.mxu0 %v3195_v0  ;;  %v391_v61 = vld [vmem:[%s4040_s0 + $0x1e0] sm:$0xff]  ;;  %v388_v62 = vld [vmem:[%s4040_s0 + $0x1c8] sm:$0xff] }
  0x3c   : > { %3020 = vmatpush3.bf16.msra.mxu1 %v3197_v2  ;;  %2909 = vmatprep.subr.bf16.mxu0 %v3198_v10  ;;  %v468_v0 = vld [vmem:[%s4041_s1 + $0x48] sm:$0xff]  ;;  %v469_v2 = vld [vmem:[%s4041_s1 + $0x50] sm:$0xff]  ;;  %v2540_v6 = vcombine.high %v387_v59, %v391_v61  ;;  %v470_v10 = vld [vmem:[%s4041_s1 + $0x58] sm:$0xff]  ;;  %v2539_v17 = vcombine.low %v387_v59, %v391_v61 }
  0x3d   : > { %3021 = vmatprep.subr.bf16.mxu1 %v3200_v13  ;;  %528 = vperm.xlu1 %3153, %v466_v58   ;;  %v399_v13 = vld [vmem:[%s4040_s0 + $0x220] sm:$0xff]  ;;  %v486_v58 = vld [vmem:[%s4041_s1 + $0xd8] sm:$0xff] }
  0x3e   : > { %533 = vperm.xlu0 %3152, %v467_v60   ;;  %v487_v59 = vld [vmem:[%s4041_s1 + $0xe0] sm:$0xff] }
  0x3f   : > { %2910 = vmatpush3.bf16.msra.mxu0 %v3199_v12  ;;  %v395_v12 = vld [vmem:[%s4040_s0 + $0x200] sm:$0xff] }
  0x40   : > { %3022 = vmatpush3.bf16.msra.mxu1 %v3201_v14  ;;  %2911 = vmatprep.subr.bf16.mxu0 %v3202_v19  ;;  %v396_v14 = vld [vmem:[%s4040_s0 + $0x208] sm:$0xff]  ;;  %v2541_v19 = vcombine.low %v388_v62, %v392_v63  ;;  %v2547_v29 = vcombine.low %v395_v12, %v399_v13  ;;  %v427_v60 = vld [vmem:[%s4040_s0 + $0x300] sm:$0xff] }
  0x41   : > { %1724 = vmatmul.mubr.bf16.gmra.mxu0 %v2499_v7  ;;  %3023 = vmatprep.subr.bf16.mxu1 %v3204_v24  ;;  %v3216_v7 = vld [vmem:[%s3311_s27 + $0x1c0] sm:$0xff]   ;;  %v2549_v31 = vcombine.low %v396_v14, %v400_v15 }
  0x42   : > { %1885 = vmatmul.mubr.bf16.gmra.mxu1 %v2501_v8  ;;  %1731 = vmatprep.mubr.bf16.mxu0 %v2508_v9  ;;  %v2542_v8 = vcombine.high %v388_v62, %v392_v63  ;;  %v3217_v9 = vld [vmem:[%s3311_s27 + $0x180] sm:$0xff]   ;;  %v428_v62 = vld [vmem:[%s4040_s0 + $0x308] sm:$0xff] }
  0x43   : > { %1892 = vmatprep.mubr.bf16.mxu1 %v2510_v11  ;;  %2912 = vmatpush3.bf16.msra.mxu0 %v3203_v21  ;;  %v471_v11 = vld [vmem:[%s4041_s1 + $0x60] sm:$0xff]  ;;  %v2550_v21 = vcombine.high %v396_v14, %v400_v15  ;;  %v432_v63 = vld [vmem:[%s4040_s0 + $0x328] sm:$0xff] }
  0x44   : > { %3024 = vmatpush3.bf16.msra.mxu1 %v3205_v26  ;;  %2913 = vmatprep.subr.bf16.mxu0 %v3206_v33  ;;  %v403_v24 = vld [vmem:[%s4040_s0 + $0x240] sm:$0xff]  ;;  %v404_v26 = vld [vmem:[%s4040_s0 + $0x248] sm:$0xff] }
  0x45   : > { %3025 = vmatprep.subr.bf16.mxu1 %v3208_v39  ;;  %538 = vperm.xlu1 %3153, %v468_v0   ;;  %v2558_v33 = vcombine.high %v404_v26, %v408_v27  ;;  %v416_v39 = vld [vmem:[%s4040_s0 + $0x2a8] sm:$0xff]  ;;  %v2557_v43 = vcombine.low %v404_v26, %v408_v27  ;;  %v431_v61 = vld [vmem:[%s4040_s0 + $0x320] sm:$0xff] }
  0x46   : > { %543 = vperm.xlu0 %3152, %v469_v2   ;;  %v488_v0 = vld [vmem:[%s4041_s1 + $0xe8] sm:$0xff]  ;;  %v489_v2 = vld [vmem:[%s4041_s1 + $0xf0] sm:$0xff]  ;;  %v443_v15 = vld [vmem:[%s4040_s0 + $0x380] sm:$0xff] }
  0x47   : > { %2914 = vmatpush3.bf16.msra.mxu0 %v3207_v36  ;;  %v411_v36 = vld [vmem:[%s4040_s0 + $0x280] sm:$0xff]  ;;  %v456_v26 = vld [vmem:[%s4040_s0 + $0x3e8] sm:$0xff] }
  0x48   : > { %3026 = vmatpush3.bf16.msra.mxu1 %v3209_v41  ;;  %2915 = vmatprep.subr.bf16.mxu0 %v3210_v49  ;;  %v423_v49 = vld [vmem:[%s4040_s0 + $0x2e0] sm:$0xff] }
  0x49   : > { %1732 = vmatmul.mubr.bf16.gmra.mxu0 %v2507_v20  ;;  %3027 = vmatprep.subr.bf16.mxu1 %v3212_v55  ;;  %v2548_v20 = vcombine.high %v395_v12, %v399_v13  ;;  %v2581_v12 = vcombine.low %v428_v62, %v432_v63 }
  0x4a   : > { %1893 = vmatmul.mubr.bf16.gmra.mxu1 %v2509_v22  ;;  %1739 = vmatprep.mubr.bf16.mxu0 %v2516_v23  ;;  %v474_v22 = vld [vmem:[%s4041_s1 + $0x78] sm:$0xff]  ;;  %v475_v23 = vld [vmem:[%s4041_s1 + $0x80] sm:$0xff] }
  0x4b   : > { %1900 = vmatprep.mubr.bf16.mxu1 %v2518_v25  ;;  %2916 = vmatpush3.bf16.msra.mxu0 %v3211_v52  ;;  %v407_v25 = vld [vmem:[%s4040_s0 + $0x260] sm:$0xff]  ;;  %v484_v52 = vld [vmem:[%s4041_s1 + $0xc8] sm:$0xff] }
  0x4c   : > { %3028 = vmatpush3.bf16.msra.mxu1 %v3213_v57  ;;  %2917 = vmatprep.subr.bf16.mxu0 %v3214_v1  ;;  %v2556_v32 = vcombine.high %v403_v24, %v407_v25  ;;  %v2555_v41 = vcombine.low %v403_v24, %v407_v25  ;;  %v2571_v1 = vcombine.low %v419_v48, %v423_v49  ;;  %v455_v24 = vld [vmem:[%s4040_s0 + $0x3e0] sm:$0xff]  ;;  %v452_v25 = vld [vmem:[%s4040_s0 + $0x3c8] sm:$0xff] }
  0x4d   : > { %3029 = vmatprep.subr.bf16.mxu1 %v3216_v7  ;;  %548 = vperm.xlu1 %3153, %v470_v10   ;;  %v435_v7 = vld [vmem:[%s4040_s0 + $0x340] sm:$0xff]  ;;  %v440_v10 = vld [vmem:[%s4040_s0 + $0x368] sm:$0xff] }
  0x4e   : > { %553 = vperm.xlu0 %3152, %v471_v11   ;;  %v2579_v11 = vcombine.low %v427_v60, %v431_v61 }
  0x4f   : > { %2918 = vmatpush3.bf16.msra.mxu0 %v3215_v4  ;;  %v2580_v4 = vcombine.high %v427_v60, %v431_v61 }
  0x50   : > { %3030 = vmatpush3.bf16.msra.mxu1 %v3217_v9  ;;  %v436_v9 = vld [vmem:[%s4040_s0 + $0x348] sm:$0xff] }
  0x51   : > { %1740 = vmatmul.mubr.bf16.gmra.mxu0 %v2515_v35  ;;  %558 = vperm.xlu1 %3153, %v472_v16   ;;  %v479_v35 = vld [vmem:[%s4041_s1 + $0xa0] sm:$0xff]  ;;  %v2590_v14 = vcombine.high %v436_v9, %v440_v10 }
  0x52   : > { %1901 = vmatmul.mubr.bf16.gmra.mxu1 %v2517_v37  ;;  %1747 = vmatprep.mubr.bf16.mxu0 %v2524_v38  ;;  %v415_v37 = vld [vmem:[%s4040_s0 + $0x2a0] sm:$0xff]  ;;  %v412_v38 = vld [vmem:[%s4040_s0 + $0x288] sm:$0xff] }
  0x53   : > { %1908 = vmatprep.mubr.bf16.mxu1 %v2526_v40  ;;  %563 = vperm.xlu0 %3152, %v473_v18   ;;  %v480_v40 = vld [vmem:[%s4041_s1 + $0xa8] sm:$0xff]  ;;  %v2564_v44 = vcombine.high %v411_v36, %v415_v37  ;;  %v2566_v45 = vcombine.high %v412_v38, %v416_v39  ;;  %v2565_v55 = vcombine.low %v412_v38, %v416_v39  ;;  %v447_v16 = vld [vmem:[%s4040_s0 + $0x3a0] sm:$0xff]  ;;  %v341_v39 = vld [vmem:[%s4040_s0 + $0x50] sm:$0xff] }
  0x54   : > { %v448_v18 = vld [vmem:[%s4040_s0 + $0x3a8] sm:$0xff]  ;;  %v2595_v27 = vcombine.low %v443_v15, %v447_v16 }
  0x55   : > { %568 = vperm.xlu1 %3153, %v474_v22  }
  0x57   : > { %573 = vperm.xlu0 %3152, %v475_v23   ;;  %v451_v23 = vld [vmem:[%s4040_s0 + $0x3c0] sm:$0xff] }
  0x59   : > { %1748 = vmatmul.mubr.bf16.gmra.mxu0 %v2523_v51  ;;  %578 = vperm.xlu1 %3153, %v476_v28   ;;  %v424_v51 = vld [vmem:[%s4040_s0 + $0x2e8] sm:$0xff] }
  0x5a   : > { %1909 = vmatmul.mubr.bf16.gmra.mxu1 %v2525_v53  ;;  %1755 = vmatprep.mubr.bf16.mxu0 %v2532_v54  ;;  %v2563_v53 = vcombine.low %v411_v36, %v415_v37  ;;  %v485_v54 = vld [vmem:[%s4041_s1 + $0xd0] sm:$0xff]  ;;  %v2574_v57 = vcombine.high %v420_v50, %v424_v51  ;;  %v2605_v36 = vcombine.low %v452_v25, %v456_v26 }
  0x5b   : > { %1916 = vmatprep.mubr.bf16.mxu1 %v2534_v56  ;;  %583 = vperm.xlu0 %3152, %v477_v30   ;;  %v2572_v56 = vcombine.high %v419_v48, %v423_v49  ;;  %v2606_v30 = vcombine.high %v452_v25, %v456_v26  ;;  %v353_v48 = vld [vmem:[%s4040_s0 + $0xb0] sm:$0xff]  ;;  %v350_v49 = vld [vmem:[%s4040_s0 + $0x98] sm:$0xff] }
  0x5c   : > { %v390_v25 = vld [vmem:[%s4040_s0 + $0x1d8] sm:$0xff] }
  0x5d   : > { %588 = vperm.xlu1 %3153, %v478_v34   ;;  %v338_v34 = vld [vmem:[%s4040_s0 + $0x38] sm:$0xff] }
  0x5e   : > { %v394_v26 = vld [vmem:[%s4040_s0 + $0x1f8] sm:$0xff] }
  0x5f   : > { %593 = vperm.xlu0 %3152, %v479_v35   ;;  %v2603_v35 = vcombine.low %v451_v23, %v455_v24 }
  0x61   : > { %1756 = vmatmul.mubr.bf16.gmra.mxu0 %v2531_v3  ;;  %598 = vperm.xlu1 %3153, %v480_v40   ;;  %v2573_v3 = vcombine.low %v420_v50, %v424_v51  ;;  %v345_v40 = vld [vmem:[%s4040_s0 + $0x70] sm:$0xff]  ;;  %v354_v50 = vld [vmem:[%s4040_s0 + $0xb8] sm:$0xff] }
  0x62   : > { %1917 = vmatmul.mubr.bf16.gmra.mxu1 %v2533_v5  ;;  %1763 = vmatprep.mubr.bf16.mxu0 %v2540_v6  ;;  %v2582_v5 = vcombine.high %v428_v62, %v432_v63  ;;  %v490_v6 = vld [vmem:[%s4041_s1 + $0xf8] sm:$0xff]  ;;  %v2495_v51 = vcombine.low %v341_v39, %v345_v40  ;;  %v2505_v60 = vcombine.low %v350_v49, %v354_v50  ;;  %v365_v63 = vld [vmem:[%s4040_s0 + $0x110] sm:$0xff] }
  0x63   : > { %1924 = vmatprep.mubr.bf16.mxu1 %v2542_v8  ;;  %603 = vperm.xlu0 %3152, %v481_v42   ;;  %v439_v8 = vld [vmem:[%s4040_s0 + $0x360] sm:$0xff]  ;;  %v346_v42 = vld [vmem:[%s4040_s0 + $0x78] sm:$0xff] }
  0x64   : > { %v2588_v13 = vcombine.high %v435_v7, %v439_v8 }
  0x65   : > { %608 = vperm.xlu1 %3153, %v482_v46  }
  0x67   : > { %613 = vperm.xlu0 %3152, %v483_v47   ;;  %v349_v47 = vld [vmem:[%s4040_s0 + $0x90] sm:$0xff] }
  0x69   : > { %1764 = vmatmul.mubr.bf16.gmra.mxu0 %v2539_v17  ;;  %618 = vperm.xlu1 %3153, %v484_v52   ;;  %v444_v17 = vld [vmem:[%s4040_s0 + $0x388] sm:$0xff] }
  0x6a   : > { %1925 = vmatmul.mubr.bf16.gmra.mxu1 %v2541_v19  ;;  %1771 = vmatprep.mubr.bf16.mxu0 %v2548_v20  ;;  %v2587_v19 = vcombine.low %v435_v7, %v439_v8  ;;  %v2589_v20 = vcombine.low %v436_v9, %v440_v10  ;;  %v2598_v22 = vcombine.high %v444_v17, %v448_v18  ;;  %v373_v7 = vld [vmem:[%s4040_s0 + $0x150] sm:$0xff]  ;;  %v374_v9 = vld [vmem:[%s4040_s0 + $0x158] sm:$0xff] }
  0x6b   : > { %1932 = vmatprep.mubr.bf16.mxu1 %v2550_v21  ;;  %623 = vperm.xlu0 %3152, %v485_v54   ;;  %v2596_v21 = vcombine.high %v443_v15, %v447_v16  ;;  %v2597_v28 = vcombine.low %v444_v17, %v448_v18  ;;  %v2506_v54 = vcombine.high %v350_v49, %v354_v50  ;;  %v377_v8 = vld [vmem:[%s4040_s0 + $0x170] sm:$0xff]  ;;  %v378_v10 = vld [vmem:[%s4040_s0 + $0x178] sm:$0xff] }
  0x6c   : > { %v381_v15 = vld [vmem:[%s4040_s0 + $0x190] sm:$0xff]  ;;  %v382_v17 = vld [vmem:[%s4040_s0 + $0x198] sm:$0xff] }
  0x6d   : > { %628 = vperm.xlu1 %3153, %v486_v58   ;;  %v362_v58 = vld [vmem:[%s4040_s0 + $0xf8] sm:$0xff]  ;;  %v385_v16 = vld [vmem:[%s4040_s0 + $0x1b0] sm:$0xff] }
  0x6e   : > { %v386_v18 = vld [vmem:[%s4040_s0 + $0x1b8] sm:$0xff] }
  0x6f   : > { %633 = vperm.xlu0 %3152, %v487_v59   ;;  %v2503_v59 = vcombine.low %v349_v47, %v353_v48 }
  0x71   : > { %1772 = vmatmul.mubr.bf16.gmra.mxu0 %v2547_v29  ;;  %638 = vperm.xlu1 %3153, %v488_v0   ;;  %v2604_v29 = vcombine.high %v451_v23, %v455_v24  ;;  %v369_v0 = vld [vmem:[%s4040_s0 + $0x130] sm:$0xff] }
  0x72   : > { %1933 = vmatmul.mubr.bf16.gmra.mxu1 %v2549_v31  ;;  %1779 = vmatprep.mubr.bf16.mxu0 %v2556_v32  ;;  %v333_v31 = vld [vmem:[%s4040_s0 + $0x10] sm:$0xff] }
  0x73   : > { %1940 = vmatprep.mubr.bf16.mxu1 %v2558_v33  ;;  %643 = vperm.xlu0 %3152, %v489_v2   ;;  %v337_v32 = vld [vmem:[%s4040_s0 + $0x30] sm:$0xff]  ;;  %v334_v33 = vld [vmem:[%s4040_s0 + $0x18] sm:$0xff] }
  0x74   : > { %v2488_v37 = vcombine.high %v333_v31, %v337_v32  ;;  %v2490_v38 = vcombine.high %v334_v33, %v338_v34  ;;  %v370_v2 = vld [vmem:[%s4040_s0 + $0x138] sm:$0xff]  ;;  %v389_v23 = vld [vmem:[%s4040_s0 + $0x1d0] sm:$0xff] }
  0x75   : > { %648 = vperm.xlu1 %3153, %v490_v6   ;;  %v393_v24 = vld [vmem:[%s4040_s0 + $0x1f0] sm:$0xff] }
  0x79   : > { %1780 = vmatmul.mubr.bf16.gmra.mxu0 %v2555_v41  ;;  %v342_v41 = vld [vmem:[%s4040_s0 + $0x58] sm:$0xff] }
  0x7a   : > { %1941 = vmatmul.mubr.bf16.gmra.mxu1 %v2557_v43  ;;  %1787 = vmatprep.mubr.bf16.mxu0 %v2564_v44  ;;  %v2487_v43 = vcombine.low %v333_v31, %v337_v32  ;;  %v2489_v44 = vcombine.low %v334_v33, %v338_v34  ;;  %v2498_v46 = vcombine.high %v342_v41, %v346_v42  ;;  %v397_v31 = vld [vmem:[%s4040_s0 + $0x210] sm:$0xff]  ;;  %v398_v33 = vld [vmem:[%s4040_s0 + $0x218] sm:$0xff] }
  0x7b   : > { %1948 = vmatprep.mubr.bf16.mxu1 %v2566_v45  ;;  %v2496_v45 = vcombine.high %v341_v39, %v345_v40  ;;  %v2497_v52 = vcombine.low %v342_v41, %v346_v42  ;;  %v401_v32 = vld [vmem:[%s4040_s0 + $0x230] sm:$0xff]  ;;  %v402_v34 = vld [vmem:[%s4040_s0 + $0x238] sm:$0xff] }
  0x7c   : > { %v405_v39 = vld [vmem:[%s4040_s0 + $0x250] sm:$0xff]  ;;  %v406_v41 = vld [vmem:[%s4040_s0 + $0x258] sm:$0xff] }
  0x7d   : > { %v409_v40 = vld [vmem:[%s4040_s0 + $0x270] sm:$0xff]  ;;  %v410_v42 = vld [vmem:[%s4040_s0 + $0x278] sm:$0xff] }
  0x81   : > { %1788 = vmatmul.mubr.bf16.gmra.mxu0 %v2563_v53  ;;  %v2504_v53 = vcombine.high %v349_v47, %v353_v48 }
  0x82   : > { %1949 = vmatmul.mubr.bf16.gmra.mxu1 %v2565_v55  ;;  %1795 = vmatprep.mubr.bf16.mxu0 %v2572_v56  ;;  %v357_v55 = vld [vmem:[%s4040_s0 + $0xd0] sm:$0xff] }
  0x83   : > { %1956 = vmatprep.mubr.bf16.mxu1 %v2574_v57  ;;  %v361_v56 = vld [vmem:[%s4040_s0 + $0xf0] sm:$0xff]  ;;  %v358_v57 = vld [vmem:[%s4040_s0 + $0xd8] sm:$0xff] }
  0x84   : > { %v2512_v61 = vcombine.high %v357_v55, %v361_v56  ;;  %v2514_v62 = vcombine.high %v358_v57, %v362_v58 }
  0x89   : > { %1796 = vmatmul.mubr.bf16.gmra.mxu0 %v2571_v1  ;;  %v366_v1 = vld [vmem:[%s4040_s0 + $0x118] sm:$0xff] }
  0x8a   : > { %1957 = vmatmul.mubr.bf16.gmra.mxu1 %v2573_v3  ;;  %1803 = vmatprep.mubr.bf16.mxu0 %v2580_v4  ;;  %v2511_v3 = vcombine.low %v357_v55, %v361_v56  ;;  %v2513_v4 = vcombine.low %v358_v57, %v362_v58  ;;  %v2522_v6 = vcombine.high %v366_v1, %v370_v2  ;;  %v414_v55 = vld [vmem:[%s4040_s0 + $0x298] sm:$0xff] }
  0x8b   : > { %1964 = vmatprep.mubr.bf16.mxu1 %v2582_v5  ;;  %v2520_v5 = vcombine.high %v365_v63, %v369_v0  ;;  %v418_v56 = vld [vmem:[%s4040_s0 + $0x2b8] sm:$0xff] }
  0x91   : > { %1804 = vmatmul.mubr.bf16.gmra.mxu0 %v2579_v11  ;;  %v2519_v11 = vcombine.low %v365_v63, %v369_v0 }
  0x92   : > { %1965 = vmatmul.mubr.bf16.gmra.mxu1 %v2581_v12  ;;  %1811 = vmatprep.mubr.bf16.mxu0 %v2588_v13  ;;  %v2521_v12 = vcombine.low %v366_v1, %v370_v2  ;;  %v2528_v13 = vcombine.high %v373_v7, %v377_v8  ;;  %v2570_v2 = vcombine.high %v414_v55, %v418_v56 }
  0x93   : > { %1972 = vmatprep.mubr.bf16.mxu1 %v2590_v14  ;;  %v2530_v14 = vcombine.high %v374_v9, %v378_v10 }
  0x99   : > { %1812 = vmatmul.mubr.bf16.gmra.mxu0 %v2587_v19  ;;  %v2527_v19 = vcombine.low %v373_v7, %v377_v8 }
  0x9a   : > { %1973 = vmatmul.mubr.bf16.gmra.mxu1 %v2589_v20  ;;  %1819 = vmatprep.mubr.bf16.mxu0 %v2596_v21  ;;  %v2529_v20 = vcombine.low %v374_v9, %v378_v10  ;;  %v2536_v21 = vcombine.high %v381_v15, %v385_v16 }
  0x9b   : > { %1980 = vmatprep.mubr.bf16.mxu1 %v2598_v22  ;;  %v2538_v22 = vcombine.high %v382_v17, %v386_v18 }
  0xa1   : > { %1820 = vmatmul.mubr.bf16.gmra.mxu0 %v2595_v27  ;;  %v2535_v27 = vcombine.low %v381_v15, %v385_v16 }
  0xa2   : > { %1981 = vmatmul.mubr.bf16.gmra.mxu1 %v2597_v28  ;;  %1827 = vmatprep.mubr.bf16.mxu0 %v2604_v29  ;;  %v2537_v28 = vcombine.low %v382_v17, %v386_v18  ;;  %v2544_v29 = vcombine.high %v389_v23, %v393_v24  ;;  %v422_v17 = vld [vmem:[%s4040_s0 + $0x2d8] sm:$0xff] }
  0xa3   : > { %1988 = vmatprep.mubr.bf16.mxu1 %v2606_v30  ;;  %v2546_v30 = vcombine.high %v390_v25, %v394_v26  ;;  %v494_v48 = vpop.permute.xlu0 %493  ;;  %v426_v18 = vld [vmem:[%s4040_s0 + $0x2f8] sm:$0xff] }
  0xa7   : > { %v504_v8 = vpop.permute.xlu1 %503 }
  0xa8   : > { %v499_v1 = vpop.permute.xlu0 %498 }
  0xa9   : > { %1828 = vmatmul.mubr.bf16.gmra.mxu0 %v2603_v35  ;;  %v2543_v35 = vcombine.low %v389_v23, %v393_v24  ;;  %v2569_v24 = vcombine.low %v414_v55, %v418_v56 }
  0xaa   : > { %1989 = vmatmul.mubr.bf16.gmra.mxu1 %v2605_v36  ;;  %2029 = vmatprep.mubr.bf16.mxu0 %v2488_v37  ;;  %v2545_v36 = vcombine.low %v390_v25, %v394_v26  ;;  %v2552_v37 = vcombine.high %v397_v31, %v401_v32 }
  0xab   : > { %2190 = vmatprep.mubr.bf16.mxu1 %v2490_v38  ;;  %v2554_v38 = vcombine.high %v398_v33, %v402_v34 }
  0xb1   : > { %2030 = vmatmul.mubr.bf16.vlgmr.msra.gmra.mxu0 %v2487_v43  ;;  %v2551_v43 = vcombine.low %v397_v31, %v401_v32 }
  0xb2   : > { %2191 = vmatmul.mubr.bf16.vlgmr.msra.gmra.mxu1 %v2489_v44  ;;  %2037 = vmatprep.mubr.bf16.mxu0 %v2496_v45  ;;  %v2553_v44 = vcombine.low %v398_v33, %v402_v34  ;;  %v2560_v45 = vcombine.high %v405_v39, %v409_v40 }
  0xb3   : > { %2198 = vmatprep.mubr.bf16.mxu1 %v2498_v46  ;;  %v2562_v46 = vcombine.high %v406_v41, %v410_v42 }
  0xb9   : > { %2038 = vmatmul.mubr.bf16.gmra.mxu0 %v2495_v51  ;;  %v413_v51 = vld [vmem:[%s4040_s0 + $0x290] sm:$0xff] }
  0xba   : > { %2199 = vmatmul.mubr.bf16.gmra.mxu1 %v2497_v52  ;;  %2045 = vmatprep.mubr.bf16.mxu0 %v2504_v53  ;;  %v417_v52 = vld [vmem:[%s4040_s0 + $0x2b0] sm:$0xff] }
  0xbb   : > { %2206 = vmatprep.mubr.bf16.mxu1 %v2506_v54  ;;  %v2568_v63 = vcombine.high %v413_v51, %v417_v52 }
  0xc1   : > { %2046 = vmatmul.mubr.bf16.gmra.mxu0 %v2503_v59  ;;  %v2559_v59 = vcombine.low %v405_v39, %v409_v40  ;;  %v433_v39 = vld [vmem:[%s4040_s0 + $0x330] sm:$0xff] }
  0xc2   : > { %2207 = vmatmul.mubr.bf16.gmra.mxu1 %v2505_v60  ;;  %2053 = vmatprep.mubr.bf16.mxu0 %v2512_v61 }
  0xc3   : > { %2214 = vmatprep.mubr.bf16.mxu1 %v2514_v62  ;;  %v2561_v62 = vcombine.low %v406_v41, %v410_v42 }
  0xc9   : > { %2054 = vmatmul.mubr.bf16.gmra.mxu0 %v2511_v3 }
  0xca   : > { %2215 = vmatmul.mubr.bf16.gmra.mxu1 %v2513_v4  ;;  %2061 = vmatprep.mubr.bf16.mxu0 %v2520_v5 }
  0xcb   : > { %2222 = vmatprep.mubr.bf16.mxu1 %v2522_v6 }
  0xd1   : > { %2062 = vmatmul.mubr.bf16.gmra.mxu0 %v2519_v11 }
  0xd2   : > { %2223 = vmatmul.mubr.bf16.gmra.mxu1 %v2521_v12  ;;  %2069 = vmatprep.mubr.bf16.mxu0 %v2528_v13  ;;  %v421_v12 = vld [vmem:[%s4040_s0 + $0x2d0] sm:$0xff] }
  0xd3   : > { %2230 = vmatprep.mubr.bf16.mxu1 %v2530_v14  ;;  %v425_v13 = vld [vmem:[%s4040_s0 + $0x2f0] sm:$0xff] }
  0xd4   : > { %v2576_v25 = vcombine.high %v421_v12, %v425_v13 }
  0xd9   : > { %2070 = vmatmul.mubr.bf16.gmra.mxu0 %v2527_v19 }
  0xda   : > { %2231 = vmatmul.mubr.bf16.gmra.mxu1 %v2529_v20  ;;  %2077 = vmatprep.mubr.bf16.mxu0 %v2536_v21  ;;  %v2567_v21 = vcombine.low %v413_v51, %v417_v52 }
  0xdb   : > { %2238 = vmatprep.mubr.bf16.mxu1 %v2538_v22 }
  0xe1   : > { %2078 = vmatmul.mubr.bf16.gmra.mxu0 %v2535_v27  ;;  %v509_v27 = vpop.permute.xlu1 %508 }
  0xe2   : > { %2239 = vmatmul.mubr.bf16.gmra.mxu1 %v2537_v28  ;;  %2085 = vmatprep.mubr.bf16.mxu0 %v2544_v29  ;;  %v2578_v28 = vcombine.high %v422_v17, %v426_v18 }
  0xe3   : > { %2246 = vmatprep.mubr.bf16.mxu1 %v2546_v30 }
  0xe9   : > { %2086 = vmatmul.mubr.bf16.gmra.mxu0 %v2543_v35 }
  0xea   : > { %2247 = vmatmul.mubr.bf16.gmra.mxu1 %v2545_v36  ;;  %2093 = vmatprep.mubr.bf16.mxu0 %v2552_v37  ;;  %v514_v37 = vpop.permute.xlu0 %513 }
  0xeb   : > { %2254 = vmatprep.mubr.bf16.mxu1 %v2554_v38  ;;  %v429_v38 = vld [vmem:[%s4040_s0 + $0x310] sm:$0xff] }
  0xec   : > { %v2584_v51 = vcombine.high %v429_v38, %v433_v39 }
  0xf1   : > { %v2695_v47 = vpop.f32.mrf.mxu0  ;;  %2094 = vmatmul.mubr.bf16.gmra.mxu0 %v2551_v43  ;;  %v430_v43 = vld [vmem:[%s4040_s0 + $0x318] sm:$0xff] }
  0xf2   : > { %v2807_v49 = vpop.f32.mrf.mxu1  ;;  %2255 = vmatmul.mubr.bf16.gmra.mxu1 %v2553_v44  ;;  %2101 = vmatprep.mubr.bf16.mxu0 %v2560_v45  ;;  %v434_v44 = vld [vmem:[%s4040_s0 + $0x338] sm:$0xff] }
  0xf3   : > { %v2696_v50 = vpop.f32.mrf.mxu0  ;;  %2262 = vmatprep.mubr.bf16.mxu1 %v2562_v46 }
  0xf4   : > { %v2697_v53 = vadd.f32 %v2696_v50, %v2695_v47  ;;  %v2808_v54 = vpop.f32.mrf.mxu1  ;;  %v2575_v47 = vcombine.low %v421_v12, %v425_v13  ;;  %v2577_v50 = vcombine.low %v422_v17, %v426_v18  ;;  %v2585_v13 = vcombine.low %v430_v43, %v434_v44 }
  0xf5   : > { %v2809_v57 = vadd.f32 %v2808_v54, %v2807_v49  ;;  %v2698_v58 = vpop.f32.mrf.mxu0  ;;  %v2586_v54 = vcombine.high %v430_v43, %v434_v44 }
  0xf6   : > { %v1710_v60 = vadd.f32 %v2697_v53, %v494_v48  ;;  %v2810_v61 = vpop.f32.mrf.mxu1  ;;  %v519_v53 = vpop.permute.xlu1 %518 }
  0xf7   : > { %v2699_v0 = vpop.f32.mrf.mxu0 }
  0xf8   : > { %v3789_v3 = vadd.f32 %v2809_v57, %v1710_v60  ;;  %v2700_v4 = vadd.f32 %v2699_v0, %v2698_v58  ;;  %v2811_v5 = vpop.f32.mrf.mxu1  ;;  %v437_v0 = vld [vmem:[%s4040_s0 + $0x350] sm:$0xff] }
  0xf9   : > { %v2812_v6 = vadd.f32 %v2811_v5, %v2810_v61  ;;  %v2701_v7 = vpop.f32.mrf.mxu0  ;;  %2102 = vmatmul.mubr.bf16.gmra.mxu0 %v2559_v59 }
  0xfa   : > { %v1713_v9 = vadd.f32 %v2700_v4, %v499_v1  ;;  %v2813_v10 = vpop.f32.mrf.mxu1  ;;  %2263 = vmatmul.mubr.bf16.gmra.mxu1 %v2561_v62  ;;  %2109 = vmatprep.mubr.bf16.mxu0 %v2568_v63  ;;  %v524_v63 = vpop.permute.xlu0 %523  ;;  %v441_v1 = vld [vmem:[%s4040_s0 + $0x370] sm:$0xff] }
  0xfb   : > { %v2702_v11 = vpop.f32.mrf.mxu0  ;;  %2270 = vmatprep.mubr.bf16.mxu1 %v2570_v2  ;;  %v529_v17 = vpop.permute.xlu1 %528 }
  0xfc   : > { %v3797_v14 = vadd.f32 %v2812_v6, %v1713_v9  ;;  %v2703_v15 = vadd.f32 %v2702_v11, %v2701_v7  ;;  %v2814_v16 = vpop.f32.mrf.mxu1  ;;  %v438_v6 = vld [vmem:[%s4040_s0 + $0x358] sm:$0xff] }
  0xfd   : > { %v2815_v19 = vadd.f32 %v2814_v16, %v2813_v10  ;;  %v2704_v20 = vpop.f32.mrf.mxu0  ;;  %v442_v7 = vld [vmem:[%s4040_s0 + $0x378] sm:$0xff]  ;;  %v2583_v10 = vcombine.low %v429_v38, %v433_v39  ;;  %v2591_v38 = vcombine.low %v437_v0, %v441_v1 }
  0xfe   : > { %v1718_v22 = vadd.f32 %v2703_v15, %v504_v8  ;;  %v2816_v23 = vpop.f32.mrf.mxu1  ;;  %v2592_v15 = vcombine.high %v437_v0, %v441_v1  ;;  %v2594_v18 = vcombine.high %v438_v6, %v442_v7 }
  0xff   : > { %v2705_v26 = vpop.f32.mrf.mxu0 }
 0x100   : > { %v3805_v29 = vadd.f32 %v2815_v19, %v1718_v22  ;;  %v2706_v30 = vadd.f32 %v2705_v26, %v2704_v20  ;;  %v2817_v31 = vpop.f32.mrf.mxu1 }
 0x101   : > { %v2818_v32 = vadd.f32 %v2817_v31, %v2816_v23  ;;  %v2707_v33 = vpop.f32.mrf.mxu0  ;;  %2110 = vmatmul.mubr.bf16.gmra.mxu0 %v2567_v21 }
 0x102   : > { %v1721_v34 = vadd.f32 %v2706_v30, %v509_v27  ;;  %v2819_v35 = vpop.f32.mrf.mxu1  ;;  %2271 = vmatmul.mubr.bf16.gmra.mxu1 %v2569_v24  ;;  %2117 = vmatprep.mubr.bf16.mxu0 %v2576_v25  ;;  %v534_v27 = vpop.permute.xlu0 %533  ;;  %v449_v30 = vld [vmem:[%s4040_s0 + $0x3b0] sm:$0xff] }
 0x103   : > { %v2708_v36 = vpop.f32.mrf.mxu0  ;;  %2278 = vmatprep.mubr.bf16.mxu1 %v2578_v28  ;;  %v445_v28 = vld [vmem:[%s4040_s0 + $0x390] sm:$0xff] }
 0x104   : > { %v3813_v40 = vadd.f32 %v2818_v32, %v1721_v34  ;;  %v2709_v41 = vadd.f32 %v2708_v36, %v2707_v33  ;;  %v2820_v42 = vpop.f32.mrf.mxu1  ;;  %v446_v34 = vld [vmem:[%s4040_s0 + $0x398] sm:$0xff]  ;;  %v2600_v43 = vcombine.high %v445_v28, %v449_v30 }
 0x105   : > { %v2821_v45 = vadd.f32 %v2820_v42, %v2819_v35  ;;  %v2710_v46 = vpop.f32.mrf.mxu0  ;;  %v450_v35 = vld [vmem:[%s4040_s0 + $0x3b8] sm:$0xff]  ;;  %v2593_v42 = vcombine.low %v438_v6, %v442_v7 }
 0x106   : > { %v1726_v48 = vadd.f32 %v2709_v41, %v514_v37  ;;  %v2822_v49 = vpop.f32.mrf.mxu1  ;;  %v2601_v7 = vcombine.low %v446_v34, %v450_v35 }
 0x107   : > { %v2711_v52 = vpop.f32.mrf.mxu0 }
 0x108   : > { %v3821_v55 = vadd.f32 %v2821_v45, %v1726_v48  ;;  %v2712_v56 = vadd.f32 %v2711_v52, %v2710_v46  ;;  %v2823_v57 = vpop.f32.mrf.mxu1  ;;  %v539_v45 = vpop.permute.xlu1 %538  ;;  %v2602_v46 = vcombine.high %v446_v34, %v450_v35 }
 0x109   : > { %v2824_v58 = vadd.f32 %v2823_v57, %v2822_v49  ;;  %v2713_v59 = vpop.f32.mrf.mxu0  ;;  %2118 = vmatmul.mubr.bf16.gmra.mxu0 %v2575_v47  ;;  %v453_v57 = vld [vmem:[%s4040_s0 + $0x3d0] sm:$0xff] }
 0x10a   : > { %v1729_v60 = vadd.f32 %v2712_v56, %v519_v53  ;;  %v2825_v61 = vpop.f32.mrf.mxu1  ;;  %2279 = vmatmul.mubr.bf16.gmra.mxu1 %v2577_v50  ;;  %2125 = vmatprep.mubr.bf16.mxu0 %v2584_v51  ;;  %v544_v56 = vpop.permute.xlu0 %543 }
 0x10b   : > { %v2714_v62 = vpop.f32.mrf.mxu0  ;;  %2286 = vmatprep.mubr.bf16.mxu1 %v2586_v54 }
 0x10c   : > { %v3829_v2 = vadd.f32 %v2824_v58, %v1729_v60  ;;  %v2715_v4 = vadd.f32 %v2714_v62, %v2713_v59  ;;  %v2826_v5 = vpop.f32.mrf.mxu1  ;;  %v457_v58 = vld [vmem:[%s4040_s0 + $0x3f0] sm:$0xff]  ;;  %v454_v62 = vld [vmem:[%s4040_s0 + $0x3d8] sm:$0xff] }
 0x10d   : > { %v2827_v8 = vadd.f32 %v2826_v5, %v2825_v61  ;;  %v2716_v9 = vpop.f32.mrf.mxu0 }
 0x10e   : > { %v1734_v11 = vadd.f32 %v2715_v4, %v524_v63  ;;  %v2828_v12 = vpop.f32.mrf.mxu1  ;;  %v458_v63 = vld [vmem:[%s4040_s0 + $0x3f8] sm:$0xff]  ;;  %v2599_v4 = vcombine.low %v445_v28, %v449_v30  ;;  %v2607_v28 = vcombine.low %v453_v57, %v457_v58 }
 0x10f   : > { %v2717_v16 = vpop.f32.mrf.mxu0 }
 0x110   : > { %v3837_v19 = vadd.f32 %v2827_v8, %v1734_v11  ;;  %v2718_v20 = vadd.f32 %v2717_v16, %v2716_v9  ;;  %v2829_v21 = vpop.f32.mrf.mxu1  ;;  %v2608_v8 = vcombine.high %v453_v57, %v457_v58  ;;  %v2610_v11 = vcombine.high %v454_v62, %v458_v63 }
 0x111   : > { %v2830_v22 = vadd.f32 %v2829_v21, %v2828_v12  ;;  %v2719_v23 = vpop.f32.mrf.mxu0  ;;  %2126 = vmatmul.mubr.bf16.gmra.mxu0 %v2583_v10  ;;  %v549_v10 = vpop.permute.xlu1 %548 }
 0x112   : > { %v1737_v24 = vadd.f32 %v2718_v20, %v529_v17  ;;  %v2831_v25 = vpop.f32.mrf.mxu1  ;;  %2287 = vmatmul.mubr.bf16.gmra.mxu1 %v2585_v13  ;;  %2133 = vmatprep.mubr.bf16.mxu0 %v2592_v15 }
 0x113   : > { %v2720_v26 = vpop.f32.mrf.mxu0  ;;  %2294 = vmatprep.mubr.bf16.mxu1 %v2594_v18 }
 0x114   : > { %v3845_v31 = vadd.f32 %v2830_v22, %v1737_v24  ;;  %v2721_v32 = vadd.f32 %v2720_v26, %v2719_v23  ;;  %v2832_v33 = vpop.f32.mrf.mxu1  ;;  %v554_v22 = vpop.permute.xlu0 %553 }
 0x115   : > { %v2833_v36 = vadd.f32 %v2832_v33, %v2831_v25  ;;  %v2722_v37 = vpop.f32.mrf.mxu0  ;;  %v2609_v33 = vcombine.low %v454_v62, %v458_v63  ;;  %v559_v35 = vpop.permute.xlu1 %558 }
 0x116   : > { %v1742_v39 = vadd.f32 %v2721_v32, %v534_v27  ;;  %v2834_v41 = vpop.f32.mrf.mxu1 }
 0x117   : > { %v2723_v44 = vpop.f32.mrf.mxu0 }
 0x118   : > { %v3853_v47 = vadd.f32 %v2833_v36, %v1742_v39  ;;  %v2724_v48 = vadd.f32 %v2723_v44, %v2722_v37  ;;  %v2835_v49 = vpop.f32.mrf.mxu1 }
 0x119   : > { %v2836_v50 = vadd.f32 %v2835_v49, %v2834_v41  ;;  %v2725_v51 = vpop.f32.mrf.mxu0  ;;  %2134 = vmatmul.mubr.bf16.gmra.mxu0 %v2591_v38 }
 0x11a   : > { %v1745_v52 = vadd.f32 %v2724_v48, %v539_v45  ;;  %v2837_v53 = vpop.f32.mrf.mxu1  ;;  %2295 = vmatmul.mubr.bf16.gmra.mxu1 %v2593_v42  ;;  %2141 = vmatprep.mubr.bf16.mxu0 %v2600_v43  ;;  %v564_v45 = vpop.permute.xlu0 %563 }
 0x11b   : > { %v2726_v54 = vpop.f32.mrf.mxu0  ;;  %2302 = vmatprep.mubr.bf16.mxu1 %v2602_v46 }
 0x11c   : > { %v3861_v59 = vadd.f32 %v2836_v50, %v1745_v52  ;;  %v2727_v60 = vadd.f32 %v2726_v54, %v2725_v51  ;;  %v2838_v61 = vpop.f32.mrf.mxu1 }
 0x11d   : > { %v2839_v0 = vadd.f32 %v2838_v61, %v2837_v53  ;;  %v2728_v1 = vpop.f32.mrf.mxu0 }
 0x11e   : > { %v1750_v5 = vadd.f32 %v2727_v60, %v544_v56  ;;  %v2840_v6 = vpop.f32.mrf.mxu1  ;;  %v569_v56 = vpop.permute.xlu1 %568 }
 0x11f   : > { %v2729_v9 = vpop.f32.mrf.mxu0 }
 0x120   : > { %v3869_v12 = vadd.f32 %v2839_v0, %v1750_v5  ;;  %v2730_v13 = vadd.f32 %v2729_v9, %v2728_v1  ;;  %v2841_v15 = vpop.f32.mrf.mxu1 }
 0x121   : > { %v2842_v16 = vadd.f32 %v2841_v15, %v2840_v6  ;;  %v2731_v17 = vpop.f32.mrf.mxu0  ;;  %2142 = vmatmul.mubr.bf16.gmra.mxu0 %v2599_v4  ;;  %v574_v4 = vpop.permute.xlu0 %573 }
 0x122   : > { %v1753_v18 = vadd.f32 %v2730_v13, %v549_v10  ;;  %v2843_v20 = vpop.f32.mrf.mxu1  ;;  %2303 = vmatmul.mubr.bf16.gmra.mxu1 %v2601_v7  ;;  %2149 = vmatprep.mubr.bf16.mxu0 %v2608_v8  ;;  %v579_v15 = vpop.permute.xlu1 %578 }
 0x123   : > { %v2732_v21 = vpop.f32.mrf.mxu0  ;;  %2310 = vmatprep.mubr.bf16.mxu1 %v2610_v11 }
 0x124   : > { %v3871_v23 = vadd.f32 %v2842_v16, %v1753_v18  ;;  %v2733_v24 = vadd.f32 %v2732_v21, %v2731_v17  ;;  %v2844_v25 = vpop.f32.mrf.mxu1 }
 0x125   : > { %v2845_v26 = vadd.f32 %v2844_v25, %v2843_v20  ;;  %v2734_v27 = vpop.f32.mrf.mxu0 }
 0x126   : > { %v1758_v30 = vadd.f32 %v2733_v24, %v554_v22  ;;  %v2846_v32 = vpop.f32.mrf.mxu1 }
 0x127   : > { %v2735_v34 = vpop.f32.mrf.mxu0 }
 0x128   : > { %v3873_v36 = vadd.f32 %v2845_v26, %v1758_v30  ;;  %v2736_v37 = vadd.f32 %v2735_v34, %v2734_v27  ;;  %v2847_v38 = vpop.f32.mrf.mxu1  ;;  %v584_v26 = vpop.permute.xlu0 %583 }
 0x129   : > { %v2848_v39 = vadd.f32 %v2847_v38, %v2846_v32  ;;  %v2737_v41 = vpop.f32.mrf.mxu0  ;;  %2150 = vmatmul.mubr.bf16.gmra.mxu0 %v2607_v28  ;;  %v589_v38 = vpop.permute.xlu1 %588 }
 0x12a   : > { %v1761_v42 = vadd.f32 %v2736_v37, %v559_v35  ;;  %v2849_v43 = vpop.f32.mrf.mxu1  ;;  %2311 = vmatmul.mubr.bf16.gmra.mxu1 %v2609_v33 }
 0x12b   : > { %v2738_v44 = vpop.f32.mrf.mxu0 }
 0x12c   : > { %v3875_v46 = vadd.f32 %v2848_v39, %v1761_v42  ;;  %v2739_v48 = vadd.f32 %v2738_v44, %v2737_v41  ;;  %v2850_v49 = vpop.f32.mrf.mxu1 }
 0x12d   : > { %v2851_v50 = vadd.f32 %v2850_v49, %v2849_v43  ;;  %v2740_v51 = vpop.f32.mrf.mxu0 }
 0x12e   : > { %v1766_v52 = vadd.f32 %v2739_v48, %v564_v45  ;;  %v2852_v53 = vpop.f32.mrf.mxu1 }
 0x12f   : > { %v2741_v54 = vpop.f32.mrf.mxu0 }
 0x130   : > { %v3877_v57 = vadd.f32 %v2851_v50, %v1766_v52  ;;  %v2742_v58 = vadd.f32 %v2741_v54, %v2740_v51  ;;  %v2853_v60 = vpop.f32.mrf.mxu1  ;;  %v594_v50 = vpop.permute.xlu0 %593 }
 0x131   : > { %v2854_v61 = vadd.f32 %v2853_v60, %v2852_v53  ;;  %v2743_v62 = vpop.f32.mrf.mxu0 }
 0x132   : > { %v1769_v63 = vadd.f32 %v2742_v58, %v569_v56  ;;  %v2855_v0 = vpop.f32.mrf.mxu1 }
 0x133   : > { %v2744_v1 = vpop.f32.mrf.mxu0 }
 0x134   : > { %v3879_v5 = vadd.f32 %v2854_v61, %v1769_v63  ;;  %v2745_v6 = vadd.f32 %v2744_v1, %v2743_v62  ;;  %v2856_v7 = vpop.f32.mrf.mxu1  ;;  %v599_v62 = vpop.permute.xlu1 %598 }
 0x135   : > { %v2857_v8 = vadd.f32 %v2856_v7, %v2855_v0  ;;  %v2746_v9 = vpop.f32.mrf.mxu0 }
 0x136   : > { %v1774_v10 = vadd.f32 %v2745_v6, %v574_v4  ;;  %v2858_v11 = vpop.f32.mrf.mxu1 }
 0x137   : > { %v2747_v13 = vpop.f32.mrf.mxu0 }
 0x138   : > { %v3881_v16 = vadd.f32 %v2857_v8, %v1774_v10  ;;  %v2748_v17 = vadd.f32 %v2747_v13, %v2746_v9  ;;  %v2859_v18 = vpop.f32.mrf.mxu1  ;;  %v604_v10 = vpop.permute.xlu0 %603 }
 0x139   : > { %v2860_v20 = vadd.f32 %v2859_v18, %v2858_v11  ;;  %v2749_v21 = vpop.f32.mrf.mxu0 }
 0x13a   : > { %v1777_v22 = vadd.f32 %v2748_v17, %v579_v15  ;;  %v2861_v24 = vpop.f32.mrf.mxu1 }
 0x13b   : > { %v2750_v25 = vpop.f32.mrf.mxu0 }
 0x13c   : > { %v3883_v27 = vadd.f32 %v2860_v20, %v1777_v22  ;;  %v2751_v28 = vadd.f32 %v2750_v25, %v2749_v21  ;;  %v2862_v30 = vpop.f32.mrf.mxu1 }
 0x13d   : > { %v2863_v32 = vadd.f32 %v2862_v30, %v2861_v24  ;;  %v2752_v33 = vpop.f32.mrf.mxu0  ;;  %v609_v24 = vpop.permute.xlu1 %608 }
 0x13e   : > { %v1782_v34 = vadd.f32 %v2751_v28, %v584_v26  ;;  %v2864_v35 = vpop.f32.mrf.mxu1 }
 0x13f   : > { %v2753_v37 = vpop.f32.mrf.mxu0 }
 0x140   : > { %v3885_v39 = vadd.f32 %v2863_v32, %v1782_v34  ;;  %v2754_v41 = vadd.f32 %v2753_v37, %v2752_v33  ;;  %v2865_v42 = vpop.f32.mrf.mxu1  ;;  %v614_v37 = vpop.permute.xlu0 %613 }
 0x141   : > { %v2866_v43 = vadd.f32 %v2865_v42, %v2864_v35  ;;  %v2755_v44 = vpop.f32.mrf.mxu0 }
 0x142   : > { %v1785_v45 = vadd.f32 %v2754_v41, %v589_v38  ;;  %v2867_v48 = vpop.f32.mrf.mxu1 }
 0x143   : > { %v2756_v49 = vpop.f32.mrf.mxu0 }
 0x144   : > { %v3887_v51 = vadd.f32 %v2866_v43, %v1785_v45  ;;  %v2757_v52 = vadd.f32 %v2756_v49, %v2755_v44  ;;  %v2868_v53 = vpop.f32.mrf.mxu1 }
 0x145   : > { %v2869_v54 = vadd.f32 %v2868_v53, %v2867_v48  ;;  %v2758_v56 = vpop.f32.mrf.mxu0 }
 0x146   : > { %v1790_v58 = vadd.f32 %v2757_v52, %v594_v50  ;;  %v2870_v60 = vpop.f32.mrf.mxu1  ;;  %v619_v50 = vpop.permute.xlu1 %618 }
 0x147   : > { %v2759_v61 = vpop.f32.mrf.mxu0 }
 0x148   : > { %v3889_v63 = vadd.f32 %v2869_v54, %v1790_v58  ;;  %v2760_v0 = vadd.f32 %v2759_v61, %v2758_v56  ;;  %v2871_v1 = vpop.f32.mrf.mxu1 }
 0x149   : > { %v2872_v4 = vadd.f32 %v2871_v1, %v2870_v60  ;;  %v2761_v6 = vpop.f32.mrf.mxu0 }
 0x14a   : > { %v1793_v7 = vadd.f32 %v2760_v0, %v599_v62  ;;  %v2873_v8 = vpop.f32.mrf.mxu1  ;;  %v624_v0 = vpop.permute.xlu0 %623 }
 0x14b   : > { %v2762_v9 = vpop.f32.mrf.mxu0 }
 0x14c   : > { %v3891_v11 = vadd.f32 %v2872_v4, %v1793_v7  ;;  %v2763_v13 = vadd.f32 %v2762_v9, %v2761_v6  ;;  %v2874_v15 = vpop.f32.mrf.mxu1 }
 0x14d   : > { %v2875_v17 = vadd.f32 %v2874_v15, %v2873_v8  ;;  %v2764_v18 = vpop.f32.mrf.mxu0  ;;  %v629_v15 = vpop.permute.xlu1 %628 }
 0x14e   : > { %v1798_v20 = vadd.f32 %v2763_v13, %v604_v10  ;;  %v2876_v21 = vpop.f32.mrf.mxu1 }
 0x14f   : > { %v2765_v22 = vpop.f32.mrf.mxu0 }
 0x150   : > { %v3893_v25 = vadd.f32 %v2875_v17, %v1798_v20  ;;  %v2766_v26 = vadd.f32 %v2765_v22, %v2764_v18  ;;  %v2877_v28 = vpop.f32.mrf.mxu1 }
 0x151   : > { %v2878_v30 = vadd.f32 %v2877_v28, %v2876_v21  ;;  %v2767_v32 = vpop.f32.mrf.mxu0 }
 0x152   : > { %v1801_v33 = vadd.f32 %v2766_v26, %v609_v24  ;;  %v2879_v34 = vpop.f32.mrf.mxu1 }
 0x153   : > { %v2768_v35 = vpop.f32.mrf.mxu0 }
 0x154   : > { %v3895_v38 = vadd.f32 %v2878_v30, %v1801_v33  ;;  %v2769_v41 = vadd.f32 %v2768_v35, %v2767_v32  ;;  %v2880_v42 = vpop.f32.mrf.mxu1  ;;  %v634_v30 = vpop.permute.xlu0 %633 }
 0x155   : > { %v2881_v43 = vadd.f32 %v2880_v42, %v2879_v34  ;;  %v2770_v44 = vpop.f32.mrf.mxu0 }
 0x156   : > { %v1806_v45 = vadd.f32 %v2769_v41, %v614_v37  ;;  %v2882_v48 = vpop.f32.mrf.mxu1 }
 0x157   : > { %v2771_v49 = vpop.f32.mrf.mxu0 }
 0x158   : > { %v3897_v52 = vadd.f32 %v2881_v43, %v1806_v45  ;;  %v2772_v53 = vadd.f32 %v2771_v49, %v2770_v44  ;;  %v2883_v54 = vpop.f32.mrf.mxu1  ;;  %v639_v44 = vpop.permute.xlu1 %638 }
 0x159   : > { %v2884_v56 = vadd.f32 %v2883_v54, %v2882_v48  ;;  %v2773_v58 = vpop.f32.mrf.mxu0 }
 0x15a   : > { %v1809_v60 = vadd.f32 %v2772_v53, %v619_v50  ;;  %v2885_v61 = vpop.f32.mrf.mxu1 }
 0x15b   : > { %v2774_v62 = vpop.f32.mrf.mxu0 }
 0x15c   : > { %v3899_v1 = vadd.f32 %v2884_v56, %v1809_v60  ;;  %v2775_v4 = vadd.f32 %v2774_v62, %v2773_v58  ;;  %v2886_v6 = vpop.f32.mrf.mxu1  ;;  %v644_v60 = vpop.permute.xlu0 %643 }
 0x15d   : > { %v2887_v7 = vadd.f32 %v2886_v6, %v2885_v61  ;;  %v2776_v8 = vpop.f32.mrf.mxu0 }
 0x15e   : > { %v1814_v9 = vadd.f32 %v2775_v4, %v624_v0  ;;  %v2888_v10 = vpop.f32.mrf.mxu1 }
 0x15f   : > { %v2777_v13 = vpop.f32.mrf.mxu0 }
 0x160   : > { %v3901_v17 = vadd.f32 %v2887_v7, %v1814_v9  ;;  %v2778_v18 = vadd.f32 %v2777_v13, %v2776_v8  ;;  %v2889_v20 = vpop.f32.mrf.mxu1 }
 0x161   : > { %v2890_v21 = vadd.f32 %v2889_v20, %v2888_v10  ;;  %v2779_v22 = vpop.f32.mrf.mxu0  ;;  %v649_v10 = vpop.permute.xlu1 %648 }
 0x162   : > { %v1817_v24 = vadd.f32 %v2778_v18, %v629_v15  ;;  %v2891_v26 = vpop.f32.mrf.mxu1 }
 0x163   : > { %v2780_v28 = vpop.f32.mrf.mxu0 }
 0x164   : > { %v3903_v32 = vadd.f32 %v2890_v21, %v1817_v24  ;;  %v2781_v33 = vadd.f32 %v2780_v28, %v2779_v22  ;;  %v2892_v34 = vpop.f32.mrf.mxu1 }
 0x165   : > { %v2893_v35 = vadd.f32 %v2892_v34, %v2891_v26  ;;  %v2782_v37 = vpop.f32.mrf.mxu0 }
 0x166   : > { %v1822_v41 = vadd.f32 %v2781_v33, %v634_v30  ;;  %v2894_v42 = vpop.f32.mrf.mxu1 }
 0x167   : > { %v2783_v43 = vpop.f32.mrf.mxu0 }
 0x168   : > { %v3905_v45 = vadd.f32 %v2893_v35, %v1822_v41  ;;  %v2784_v48 = vadd.f32 %v2783_v43, %v2782_v37  ;;  %v2895_v49 = vpop.f32.mrf.mxu1 }
 0x169   : > { %v2896_v50 = vadd.f32 %v2895_v49, %v2894_v42  ;;  %v2785_v53 = vpop.f32.mrf.mxu0 }
 0x16a   : > { %v1825_v54 = vadd.f32 %v2784_v48, %v639_v44  ;;  %v2897_v56 = vpop.f32.mrf.mxu1 }
 0x16b   : > { %v2786_v58 = vpop.f32.mrf.mxu0 }
 0x16c   : > { %v3907_v61 = vadd.f32 %v2896_v50, %v1825_v54  ;;  %v2787_v62 = vadd.f32 %v2786_v58, %v2785_v53  ;;  %v2898_v0 = vpop.f32.mrf.mxu1 }
 0x16d   : > { %v2899_v4 = vadd.f32 %v2898_v0, %v2897_v56  ;;  %v2788_v6 = vpop.f32.mrf.mxu0 }
 0x16e   : > { %v1830_v7 = vadd.f32 %v2787_v62, %v644_v60  ;;  %v2900_v8 = vpop.f32.mrf.mxu1 }
 0x16f   : > { %v2789_v9 = vpop.f32.mrf.mxu0 }
 0x170   : > { %v3909_v13 = vadd.f32 %v2899_v4, %v1830_v7  ;;  %v2790_v15 = vadd.f32 %v2789_v9, %v2788_v6  ;;  %v2901_v18 = vpop.f32.mrf.mxu1 }
 0x171   : > { %v2902_v20 = vadd.f32 %v2901_v18, %v2900_v8  ;;  %v2919_v21 = vpop.f32.mrf.mxu0 }
 0x172   : > { %v1833_v22 = vadd.f32 %v2790_v15, %v649_v10  ;;  %v3031_v24 = vpop.f32.mrf.mxu1 }
 0x173   : > { %v2920_v26 = vpop.f32.mrf.mxu0 }
 0x174   : > { %v3911_v28 = vadd.f32 %v2902_v20, %v1833_v22  ;;  %v2921_v30 = vadd.f32 %v2920_v26, %v2919_v21  ;;  %v3032_v33 = vpop.f32.mrf.mxu1 }
 0x175   : > { %v3033_v34 = vadd.f32 %v3032_v33, %v3031_v24  ;;  %v2922_v35 = vpop.f32.mrf.mxu0 }
 0x176   : > { %v2032_v37 = vadd.f32 %v2921_v30, %v3789_v3  ;;  %v3034_v41 = vpop.f32.mrf.mxu1 }
 0x177   : > { %v2923_v42 = vpop.f32.mrf.mxu0 }
 0x178   : > { %v3914_v43 = vadd.f32 %v3033_v34, %v2032_v37  ;;  %v2924_v44 = vadd.f32 %v2923_v42, %v2922_v35  ;;  %v3035_v48 = vpop.f32.mrf.mxu1 }
 0x179   : > { %v3036_v49 = vadd.f32 %v3035_v48, %v3034_v41  ;;  %v2925_v50 = vpop.f32.mrf.mxu0 }
 0x17a   : > { %v2035_v53 = vadd.f32 %v2924_v44, %v3797_v14  ;;  %v3037_v54 = vpop.f32.mrf.mxu1 }
 0x17b   : > { %v2926_v56 = vpop.f32.mrf.mxu0 }
 0x17c   : > { %v3917_v58 = vadd.f32 %v3036_v49, %v2035_v53  ;;  %v2927_v60 = vadd.f32 %v2926_v56, %v2925_v50  ;;  %v3038_v62 = vpop.f32.mrf.mxu1 }
 0x17d   : > { %v3039_v0 = vadd.f32 %v3038_v62, %v3037_v54  ;;  %v2928_v4 = vpop.f32.mrf.mxu0 }
 0x17e   : > { %v2040_v3 = vadd.f32 %v2927_v60, %v3805_v29  ;;  %v3040_v6 = vpop.f32.mrf.mxu1 }
 0x17f   : > { %v2929_v7 = vpop.f32.mrf.mxu0 }
 0x180   : > { %v3920_v8 = vadd.f32 %v3039_v0, %v2040_v3  ;;  %v2930_v9 = vadd.f32 %v2929_v7, %v2928_v4  ;;  %v3041_v10 = vpop.f32.mrf.mxu1 }
 0x181   : > { %v3042_v15 = vadd.f32 %v3041_v10, %v3040_v6  ;;  %v2931_v18 = vpop.f32.mrf.mxu0 }
 0x182   : > { %v2043_v14 = vadd.f32 %v2930_v9, %v3813_v40  ;;  %v3043_v20 = vpop.f32.mrf.mxu1 }
 0x183   : > { %v2932_v21 = vpop.f32.mrf.mxu0 }
 0x184   : > { %v3923_v22 = vadd.f32 %v3042_v15, %v2043_v14  ;;  %v2933_v24 = vadd.f32 %v2932_v21, %v2931_v18  ;;  %v3044_v26 = vpop.f32.mrf.mxu1 }
 0x185   : > { %v3045_v30 = vadd.f32 %v3044_v26, %v3043_v20  ;;  %v2934_v33 = vpop.f32.mrf.mxu0 }
 0x186   : > { %v2048_v29 = vadd.f32 %v2933_v24, %v3821_v55  ;;  %v3046_v34 = vpop.f32.mrf.mxu1 }
 0x187   : > { %v2935_v35 = vpop.f32.mrf.mxu0 }
 0x188   : > { %v3926_v37 = vadd.f32 %v3045_v30, %v2048_v29  ;;  %v2936_v41 = vadd.f32 %v2935_v35, %v2934_v33  ;;  %v3047_v42 = vpop.f32.mrf.mxu1 }
 0x189   : > { %v3048_v44 = vadd.f32 %v3047_v42, %v3046_v34  ;;  %v2937_v48 = vpop.f32.mrf.mxu0  ;;  %v2319_v42 = vmax.f32 %v3914_v43, 0.0 }
 0x18a   : > { %v2051_v40 = vadd.f32 %v2936_v41, %v3829_v2  ;;  %v3049_v49 = vpop.f32.mrf.mxu1 }
 0x18b   : > { %v2938_v50 = vpop.f32.mrf.mxu0 }
 0x18c   : > { %v3929_v53 = vadd.f32 %v3048_v44, %v2051_v40  ;;  %v2939_v54 = vadd.f32 %v2938_v50, %v2937_v48  ;;  %v3050_v56 = vpop.f32.mrf.mxu1 }
 0x18d   : > { %v3051_v60 = vadd.f32 %v3050_v56, %v3049_v49  ;;  %v2940_v62 = vpop.f32.mrf.mxu0 }
 0x18e   : > { %v2056_v55 = vadd.f32 %v2939_v54, %v3837_v19  ;;  %v3052_v0 = vpop.f32.mrf.mxu1 }
 0x18f   : > { %v2941_v4 = vpop.f32.mrf.mxu0 }
 0x190   : > { %v3932_v3 = vadd.f32 %v3051_v60, %v2056_v55  ;;  %v2942_v6 = vadd.f32 %v2941_v4, %v2940_v62  ;;  %v3053_v7 = vpop.f32.mrf.mxu1  ;;  %v2320_v62 = vmax.f32 %v3917_v58, 0.0 }
 0x191   : > { %v3054_v9 = vadd.f32 %v3053_v7, %v3052_v0  ;;  %v2943_v10 = vpop.f32.mrf.mxu0 }
 0x192   : > { %v2059_v2 = vadd.f32 %v2942_v6, %v3845_v31  ;;  %v3055_v15 = vpop.f32.mrf.mxu1 }
 0x193   : > { %v2944_v18 = vpop.f32.mrf.mxu0 }
 0x194   : > { %v3935_v14 = vadd.f32 %v3054_v9, %v2059_v2  ;;  %v2945_v20 = vadd.f32 %v2944_v18, %v2943_v10  ;;  %v3056_v21 = vpop.f32.mrf.mxu1 }
 0x195   : > { %v2946_v24 = vpop.f32.mrf.mxu0  ;;  %v3057_v19 = vadd.f32 %v3056_v21, %v3055_v15  ;;  %v2321_v15 = vmax.f32 %v3920_v8, 0.0 }
 0x196   : > { %v2064_v26 = vadd.f32 %v2945_v20, %v3853_v47  ;;  %v3058_v30 = vpop.f32.mrf.mxu1 }
 0x197   : > { %v2947_v33 = vpop.f32.mrf.mxu0 }
 0x198   : > { %v2225_v29 = vadd.f32 %v3057_v19, %v2064_v26  ;;  %v2948_v34 = vadd.f32 %v2947_v33, %v2946_v24  ;;  %v3059_v35 = vpop.f32.mrf.mxu1 }
 0x199   : > { %v2949_v41 = vpop.f32.mrf.mxu0  ;;  %v3060_v48 = vadd.f32 %v3059_v35, %v3058_v30 }
 0x19a   : > { %v2327_v44 = vmax.f32 %v2225_v29, 0.0  ;;  %v2067_v31 = vadd.f32 %v2948_v34, %v3861_v59  ;;  %v3061_v40 = vpop.f32.mrf.mxu1  ;;  %v2322_v29 = vmax.f32 %v3923_v22, 0.0 }
 0x19b   : > { %v2950_v49 = vpop.f32.mrf.mxu0 }
 0x19c   : > { %v3940_v50 = vadd.f32 %v2327_v44, %v2319_v42  ;;  %v2228_v54 = vadd.f32 %v3060_v48, %v2067_v31  ;;  %v2951_v56 = vadd.f32 %v2950_v49, %v2949_v41  ;;  %v3062_v47 = vpop.f32.mrf.mxu1  ;;  %v2323_v49 = vmax.f32 %v3926_v37, 0.0 }
 0x19d   : > { %v2952_v60 = vpop.f32.mrf.mxu0  ;;  %v3063_v4 = vadd.f32 %v3062_v47, %v3061_v40 }
 0x19e   : > { %v2328_v55 = vmax.f32 %v2228_v54, 0.0  ;;  %v2072_v0 = vadd.f32 %v2951_v56, %v3869_v12  ;;  %v3064_v6 = vpop.f32.mrf.mxu1 }
 0x19f   : > { %v2953_v43 = vpop.f32.mrf.mxu0 }
 0x1a0   : > { %v3944_v7 = vadd.f32 %v2328_v55, %v2320_v62  ;;  %v2233_v59 = vadd.f32 %v3063_v4, %v2072_v0  ;;  %v2954_v9 = vadd.f32 %v2953_v43, %v2952_v60  ;;  %v3065_v10 = vpop.f32.mrf.mxu1 }
 0x1a1   : > { %v2955_v2 = vpop.f32.mrf.mxu0  ;;  %v3066_v21 = vadd.f32 %v3065_v10, %v3064_v6  ;;  %v2324_v6 = vmax.f32 %v3929_v53, 0.0 }
 0x1a2   : > { %v2329_v18 = vmax.f32 %v2233_v59, 0.0  ;;  %v2075_v20 = vadd.f32 %v2954_v9, %v3871_v23  ;;  %v3067_v24 = vpop.f32.mrf.mxu1 }
 0x1a3   : > { %v2956_v58 = vpop.f32.mrf.mxu0 }
 0x1a4   : > { %v3948_v26 = vadd.f32 %v2329_v18, %v2321_v15  ;;  %v2236_v12 = vadd.f32 %v3066_v21, %v2075_v20  ;;  %v2957_v19 = vadd.f32 %v2956_v58, %v2955_v2  ;;  %v3068_v30 = vpop.f32.mrf.mxu1  ;;  %v2325_v21 = vmax.f32 %v3932_v3, 0.0 }
 0x1a5   : > { %v2958_v33 = vpop.f32.mrf.mxu0  ;;  %v3069_v41 = vadd.f32 %v3068_v30, %v3067_v24 }
 0x1a6   : > { %v2330_v34 = vmax.f32 %v2236_v12, 0.0  ;;  %v2080_v35 = vadd.f32 %v2957_v19, %v3873_v36  ;;  %v3070_v42 = vpop.f32.mrf.mxu1 }
 0x1a7   : > { %v2959_v8 = vpop.f32.mrf.mxu0 }
 0x1a8   : > { %v3952_v44 = vadd.f32 %v2330_v34, %v2322_v29  ;;  %v2241_v23 = vadd.f32 %v3069_v41, %v2080_v35  ;;  %v2960_v31 = vadd.f32 %v2959_v8, %v2958_v33  ;;  %v3071_v48 = vpop.f32.mrf.mxu1  ;;  %v2326_v35 = vmax.f32 %v3935_v14, 0.0 }
 0x1a9   : > { %v2961_v40 = vpop.f32.mrf.mxu0  ;;  %v3072_v47 = vadd.f32 %v3071_v48, %v3070_v42 }
 0x1aa   : > { %v2331_v54 = vmax.f32 %v2241_v23, 0.0  ;;  %v2083_v56 = vadd.f32 %v2960_v31, %v3875_v46  ;;  %v3073_v60 = vpop.f32.mrf.mxu1 }
 0x1ab   : > { %v2962_v22 = vpop.f32.mrf.mxu0 }
 0x1ac   : > { %v3956_v62 = vadd.f32 %v2331_v54, %v2323_v49  ;;  %v2244_v36 = vadd.f32 %v3072_v47, %v2083_v56  ;;  %v2963_v55 = vadd.f32 %v2962_v22, %v2961_v40  ;;  %v3074_v0 = vpop.f32.mrf.mxu1 }
 0x1ad   : > { %v2964_v4 = vpop.f32.mrf.mxu0  ;;  %v3075_v9 = vadd.f32 %v3074_v0, %v3073_v60 }
 0x1ae   : > { %v2332_v43 = vmax.f32 %v2244_v36, 0.0  ;;  %v2088_v59 = vadd.f32 %v2963_v55, %v3877_v57  ;;  %v3076_v10 = vpop.f32.mrf.mxu1 }
 0x1af   : > { %v2965_v37 = vpop.f32.mrf.mxu0 }
 0x1b0   : > { %v3960_v2 = vadd.f32 %v2332_v43, %v2324_v6  ;;  %v2249_v46 = vadd.f32 %v3075_v9, %v2088_v59  ;;  %v2966_v15 = vadd.f32 %v2965_v37, %v2964_v4  ;;  %v3077_v18 = vpop.f32.mrf.mxu1 }
 0x1b1   : > { %v2967_v20 = vpop.f32.mrf.mxu0  ;;  %v3078_v12 = vadd.f32 %v3077_v18, %v3076_v10 }
 0x1b2   : > { %v2333_v24 = vmax.f32 %v2249_v46, 0.0  ;;  %v2091_v58 = vadd.f32 %v2966_v15, %v3879_v5  ;;  %v3079_v19 = vpop.f32.mrf.mxu1 }
 0x1b3   : > { %v2968_v53 = vpop.f32.mrf.mxu0 }
 0x1b4   : > { %v3964_v30 = vadd.f32 %v2333_v24, %v2325_v21  ;;  %v2252_v57 = vadd.f32 %v3078_v12, %v2091_v58  ;;  %v2969_v33 = vadd.f32 %v2968_v53, %v2967_v20  ;;  %v3080_v29 = vpop.f32.mrf.mxu1 }
 0x1b5   : > { %v2970_v34 = vpop.f32.mrf.mxu0  ;;  %v3081_v8 = vadd.f32 %v3080_v29, %v3079_v19 }
 0x1b6   : > { %v2334_v41 = vmax.f32 %v2252_v57, 0.0  ;;  %v2096_v42 = vadd.f32 %v2969_v33, %v3881_v16  ;;  %v3082_v23 = vpop.f32.mrf.mxu1 }
 0x1b7   : > { %v2971_v3 = vpop.f32.mrf.mxu0 }
 0x1b8   : > { %v3968_v31 = vadd.f32 %v2334_v41, %v2326_v35  ;;  %v2257_v5 = vadd.f32 %v3081_v8, %v2096_v42  ;;  %v2972_v48 = vadd.f32 %v2971_v3, %v2970_v34  ;;  %v3083_v40 = vpop.f32.mrf.mxu1 }
 0x1b9   : > { %v2973_v49 = vpop.f32.mrf.mxu0  ;;  %v3084_v47 = vadd.f32 %v3083_v40, %v3082_v23 }
 0x1ba   : > { %v2335_v54 = vmax.f32 %v2257_v5, 0.0  ;;  %v2099_v56 = vadd.f32 %v2972_v48, %v3883_v27  ;;  %v3085_v60 = vpop.f32.mrf.mxu1 }
 0x1bb   : > { %v2974_v22 = vpop.f32.mrf.mxu0 }
 0x1bc   : > { %v3972_v14 = vadd.f32 %v3940_v50, %v2335_v54  ;;  %v2260_v36 = vadd.f32 %v3084_v47, %v2099_v56  ;;  %v2975_v16 = vadd.f32 %v2974_v22, %v2973_v49  ;;  %v3086_v55 = vpop.f32.mrf.mxu1 }
 0x1bd   : > { %v2976_v0 = vpop.f32.mrf.mxu0  ;;  %v3087_v43 = vadd.f32 %v3086_v55, %v3085_v60 }
 0x1be   : > { %v2336_v4 = vmax.f32 %v2260_v36, 0.0  ;;  %v2104_v6 = vadd.f32 %v2975_v16, %v3885_v39  ;;  %v3088_v59 = vpop.f32.mrf.mxu1 }
 0x1bf   : > { %v2977_v9 = vpop.f32.mrf.mxu0 }
 0x1c0   : > { %v3976_v10 = vadd.f32 %v3944_v7, %v2336_v4  ;;  %v2265_v27 = vadd.f32 %v3087_v43, %v2104_v6  ;;  %v2978_v37 = vadd.f32 %v2977_v9, %v2976_v0  ;;  %v3089_v46 = vpop.f32.mrf.mxu1 }
 0x1c1   : > { %v2979_v15 = vpop.f32.mrf.mxu0  ;;  %v3090_v20 = vadd.f32 %v3089_v46, %v3088_v59 }
 0x1c2   : > { %v2337_v18 = vmax.f32 %v2265_v27, 0.0  ;;  %v2107_v50 = vadd.f32 %v2978_v37, %v3887_v51  ;;  %v3091_v21 = vpop.f32.mrf.mxu1 }
 0x1c3   : > { %v2980_v24 = vpop.f32.mrf.mxu0 }
 0x1c4   : > { %v3980_v58 = vadd.f32 %v3948_v26, %v2337_v18  ;;  %v2268_v39 = vadd.f32 %v3090_v20, %v2107_v50  ;;  %v2981_v12 = vadd.f32 %v2980_v24, %v2979_v15  ;;  %v3092_v19 = vpop.f32.mrf.mxu1 }
 0x1c5   : > { %v2982_v53 = vpop.f32.mrf.mxu0  ;;  %v3093_v33 = vadd.f32 %v3092_v19, %v3091_v21 }
 0x1c6   : > { %v2338_v57 = vmax.f32 %v2268_v39, 0.0  ;;  %v2112_v7 = vadd.f32 %v2981_v12, %v3889_v63  ;;  %v3094_v29 = vpop.f32.mrf.mxu1 }
 0x1c7   : > { %v2983_v34 = vpop.f32.mrf.mxu0 }
 0x1c8   : > { %v3984_v35 = vadd.f32 %v3952_v44, %v2338_v57  ;;  %v2273_v51 = vadd.f32 %v3093_v33, %v2112_v7  ;;  %v2984_v41 = vadd.f32 %v2983_v34, %v2982_v53  ;;  %v3095_v42 = vpop.f32.mrf.mxu1 }
 0x1c9   : > { %v2985_v8 = vpop.f32.mrf.mxu0  ;;  %v3096_v3 = vadd.f32 %v3095_v42, %v3094_v29 }
 0x1ca   : > { %v2339_v23 = vmax.f32 %v2273_v51, 0.0  ;;  %v2115_v26 = vadd.f32 %v2984_v41, %v3891_v11  ;;  %v3097_v5 = vpop.f32.mrf.mxu1 }
 0x1cb   : > { %v2986_v48 = vpop.f32.mrf.mxu0 }
 0x1cc   : > { %v3988_v40 = vadd.f32 %v3956_v62, %v2339_v23  ;;  %v2276_v63 = vadd.f32 %v3096_v3, %v2115_v26  ;;  %v2987_v49 = vadd.f32 %v2986_v48, %v2985_v8  ;;  %v3098_v54 = vpop.f32.mrf.mxu1 }
 0x1cd   : > { %v2988_v56 = vpop.f32.mrf.mxu0  ;;  %v3099_v60 = vadd.f32 %v3098_v54, %v3097_v5 }
 0x1ce   : > { %v2340_v47 = vmax.f32 %v2276_v63, 0.0  ;;  %v2120_v44 = vadd.f32 %v2987_v49, %v3893_v25  ;;  %v3100_v22 = vpop.f32.mrf.mxu1 }
 0x1cf   : > { %v2989_v36 = vpop.f32.mrf.mxu0 }
 0x1d0   : > { %v3992_v16 = vadd.f32 %v3960_v2, %v2340_v47  ;;  %v2281_v11 = vadd.f32 %v3099_v60, %v2120_v44  ;;  %v2990_v55 = vadd.f32 %v2989_v36, %v2988_v56  ;;  %v3101_v0 = vpop.f32.mrf.mxu1 }
 0x1d1   : > { %v2991_v4 = vpop.f32.mrf.mxu0  ;;  %v3102_v43 = vadd.f32 %v3101_v0, %v3100_v22 }
 0x1d2   : > { %v2341_v6 = vmax.f32 %v2281_v11, 0.0  ;;  %v2123_v62 = vadd.f32 %v2990_v55, %v3895_v38  ;;  %v3103_v59 = vpop.f32.mrf.mxu1 }
 0x1d3   : > { %v2992_v9 = vpop.f32.mrf.mxu0 }
 0x1d4   : > { %v3996_v27 = vadd.f32 %v3964_v30, %v2341_v6  ;;  %v2284_v25 = vadd.f32 %v3102_v43, %v2123_v62  ;;  %v2993_v37 = vadd.f32 %v2992_v9, %v2991_v4  ;;  %v3104_v46 = vpop.f32.mrf.mxu1 }
 0x1d5   : > { %v2994_v15 = vpop.f32.mrf.mxu0  ;;  %v3105_v50 = vadd.f32 %v3104_v46, %v3103_v59 }
 0x1d6   : > { %v2342_v2 = vmax.f32 %v2284_v25, 0.0  ;;  %v2128_v18 = vadd.f32 %v2993_v37, %v3897_v52  ;;  %v3106_v20 = vpop.f32.mrf.mxu1 }
 0x1d7   : > { %v2995_v21 = vpop.f32.mrf.mxu0 }
 0x1d8   : > { %v4000_v24 = vadd.f32 %v3968_v31, %v2342_v2  ;;  %v2289_v38 = vadd.f32 %v3105_v50, %v2128_v18  ;;  %v2996_v39 = vadd.f32 %v2995_v21, %v2994_v15  ;;  %v3107_v12 = vpop.f32.mrf.mxu1 }
 0x1d9   : > { %v2997_v19 = vpop.f32.mrf.mxu0  ;;  %v3108_v57 = vadd.f32 %v3107_v12, %v3106_v20 }
 0x1da   : > { %v2343_v30 = vmax.f32 %v2289_v38, 0.0  ;;  %v2131_v53 = vadd.f32 %v2996_v39, %v3899_v1  ;;  %v3109_v7 = vpop.f32.mrf.mxu1 }
 0x1db   : > { %v2998_v33 = vpop.f32.mrf.mxu0 }
 0x1dc   : > { %v2367_v29 = vadd.f32 %v3972_v14, %v2343_v30  ;;  %v2292_v52 = vadd.f32 %v3108_v57, %v2131_v53  ;;  %v2999_v34 = vadd.f32 %v2998_v33, %v2997_v19  ;;  %v3110_v51 = vpop.f32.mrf.mxu1 }
 0x1dd   : > { %v3000_v31 = vpop.f32.mrf.mxu0  ;;  %v3111_v1 = vadd.f32 %v3110_v51, %v3109_v7 }
 0x1de   : > { %v2375_v41 = vmul.f32 0.25, %v2367_v29  ;;  %v2344_v42 = vmax.f32 %v2292_v52, 0.0  ;;  %v2136_v8 = vadd.f32 %v2999_v34, %v3901_v17  ;;  %v3112_v23 = vpop.f32.mrf.mxu1 }
 0x1df   : > { %v3001_v26 = vpop.f32.mrf.mxu0 }
 0x1e0   : > { %2383 = vst [vmem:[%s4008_s23] sm:$0xff] %v2375_v41  ;;  %v2368_v14 = vadd.f32 %v3976_v10, %v2344_v42  ;;  %v2297_v3 = vadd.f32 %v3111_v1, %v2136_v8  ;;  %v3002_v5 = vadd.f32 %v3001_v26, %v3000_v31  ;;  %v3113_v48 = vpop.f32.mrf.mxu1 }
 0x1e1   : > { %v3003_v63 = vpop.f32.mrf.mxu0  ;;  %v3114_v47 = vadd.f32 %v3113_v48, %v3112_v23 }
 0x1e2   : > { %v2376_v49 = vmul.f32 0.25, %v2368_v14  ;;  %v2345_v54 = vmax.f32 %v2297_v3, 0.0  ;;  %v2139_v56 = vadd.f32 %v3002_v5, %v3903_v32  ;;  %v3115_v44 = vpop.f32.mrf.mxu1 }
 0x1e3   : > { %v3004_v60 = vpop.f32.mrf.mxu0 }
 0x1e4   : > { %2384 = vst [vmem:[%s4008_s23 + $0x8] sm:$0xff] %v2376_v49  ;;  %v2369_v17 = vadd.f32 %v3980_v58, %v2345_v54  ;;  %v2300_v22 = vadd.f32 %v3114_v47, %v2139_v56  ;;  %v3005_v36 = vadd.f32 %v3004_v60, %v3003_v63  ;;  %v3116_v11 = vpop.f32.mrf.mxu1 }
 0x1e5   : > { %v3006_v55 = vpop.f32.mrf.mxu0  ;;  %v3117_v6 = vadd.f32 %v3116_v11, %v3115_v44 }
 0x1e6   : > { %v2377_v10 = vmul.f32 0.25, %v2369_v17  ;;  %v2346_v0 = vmax.f32 %v2300_v22, 0.0  ;;  %v2144_v4 = vadd.f32 %v3005_v36, %v3905_v45  ;;  %v3118_v62 = vpop.f32.mrf.mxu1 }
 0x1e7   : > { %v3007_v43 = vpop.f32.mrf.mxu0 }
 0x1e8   : > { %2385 = vst [vmem:[%s4008_s23 + $0x10] sm:$0xff] %v2377_v10  ;;  %v2370_v32 = vadd.f32 %v3984_v35, %v2346_v0  ;;  %v2305_v59 = vadd.f32 %v3117_v6, %v2144_v4  ;;  %v3008_v9 = vadd.f32 %v3007_v43, %v3006_v55  ;;  %v3119_v25 = vpop.f32.mrf.mxu1 }
 0x1e9   : > { %v3009_v37 = vpop.f32.mrf.mxu0  ;;  %v3120_v2 = vadd.f32 %v3119_v25, %v3118_v62 }
 0x1ea   : > { %v2378_v58 = vmul.f32 0.25, %v2370_v32  ;;  %v2347_v46 = vmax.f32 %v2305_v59, 0.0  ;;  %v2147_v15 = vadd.f32 %v3008_v9, %v3907_v61  ;;  %v3121_v18 = vpop.f32.mrf.mxu1 }
 0x1eb   : > { %v3010_v50 = vpop.f32.mrf.mxu0 }
 0x1ec   : > { %2386 = vst [vmem:[%s4008_s23 + $0x18] sm:$0xff] %v2378_v58  ;;  %v2371_v45 = vadd.f32 %v3988_v40, %v2347_v46  ;;  %v2308_v20 = vadd.f32 %v3120_v2, %v2147_v15  ;;  %v3011_v21 = vadd.f32 %v3010_v50, %v3009_v37  ;;  %v3122_v38 = vpop.f32.mrf.mxu1 }
 0x1ed   : > { %v3012_v39 = vpop.f32.mrf.mxu0  ;;  %v3123_v30 = vadd.f32 %v3122_v38, %v3121_v18 }
 0x1ee   : > { %v2379_v35 = vmul.f32 0.25, %v2371_v45  ;;  %v2348_v12 = vmax.f32 %v2308_v20, 0.0  ;;  %v2152_v19 = vadd.f32 %v3011_v21, %v3909_v13  ;;  %v3124_v53 = vpop.f32.mrf.mxu1 }
 0x1ef   : > { %v3013_v61 = vpop.f32.mrf.mxu0 }
 0x1f0   : > { %2387 = vst [vmem:[%s4008_s23 + $0x20] sm:$0xff] %v2379_v35  ;;  %v2372_v57 = vadd.f32 %v3992_v16, %v2348_v12  ;;  %v2313_v7 = vadd.f32 %v3123_v30, %v2152_v19  ;;  %v3014_v33 = vadd.f32 %v3013_v61, %v3012_v39  ;;  %v3125_v40 = vpop.f32.mrf.mxu1 }
 0x1f1   : > { %v3126_v51 = vadd.f32 %v3125_v40, %v3124_v53 }
 0x1f2   : > { %v2380_v29 = vmul.f32 0.25, %v2372_v57  ;;  %v2349_v52 = vmax.f32 %v2313_v7, 0.0  ;;  %v2155_v34 = vadd.f32 %v3014_v33, %v3911_v28 }
 0x1f4   : > { %2388 = vst [vmem:[%s4008_s23 + $0x28] sm:$0xff] %v2380_v29  ;;  %v2373_v31 = vadd.f32 %v3996_v27, %v2349_v52  ;;  %v2316_v13 = vadd.f32 %v3126_v51, %v2155_v34 }
 0x1f6   : > { %v2381_v41 = vmul.f32 0.25, %v2373_v31  ;;  %v2350_v42 = vmax.f32 %v2316_v13, 0.0 }
 0x1f8   : > { %2389 = vst [vmem:[%s4008_s23 + $0x30] sm:$0xff] %v2381_v41  ;;  %v2374_v8 = vadd.f32 %v4000_v24, %v2350_v42 }
 0x1fa   : > { %v2382_v1 = vmul.f32 0.25, %v2374_v8 }
 0x1fc   : > { %2390 = vst [vmem:[%s4008_s23 + $0x38] sm:$0xff] %v2382_v1 }
 0x1fd PF: > { %s13_s14 = sadd.s32 1, %s3240_s14   ;;  %s4044_s12 = smov %s3236_s13 }
 0x1fe   : > { %p10_p5 = scmp.ge.s32.totalorder %s13_s14, 4   ;;  %s4045_s13 = smov %s4047_s15 }
 0x200   :  { %12 = sbr.rel (!%p10_p5) target bundleno = 2 (0x2), region = 62 }

// kernel: convnet_forward.7
= control target key start
LH: loop header
LB: loop body
LE: loop exit
PB: predicated region body
PF: predicated region fallthrough
CT: control target
= control target key end

     0   :  { %v315_v1 = vmov 0   ;;  %vm27_vm0 = vcmask 1041408   ;;  %vm28_vm1 = vcmask 519170   ;;  %v316_v19 = vmov 0.0   ;;  %s421_s1 = inlined_call_operand.vmem [shape: bf16[128,192], index: 1, kind: input, shape index: {}]   ;;  %s422_s0 = inlined_call_operand.vmem [shape: bf16[2,128], index: 0, kind: input, shape index: {}]   ;;  %s423_s4 = inlined_call_operand.<no memory space> [shape: f32[1,1], index: 4, kind: input, shape index: {}]   ;;  %s424_s2 = inlined_call_operand.vmem [shape: f32[1,192], index: 2, kind: input, shape index: {}]   ;;  %s425_s3 = inlined_call_operand.vmem [shape: f32[1,192], index: 3, kind: input, shape index: {}]   ;;  %s426_s5 = inlined_call_operand.vmem [shape: f32[2,1], index: 5, kind: output, shape index: {}]  }
   0x1   :  { %v289_v0 = vld [vmem:[%s421_s1 + $0x74] ss:$8 sps:$4 sm:$0xff]   ;;  %161 = vmatprep.mubr.bf16.mxu0 %v315_v1  ;;  %v291_v2 = vld [vmem:[%s421_s1 + $0x70] ss:$8 sps:$4 sm:$0xff]   ;;  %v292_v3 = vld [vmem:[%s421_s1 + $0x64] ss:$8 sps:$4 sm:$0xff]   ;;  %v10_v20 = vstv %s423_s4  ;;  %v176_v23 = vlaneseq }
   0x2   :  { %129 = vmatprep.subr.bf16.mxu0 %v289_v0  ;;  %v294_v4 = vld [vmem:[%s421_s1 + $0x60] ss:$8 sps:$4 sm:$0xff]   ;;  %v295_v5 = vld [vmem:[%s421_s1 + $0x54] ss:$8 sps:$4 sm:$0xff]   ;;  %v297_v6 = vld [vmem:[%s421_s1 + $0x50] ss:$8 sps:$4 sm:$0xff]  }
   0x3   :  { %130 = vmatpush1.bf16.msra.mxu0 %v291_v2  ;;  %v298_v7 = vld [vmem:[%s421_s1 + $0x44] ss:$8 sps:$4 sm:$0xff]   ;;  %v300_v8 = vld [vmem:[%s421_s1 + $0x40] ss:$8 sps:$4 sm:$0xff]   ;;  %v301_v9 = vld [vmem:[%s421_s1 + $0x34] ss:$8 sps:$4 sm:$0xff]  }
   0x4   :  { %131 = vmatprep.subr.bf16.mxu0 %v292_v3  ;;  %v303_v10 = vld [vmem:[%s421_s1 + $0x30] ss:$8 sps:$4 sm:$0xff]   ;;  %v304_v11 = vld [vmem:[%s421_s1 + $0x24] ss:$8 sps:$4 sm:$0xff]   ;;  %v306_v12 = vld [vmem:[%s421_s1 + $0x20] ss:$8 sps:$4 sm:$0xff]  }
   0x5   :  { %v307_v13 = vld [vmem:[%s421_s1 + $0x14] ss:$8 sps:$4 sm:$0xff]   ;;  %v309_v14 = vld [vmem:[%s421_s1 + $0x10] ss:$8 sps:$4 sm:$0xff]   ;;  %v310_v15 = vld [vmem:[%s421_s1 + $0x4] ss:$8 sps:$4 sm:$0xff]  }
   0x6   :  { %v312_v16 = vld [vmem:[%s421_s1] ss:$8 sps:$4 sm:$0xff]   ;;  %vm400_vm2 = vmor %vm28_vm1, %vm27_vm0  ;;  %11 = vst [vmem:[#allocation3] sm:$0x1] %v10_v20  ;;  %v317_v21 = vmov 1983009808  }
   0x7   :  { %132 = vmatpush1.bf16.msra.mxu0 %v294_v4  ;;  %v32_v17 = vld [vmem:[%s422_s0] sm:$0x1]  ;;  %30 = vst.msk [vmem:[#allocation2] sm:$0xf] %vm400_vm2, %v316_v19  ;;  %v174_v22 = vunpack.c.l.s4 %v317_v21  ;;  %v177_v25 = vshrl.u32 %v176_v23, 7  ;;  %vm249_vm4 = vcmask 517120  }
   0x8   :  { %133 = vmatprep.subr.bf16.mxu0 %v295_v5  ;;  %v190_v31 = vld [vmem:[%s424_s2] sm:$0x3]  ;;  %vm262_vm5 = vcmask 1024  }
   0x9   :  { %v175_v24 = vunpack.c.0.s8 %v174_v22  ;;  %v194_v28 = vsub.s32 0, %v177_v25  ;;  %v198_v29 = vsub.s32 1, %v177_v25  ;;  %v217_v45 = vld [vmem:[%s425_s3] sm:$0x3] }
   0xb   :  { %134 = vmatpush1.bf16.msra.mxu0 %v297_v6  ;;  %v178_v27 = vsub.s32 %v175_v24, %v177_v25  ;;  %v195_v36 = vrot.slane %v190_v31, %v194_v28  ;;  %v199_v37 = vrot.slane %v190_v31, %v198_v29  ;;  %v222_v46 = vrot.slane %v217_v45, %v194_v28 }
   0xc   :  { %135 = vmatprep.subr.bf16.mxu0 %v298_v7  ;;  %v226_v47 = vrot.slane %v217_v45, %v198_v29 }
   0xd   :  { %v200_v40 = vcombine.low %v195_v36, %v199_v37  ;;  %v285_v61 = vld [vmem:[#allocation3] ss:$0 sm:$0xff] }
   0xe   :  { %v31_v34 = vld [vmem:[#allocation2] sm:$0xf]  ;;  %v227_v49 = vcombine.low %v222_v46, %v226_v47 }
   0xf   :  { %136 = vmatpush1.bf16.msra.mxu0 %v300_v8  ;;  %v207_v41 = vrot.slane %v200_v40, %v178_v27 }
  0x10   :  { %137 = vmatprep.subr.bf16.mxu0 %v301_v9  ;;  %v234_v52 = vrot.slane %v227_v49, %v178_v27 }
  0x13   :  { %138 = vmatpush1.bf16.msra.mxu0 %v303_v10 }
  0x14   :  { %139 = vmatprep.subr.bf16.mxu0 %v304_v11 }
  0x17   :  { %140 = vmatpush1.bf16.msra.mxu0 %v306_v12 }
  0x18   :  { %141 = vmatprep.subr.bf16.mxu0 %v307_v13 }
  0x1b   :  { %142 = vmatpush1.bf16.msra.mxu0 %v309_v14 }
  0x1c   :  { %143 = vmatprep.subr.bf16.mxu0 %v310_v15 }
  0x1f   :  { %144 = vmatpush1.bf16.msra.mxu0 %v312_v16 }
  0x22   :  { %162 = vmatmul.mubr.bf16.vlgmr.msra.gmra.mxu0 %v32_v17 }
  0xe2   :  { %v163_v26 = vpop.f32.mrf.mxu0 }
  0xe4   :  { %v165_v30 = vpop.f32.mrf.mxu0 }
  0xe5   :  { %v172_v32 = vcombine.low %v163_v26, %v165_v30 }
  0xe6   :  { %v167_v33 = vpop.f32.mrf.mxu0 }
  0xe7   :  { %v179_v35 = vrot.slane %v172_v32, %v178_v27 }
  0xe8   :  { %v168_v38 = vpop.f32.mrf.mxu0 }
  0xe9   :  { %v181_v39 = vadd.f32 %v179_v35, %v31_v34 }
  0xeb   :  { %185 = vst.msk [vmem:[#allocation2] sm:$0xf] %vm400_vm2, %v181_v39 }
  0xf2   :  { %v189_v42 = vld [vmem:[#allocation2] sm:$0xf] }
  0xf3   :  { %v209_v43 = vadd.f32 %v207_v41, %v189_v42 }
  0xf5   :  { %v211_v44 = vmul.f32 1.442695, %v209_v43  ;;  %vm210_vm3 = vcmp.gt.f32.partialorder %v209_v43, 0.0 }
  0xf7   :  { %313 = vpow2.f32 %v211_v44 }
 0x104   :  { %v314_v48 = vpop.eup %313 }
 0x105   :  { %v284_v50 = vadd.f32 -1.0, %v314_v48 }
 0x107   :  { %v214_v51 = vmul.f32 1.6732632, %v284_v50 }
 0x109   :  { %v215_v53 = vsel %vm210_vm3, %v209_v43, %v214_v51 }
 0x10a   :  { %v216_v54 = vmul.f32 1.050701, %v215_v53 }
 0x10c   :  { %v236_v55 = vmul.f32 %v234_v52, %v216_v54 }
 0x10e   :  { %v244_v56 = vrot.slane %v236_v55, %v178_v27 }
 0x110   :  { %v245_v57 = vcombine.high %v244_v56, %v244_v56  ;;  %v248_v58 = vsel %vm27_vm0, %v244_v56, 0.0 }
 0x112   :  { %v250_v59 = vsel %vm249_vm4, %v245_v57, 0.0 }
 0x113   :  { %v251_v60 = vadd.f32 %v250_v59, %v248_v58 }
 0x115   :  { %252 = vadd.xlane.f32.xlu0 %v251_v60 }
 0x19e   :  { %v253_v62 = vpop.xlane.xlu0 %252 }
 0x19f   :  { %v261_v63 = vadd.f32 %v285_v61, %v253_v62 }
 0x1a1   :  { %263 = vst.msk [vmem:[%s426_s5] sm:$0x3] %vm262_vm5, %v261_v63 }

</bundles_post_ra>
